<compile_context>
chip_gen: v6e
topology: v6e:2x2x1
jax: 0.10.0
libtpu: 0.0.40
codegen_flags: <defaults>
</compile_context>

<pallas_src>
import functools

import jax
import jax.numpy as jnp
from jax.experimental import pallas as pl
from jax.experimental.pallas import tpu as pltpu

LANES = 128
CHUNK = 8                     # groups per unrolled inner step (~32 KiB/input)
MAX_GROUPS_PER_BLOCK = 512    # 512 groups * 4 KiB = 2 MiB per input block
SMALL_N = 1 << 18             # below this, plain XLA beats a kernel launch


def _sublanes_for(dtype):
    # 8 sublanes per group for 4-byte dtypes, 16 for 2-byte, 32 for 1-byte,
    # so a group is always a full (SUB, 128) native tile of 4 KiB.
    itemsize = jnp.dtype(dtype).itemsize
    return max(8, 32 // itemsize)


def _charbonnier_kernel(x_ref, y_ref, out_ref, *, eps, chunk):
    # x_ref / y_ref: (tm_groups, SUB, 128); out_ref: (1, SUB, 128), resident
    # across the inner (reduction) grid axis.
    i = pl.program_id(1)

    @pl.when(i == 0)
    def _():
        out_ref[...] = jnp.zeros_like(out_ref)

    n_chunks = x_ref.shape[0] // chunk  # wrapper guarantees exact divisibility

    def body(c, acc):
        start = pl.multiple_of(c * chunk, chunk)
        x = x_ref[pl.ds(start, chunk)].astype(jnp.float32)
        y = y_ref[pl.ds(start, chunk)].astype(jnp.float32)
        d = x - y
        err = jnp.sqrt(d * d + eps)
        # Reduce only the leading (vreg-count) axis: VPU adds, no cross-lane moves.
        return acc + jnp.sum(err, axis=0, keepdims=True)

    acc0 = jnp.zeros(out_ref.shape, jnp.float32)
    acc = jax.lax.fori_loop(0, n_chunks, body, acc0, unroll=True)
    out_ref[...] += acc


def l1_charbonnier_loss(x, y, eps=1e-6):
    # TODO(synk): torch's _assert_no_grad(target) has no JAX equivalent (no
    # per-tensor requires_grad); forward semantics are unaffected.
    assert x.shape == y.shape
    n = x.size
    eps = float(eps)

    def _plain(xa, ya):
        d = xa.astype(jnp.float32) - ya.astype(jnp.float32)
        return jnp.mean(jnp.sqrt(d * d + eps)).astype(jnp.float32)

    if n < SMALL_N:
        return _plain(x, y)

    if y.dtype != x.dtype:
        y = y.astype(x.dtype)

    sub = _sublanes_for(x.dtype)
    group = sub * LANES
    pad = (-n) % group

    xf = x.reshape(-1)
    yf = y.reshape(-1)
    if pad:
        # Only pay this copy when n isn't group-aligned; padded zeros each
        # contribute exactly sqrt(eps), subtracted analytically below.
        xf = jnp.pad(xf, (0, pad))
        yf = jnp.pad(yf, (0, pad))
    g = (n + pad) // group
    xg = xf.reshape(g, sub, LANES)   # free reshape (contiguous)
    yg = yf.reshape(g, sub, LANES)

    # Split across 2 TensorCores (v7x) whenever there is enough work; spread
    # groups evenly over blocks so the jnp tail stays tiny.
    splits = 2 if g >= 2 * CHUNK else 1
    gs = g // splits
    tiles_per_split = max(1, pl.cdiv(gs, MAX_GROUPS_PER_BLOCK))
    tm_groups = (gs // tiles_per_split) // CHUNK * CHUNK
    if tm_groups == 0:  # safety net; unreachable above SMALL_N
        return _plain(x, y)
    covered_groups = splits * tiles_per_split * tm_groups
    covered_elems = covered_groups * group
    itemsize = jnp.dtype(x.dtype).itemsize

    kernel = functools.partial(_charbonnier_kernel, eps=eps, chunk=CHUNK)
    in_map = lambda s, i: (s * tiles_per_split + i, 0, 0)

    partials = pl.pallas_call(
        kernel,
        out_shape=jax.ShapeDtypeStruct((splits, sub, LANES), jnp.float32),
        grid_spec=pltpu.PrefetchScalarGridSpec(
            num_scalar_prefetch=0,
            grid=(splits, tiles_per_split),
            in_specs=[
                pl.BlockSpec((tm_groups, sub, LANES), in_map),
                pl.BlockSpec((tm_groups, sub, LANES), in_map),
            ],
            out_specs=pl.BlockSpec((1, sub, LANES), lambda s, i: (s, 0, 0)),
        ),
        compiler_params=pltpu.CompilerParams(
            dimension_semantics=("parallel", "arbitrary"),
            vmem_limit_bytes=32 * 1024 * 1024,
        ),
        cost_estimate=pl.CostEstimate(
            flops=4 * covered_elems,
            transcendentals=covered_elems,
            bytes_accessed=2 * covered_elems * itemsize + splits * sub * LANES * 4,
        ),
    )(xg, yg)

    total = jnp.sum(partials, dtype=jnp.float32)

    if covered_groups < g:
        # Tiny jnp tail: leftover whole groups past the block-aligned coverage.
        xt = xg[covered_groups:].astype(jnp.float32)
        yt = yg[covered_groups:].astype(jnp.float32)
        dt = xt - yt
        total = total + jnp.sum(jnp.sqrt(dt * dt + eps), dtype=jnp.float32)

    if pad:
        total = total - jnp.float32(pad * (eps ** 0.5))

    return (total / n).astype(jnp.float32)


if __name__ == "__main__":
    def ref_loss(x, y, eps=1e-6):
        d = x.astype(jnp.float32) - y.astype(jnp.float32)
        return jnp.mean(jnp.sqrt(d * d + eps))

    checks = []

    # 1) Small shape from the module spec (fast path).
    k1, k2 = jax.random.split(jax.random.PRNGKey(0))
    checks.append((jax.random.normal(k1, (2, 4, 16, 16), dtype=jnp.float32),
                   jax.random.normal(k2, (2, 4, 16, 16), dtype=jnp.float32)))

    # 2) Group-aligned shape that exercises the Pallas kernel (524288 elems,
    #    grid (2, 1), zero-copy reshape, no tail).
    k3, k4 = jax.random.split(jax.random.PRNGKey(1))
    checks.append((jax.random.normal(k3, (2, 4, 256, 256), dtype=jnp.float32),
                   jax.random.normal(k4, (2, 4, 256, 256), dtype=jnp.float32)))

    # 3) Unaligned element count (275370): exercises pad-correction + jnp tail.
    k5, k6 = jax.random.split(jax.random.PRNGKey(2))
    checks.append((jax.random.normal(k5, (3, 5, 134, 137), dtype=jnp.float32),
                   jax.random.normal(k6, (3, 5, 134, 137), dtype=jnp.float32)))

    for xi, yi in checks:
        out = l1_charbonnier_loss(xi, yi)
        jax.block_until_ready(out)
        ref = ref_loss(xi, yi)
        assert jnp.allclose(out, ref, rtol=1e-5, atol=1e-6), (xi.shape, out, ref)

    print("KERNEL_OK")
</pallas_src>

<mosaic_0001>
module attributes {stable_mosaic.version = 11 : i64} {
  func.func @_charbonnier_kernel(%arg0: i32, %arg1: i32, %arg2: memref<256x8x128xf32, #tpu.memory_space<vmem>>, %arg3: memref<256x8x128xf32, #tpu.memory_space<vmem>>, %arg4: memref<1x8x128xf32, #tpu.memory_space<vmem>>) attributes {dimension_semantics = [#tpu.dimension_semantics<parallel>, #tpu.dimension_semantics<arbitrary>], iteration_bounds = array<i64: 2, 1>, scalar_prefetch = 0 : i64, scratch_operands = 0 : i64, tpu.core_type = #tpu.core_type<tc>, window_params = [{transform_indices = @transform_0, window_bounds = array<i64: 256, 8, 128>}, {transform_indices = @transform_1, window_bounds = array<i64: 256, 8, 128>}, {transform_indices = @transform_2, window_bounds = array<i64: 1, 8, 128>}]} {
    %c0_i32 = arith.constant 0 : i32
    %0 = arith.cmpi eq, %arg1, %c0_i32 : i32
    %1 = arith.extui %0 : i1 to i32
    %c0_i32_0 = arith.constant 0 : i32
    %2 = arith.cmpi ne, %1, %c0_i32_0 : i32
    scf.if %2 {
      %cst_231 = arith.constant 0.000000e+00 : f32
      %455 = vector.broadcast %cst_231 : f32 to vector<1x8x128xf32>
      %c0_232 = arith.constant 0 : index
      %c0_233 = arith.constant 0 : index
      %c0_234 = arith.constant 0 : index
      %456 = vector.load %arg4[%c0_232, %c0_233, %c0_234] : memref<1x8x128xf32, #tpu.memory_space<vmem>>, vector<1x8x128xf32>
      tpu.vector_store %arg4[%c0_232, %c0_233, %c0_234], %455 {strides = array<i32>} : memref<1x8x128xf32, #tpu.memory_space<vmem>>, vector<1x8x128xf32>,
    } else {
    }
    %cst = arith.constant 0.000000e+00 : f32
    %3 = vector.broadcast %cst : f32 to vector<1x8x128xf32>
    %c0_i32_1 = arith.constant 0 : i32
    %c8_i32 = arith.constant 8 : i32
    %4 = arith.muli %c0_i32_1, %c8_i32 : i32
    %5 = tpu.assume_multiple %4, 8 : i32
    %6 = arith.index_cast %5 : i32 to index
    %c0 = arith.constant 0 : index
    %c0_2 = arith.constant 0 : index
    %7 = vector.load %arg2[%6, %c0, %c0_2] : memref<256x8x128xf32, #tpu.memory_space<vmem>>, vector<8x8x128xf32>
    %8 = arith.index_cast %5 : i32 to index
    %c0_3 = arith.constant 0 : index
    %c0_4 = arith.constant 0 : index
    %9 = vector.load %arg3[%8, %c0_3, %c0_4] : memref<256x8x128xf32, #tpu.memory_space<vmem>>, vector<8x8x128xf32>
    %10 = arith.subf %7, %9 : vector<8x8x128xf32>
    %11 = arith.mulf %10, %10 : vector<8x8x128xf32>
    %cst_5 = arith.constant 9.99999997E-7 : f32
    %12 = vector.broadcast %cst_5 : f32 to vector<8x8x128xf32>
    %13 = arith.addf %11, %12 : vector<8x8x128xf32>
    %14 = math.sqrt %13 : vector<8x8x128xf32>
    %cst_6 = arith.constant dense<0.000000e+00> : vector<8x128xf32>
    %15 = vector.multi_reduction <add>, %14, %cst_6 [0] : vector<8x8x128xf32> to vector<8x128xf32>
    %16 = vector.shape_cast %15 : vector<8x128xf32> to vector<1x8x128xf32>
    %17 = arith.addf %3, %16 : vector<1x8x128xf32>
    %c1_i32 = arith.constant 1 : i32
    %c8_i32_7 = arith.constant 8 : i32
    %18 = arith.muli %c1_i32, %c8_i32_7 : i32
    %19 = tpu.assume_multiple %18, 8 : i32
    %20 = arith.index_cast %19 : i32 to index
    %c0_8 = arith.constant 0 : index
    %c0_9 = arith.constant 0 : index
    %21 = vector.load %arg2[%20, %c0_8, %c0_9] : memref<256x8x128xf32, #tpu.memory_space<vmem>>, vector<8x8x128xf32>
    %22 = arith.index_cast %19 : i32 to index
    %c0_10 = arith.constant 0 : index
    %c0_11 = arith.constant 0 : index
    %23 = vector.load %arg3[%22, %c0_10, %c0_11] : memref<256x8x128xf32, #tpu.memory_space<vmem>>, vector<8x8x128xf32>
    %24 = arith.subf %21, %23 : vector<8x8x128xf32>
    %25 = arith.mulf %24, %24 : vector<8x8x128xf32>
    %cst_12 = arith.constant 9.99999997E-7 : f32
    %26 = vector.broadcast %cst_12 : f32 to vector<8x8x128xf32>
    %27 = arith.addf %25, %26 : vector<8x8x128xf32>
    %28 = math.sqrt %27 : vector<8x8x128xf32>
    %cst_13 = arith.constant dense<0.000000e+00> : vector<8x128xf32>
    %29 = vector.multi_reduction <add>, %28, %cst_13 [0] : vector<8x8x128xf32> to vector<8x128xf32>
    %30 = vector.shape_cast %29 : vector<8x128xf32> to vector<1x8x128xf32>
    %31 = arith.addf %17, %30 : vector<1x8x128xf32>
    %c2_i32 = arith.constant 2 : i32
    %c8_i32_14 = arith.constant 8 : i32
    %32 = arith.muli %c2_i32, %c8_i32_14 : i32
    %33 = tpu.assume_multiple %32, 8 : i32
    %34 = arith.index_cast %33 : i32 to index
    %c0_15 = arith.constant 0 : index
    %c0_16 = arith.constant 0 : index
    %35 = vector.load %arg2[%34, %c0_15, %c0_16] : memref<256x8x128xf32, #tpu.memory_space<vmem>>, vector<8x8x128xf32>
    %36 = arith.index_cast %33 : i32 to index
    %c0_17 = arith.constant 0 : index
    %c0_18 = arith.constant 0 : index
    %37 = vector.load %arg3[%36, %c0_17, %c0_18] : memref<256x8x128xf32, #tpu.memory_space<vmem>>, vector<8x8x128xf32>
    %38 = arith.subf %35, %37 : vector<8x8x128xf32>
    %39 = arith.mulf %38, %38 : vector<8x8x128xf32>
    %cst_19 = arith.constant 9.99999997E-7 : f32
    %40 = vector.broadcast %cst_19 : f32 to vector<8x8x128xf32>
    %41 = arith.addf %39, %40 : vector<8x8x128xf32>
    %42 = math.sqrt %41 : vector<8x8x128xf32>
    %cst_20 = arith.constant dense<0.000000e+00> : vector<8x128xf32>
    %43 = vector.multi_reduction <add>, %42, %cst_20 [0] : vector<8x8x128xf32> to vector<8x128xf32>
    %44 = vector.shape_cast %43 : vector<8x128xf32> to vector<1x8x128xf32>
    %45 = arith.addf %31, %44 : vector<1x8x128xf32>
    %c3_i32 = arith.constant 3 : i32
    %c8_i32_21 = arith.constant 8 : i32
    %46 = arith.muli %c3_i32, %c8_i32_21 : i32
    %47 = tpu.assume_multiple %46, 8 : i32
    %48 = arith.index_cast %47 : i32 to index
    %c0_22 = arith.constant 0 : index
    %c0_23 = arith.constant 0 : index
    %49 = vector.load %arg2[%48, %c0_22, %c0_23] : memref<256x8x128xf32, #tpu.memory_space<vmem>>, vector<8x8x128xf32>
    %50 = arith.index_cast %47 : i32 to index
    %c0_24 = arith.constant 0 : index
    %c0_25 = arith.constant 0 : index
    %51 = vector.load %arg3[%50, %c0_24, %c0_25] : memref<256x8x128xf32, #tpu.memory_space<vmem>>, vector<8x8x128xf32>
    %52 = arith.subf %49, %51 : vector<8x8x128xf32>
    %53 = arith.mulf %52, %52 : vector<8x8x128xf32>
    %cst_26 = arith.constant 9.99999997E-7 : f32
    %54 = vector.broadcast %cst_26 : f32 to vector<8x8x128xf32>
    %55 = arith.addf %53, %54 : vector<8x8x128xf32>
    %56 = math.sqrt %55 : vector<8x8x128xf32>
    %cst_27 = arith.constant dense<0.000000e+00> : vector<8x128xf32>
    %57 = vector.multi_reduction <add>, %56, %cst_27 [0] : vector<8x8x128xf32> to vector<8x128xf32>
    %58 = vector.shape_cast %57 : vector<8x128xf32> to vector<1x8x128xf32>
    %59 = arith.addf %45, %58 : vector<1x8x128xf32>
    %c4_i32 = arith.constant 4 : i32
    %c8_i32_28 = arith.constant 8 : i32
    %60 = arith.muli %c4_i32, %c8_i32_28 : i32
    %61 = tpu.assume_multiple %60, 8 : i32
    %62 = arith.index_cast %61 : i32 to index
    %c0_29 = arith.constant 0 : index
    %c0_30 = arith.constant 0 : index
    %63 = vector.load %arg2[%62, %c0_29, %c0_30] : memref<256x8x128xf32, #tpu.memory_space<vmem>>, vector<8x8x128xf32>
    %64 = arith.index_cast %61 : i32 to index
    %c0_31 = arith.constant 0 : index
    %c0_32 = arith.constant 0 : index
    %65 = vector.load %arg3[%64, %c0_31, %c0_32] : memref<256x8x128xf32, #tpu.memory_space<vmem>>, vector<8x8x128xf32>
    %66 = arith.subf %63, %65 : vector<8x8x128xf32>
    %67 = arith.mulf %66, %66 : vector<8x8x128xf32>
    %cst_33 = arith.constant 9.99999997E-7 : f32
    %68 = vector.broadcast %cst_33 : f32 to vector<8x8x128xf32>
    %69 = arith.addf %67, %68 : vector<8x8x128xf32>
    %70 = math.sqrt %69 : vector<8x8x128xf32>
    %cst_34 = arith.constant dense<0.000000e+00> : vector<8x128xf32>
    %71 = vector.multi_reduction <add>, %70, %cst_34 [0] : vector<8x8x128xf32> to vector<8x128xf32>
    %72 = vector.shape_cast %71 : vector<8x128xf32> to vector<1x8x128xf32>
    %73 = arith.addf %59, %72 : vector<1x8x128xf32>
    %c5_i32 = arith.constant 5 : i32
    %c8_i32_35 = arith.constant 8 : i32
    %74 = arith.muli %c5_i32, %c8_i32_35 : i32
    %75 = tpu.assume_multiple %74, 8 : i32
    %76 = arith.index_cast %75 : i32 to index
    %c0_36 = arith.constant 0 : index
    %c0_37 = arith.constant 0 : index
    %77 = vector.load %arg2[%76, %c0_36, %c0_37] : memref<256x8x128xf32, #tpu.memory_space<vmem>>, vector<8x8x128xf32>
    %78 = arith.index_cast %75 : i32 to index
    %c0_38 = arith.constant 0 : index
    %c0_39 = arith.constant 0 : index
    %79 = vector.load %arg3[%78, %c0_38, %c0_39] : memref<256x8x128xf32, #tpu.memory_space<vmem>>, vector<8x8x128xf32>
    %80 = arith.subf %77, %79 : vector<8x8x128xf32>
    %81 = arith.mulf %80, %80 : vector<8x8x128xf32>
    %cst_40 = arith.constant 9.99999997E-7 : f32
    %82 = vector.broadcast %cst_40 : f32 to vector<8x8x128xf32>
    %83 = arith.addf %81, %82 : vector<8x8x128xf32>
    %84 = math.sqrt %83 : vector<8x8x128xf32>
    %cst_41 = arith.constant dense<0.000000e+00> : vector<8x128xf32>
    %85 = vector.multi_reduction <add>, %84, %cst_41 [0] : vector<8x8x128xf32> to vector<8x128xf32>
    %86 = vector.shape_cast %85 : vector<8x128xf32> to vector<1x8x128xf32>
    %87 = arith.addf %73, %86 : vector<1x8x128xf32>
    %c6_i32 = arith.constant 6 : i32
    %c8_i32_42 = arith.constant 8 : i32
    %88 = arith.muli %c6_i32, %c8_i32_42 : i32
    %89 = tpu.assume_multiple %88, 8 : i32
    %90 = arith.index_cast %89 : i32 to index
    %c0_43 = arith.constant 0 : index
    %c0_44 = arith.constant 0 : index
    %91 = vector.load %arg2[%90, %c0_43, %c0_44] : memref<256x8x128xf32, #tpu.memory_space<vmem>>, vector<8x8x128xf32>
    %92 = arith.index_cast %89 : i32 to index
    %c0_45 = arith.constant 0 : index
    %c0_46 = arith.constant 0 : index
    %93 = vector.load %arg3[%92, %c0_45, %c0_46] : memref<256x8x128xf32, #tpu.memory_space<vmem>>, vector<8x8x128xf32>
    %94 = arith.subf %91, %93 : vector<8x8x128xf32>
    %95 = arith.mulf %94, %94 : vector<8x8x128xf32>
    %cst_47 = arith.constant 9.99999997E-7 : f32
    %96 = vector.broadcast %cst_47 : f32 to vector<8x8x128xf32>
    %97 = arith.addf %95, %96 : vector<8x8x128xf32>
    %98 = math.sqrt %97 : vector<8x8x128xf32>
    %cst_48 = arith.constant dense<0.000000e+00> : vector<8x128xf32>
    %99 = vector.multi_reduction <add>, %98, %cst_48 [0] : vector<8x8x128xf32> to vector<8x128xf32>
    %100 = vector.shape_cast %99 : vector<8x128xf32> to vector<1x8x128xf32>
    %101 = arith.addf %87, %100 : vector<1x8x128xf32>
    %c7_i32 = arith.constant 7 : i32
    %c8_i32_49 = arith.constant 8 : i32
    %102 = arith.muli %c7_i32, %c8_i32_49 : i32
    %103 = tpu.assume_multiple %102, 8 : i32
    %104 = arith.index_cast %103 : i32 to index
    %c0_50 = arith.constant 0 : index
    %c0_51 = arith.constant 0 : index
    %105 = vector.load %arg2[%104, %c0_50, %c0_51] : memref<256x8x128xf32, #tpu.memory_space<vmem>>, vector<8x8x128xf32>
    %106 = arith.index_cast %103 : i32 to index
    %c0_52 = arith.constant 0 : index
    %c0_53 = arith.constant 0 : index
    %107 = vector.load %arg3[%106, %c0_52, %c0_53] : memref<256x8x128xf32, #tpu.memory_space<vmem>>, vector<8x8x128xf32>
    %108 = arith.subf %105, %107 : vector<8x8x128xf32>
    %109 = arith.mulf %108, %108 : vector<8x8x128xf32>
    %cst_54 = arith.constant 9.99999997E-7 : f32
    %110 = vector.broadcast %cst_54 : f32 to vector<8x8x128xf32>
    %111 = arith.addf %109, %110 : vector<8x8x128xf32>
    %112 = math.sqrt %111 : vector<8x8x128xf32>
    %cst_55 = arith.constant dense<0.000000e+00> : vector<8x128xf32>
    %113 = vector.multi_reduction <add>, %112, %cst_55 [0] : vector<8x8x128xf32> to vector<8x128xf32>
    %114 = vector.shape_cast %113 : vector<8x128xf32> to vector<1x8x128xf32>
    %115 = arith.addf %101, %114 : vector<1x8x128xf32>
    %c8_i32_56 = arith.constant 8 : i32
    %c8_i32_57 = arith.constant 8 : i32
    %116 = arith.muli %c8_i32_56, %c8_i32_57 : i32
    %117 = tpu.assume_multiple %116, 8 : i32
    %118 = arith.index_cast %117 : i32 to index
    %c0_58 = arith.constant 0 : index
    %c0_59 = arith.constant 0 : index
    %119 = vector.load %arg2[%118, %c0_58, %c0_59] : memref<256x8x128xf32, #tpu.memory_space<vmem>>, vector<8x8x128xf32>
    %120 = arith.index_cast %117 : i32 to index
    %c0_60 = arith.constant 0 : index
    %c0_61 = arith.constant 0 : index
    %121 = vector.load %arg3[%120, %c0_60, %c0_61] : memref<256x8x128xf32, #tpu.memory_space<vmem>>, vector<8x8x128xf32>
    %122 = arith.subf %119, %121 : vector<8x8x128xf32>
    %123 = arith.mulf %122, %122 : vector<8x8x128xf32>
    %cst_62 = arith.constant 9.99999997E-7 : f32
    %124 = vector.broadcast %cst_62 : f32 to vector<8x8x128xf32>
    %125 = arith.addf %123, %124 : vector<8x8x128xf32>
    %126 = math.sqrt %125 : vector<8x8x128xf32>
    %cst_63 = arith.constant dense<0.000000e+00> : vector<8x128xf32>
    %127 = vector.multi_reduction <add>, %126, %cst_63 [0] : vector<8x8x128xf32> to vector<8x128xf32>
    %128 = vector.shape_cast %127 : vector<8x128xf32> to vector<1x8x128xf32>
    %129 = arith.addf %115, %128 : vector<1x8x128xf32>
    %c9_i32 = arith.constant 9 : i32
    %c8_i32_64 = arith.constant 8 : i32
    %130 = arith.muli %c9_i32, %c8_i32_64 : i32
    %131 = tpu.assume_multiple %130, 8 : i32
    %132 = arith.index_cast %131 : i32 to index
    %c0_65 = arith.constant 0 : index
    %c0_66 = arith.constant 0 : index
    %133 = vector.load %arg2[%132, %c0_65, %c0_66] : memref<256x8x128xf32, #tpu.memory_space<vmem>>, vector<8x8x128xf32>
    %134 = arith.index_cast %131 : i32 to index
    %c0_67 = arith.constant 0 : index
    %c0_68 = arith.constant 0 : index
    %135 = vector.load %arg3[%134, %c0_67, %c0_68] : memref<256x8x128xf32, #tpu.memory_space<vmem>>, vector<8x8x128xf32>
    %136 = arith.subf %133, %135 : vector<8x8x128xf32>
    %137 = arith.mulf %136, %136 : vector<8x8x128xf32>
    %cst_69 = arith.constant 9.99999997E-7 : f32
    %138 = vector.broadcast %cst_69 : f32 to vector<8x8x128xf32>
    %139 = arith.addf %137, %138 : vector<8x8x128xf32>
    %140 = math.sqrt %139 : vector<8x8x128xf32>
    %cst_70 = arith.constant dense<0.000000e+00> : vector<8x128xf32>
    %141 = vector.multi_reduction <add>, %140, %cst_70 [0] : vector<8x8x128xf32> to vector<8x128xf32>
    %142 = vector.shape_cast %141 : vector<8x128xf32> to vector<1x8x128xf32>
    %143 = arith.addf %129, %142 : vector<1x8x128xf32>
    %c10_i32 = arith.constant 10 : i32
    %c8_i32_71 = arith.constant 8 : i32
    %144 = arith.muli %c10_i32, %c8_i32_71 : i32
    %145 = tpu.assume_multiple %144, 8 : i32
    %146 = arith.index_cast %145 : i32 to index
    %c0_72 = arith.constant 0 : index
    %c0_73 = arith.constant 0 : index
    %147 = vector.load %arg2[%146, %c0_72, %c0_73] : memref<256x8x128xf32, #tpu.memory_space<vmem>>, vector<8x8x128xf32>
    %148 = arith.index_cast %145 : i32 to index
    %c0_74 = arith.constant 0 : index
    %c0_75 = arith.constant 0 : index
    %149 = vector.load %arg3[%148, %c0_74, %c0_75] : memref<256x8x128xf32, #tpu.memory_space<vmem>>, vector<8x8x128xf32>
    %150 = arith.subf %147, %149 : vector<8x8x128xf32>
    %151 = arith.mulf %150, %150 : vector<8x8x128xf32>
    %cst_76 = arith.constant 9.99999997E-7 : f32
    %152 = vector.broadcast %cst_76 : f32 to vector<8x8x128xf32>
    %153 = arith.addf %151, %152 : vector<8x8x128xf32>
    %154 = math.sqrt %153 : vector<8x8x128xf32>
    %cst_77 = arith.constant dense<0.000000e+00> : vector<8x128xf32>
    %155 = vector.multi_reduction <add>, %154, %cst_77 [0] : vector<8x8x128xf32> to vector<8x128xf32>
    %156 = vector.shape_cast %155 : vector<8x128xf32> to vector<1x8x128xf32>
    %157 = arith.addf %143, %156 : vector<1x8x128xf32>
    %c11_i32 = arith.constant 11 : i32
    %c8_i32_78 = arith.constant 8 : i32
    %158 = arith.muli %c11_i32, %c8_i32_78 : i32
    %159 = tpu.assume_multiple %158, 8 : i32
    %160 = arith.index_cast %159 : i32 to index
    %c0_79 = arith.constant 0 : index
    %c0_80 = arith.constant 0 : index
    %161 = vector.load %arg2[%160, %c0_79, %c0_80] : memref<256x8x128xf32, #tpu.memory_space<vmem>>, vector<8x8x128xf32>
    %162 = arith.index_cast %159 : i32 to index
    %c0_81 = arith.constant 0 : index
    %c0_82 = arith.constant 0 : index
    %163 = vector.load %arg3[%162, %c0_81, %c0_82] : memref<256x8x128xf32, #tpu.memory_space<vmem>>, vector<8x8x128xf32>
    %164 = arith.subf %161, %163 : vector<8x8x128xf32>
    %165 = arith.mulf %164, %164 : vector<8x8x128xf32>
    %cst_83 = arith.constant 9.99999997E-7 : f32
    %166 = vector.broadcast %cst_83 : f32 to vector<8x8x128xf32>
    %167 = arith.addf %165, %166 : vector<8x8x128xf32>
    %168 = math.sqrt %167 : vector<8x8x128xf32>
    %cst_84 = arith.constant dense<0.000000e+00> : vector<8x128xf32>
    %169 = vector.multi_reduction <add>, %168, %cst_84 [0] : vector<8x8x128xf32> to vector<8x128xf32>
    %170 = vector.shape_cast %169 : vector<8x128xf32> to vector<1x8x128xf32>
    %171 = arith.addf %157, %170 : vector<1x8x128xf32>
    %c12_i32 = arith.constant 12 : i32
    %c8_i32_85 = arith.constant 8 : i32
    %172 = arith.muli %c12_i32, %c8_i32_85 : i32
    %173 = tpu.assume_multiple %172, 8 : i32
    %174 = arith.index_cast %173 : i32 to index
    %c0_86 = arith.constant 0 : index
    %c0_87 = arith.constant 0 : index
    %175 = vector.load %arg2[%174, %c0_86, %c0_87] : memref<256x8x128xf32, #tpu.memory_space<vmem>>, vector<8x8x128xf32>
    %176 = arith.index_cast %173 : i32 to index
    %c0_88 = arith.constant 0 : index
    %c0_89 = arith.constant 0 : index
    %177 = vector.load %arg3[%176, %c0_88, %c0_89] : memref<256x8x128xf32, #tpu.memory_space<vmem>>, vector<8x8x128xf32>
    %178 = arith.subf %175, %177 : vector<8x8x128xf32>
    %179 = arith.mulf %178, %178 : vector<8x8x128xf32>
    %cst_90 = arith.constant 9.99999997E-7 : f32
    %180 = vector.broadcast %cst_90 : f32 to vector<8x8x128xf32>
    %181 = arith.addf %179, %180 : vector<8x8x128xf32>
    %182 = math.sqrt %181 : vector<8x8x128xf32>
    %cst_91 = arith.constant dense<0.000000e+00> : vector<8x128xf32>
    %183 = vector.multi_reduction <add>, %182, %cst_91 [0] : vector<8x8x128xf32> to vector<8x128xf32>
    %184 = vector.shape_cast %183 : vector<8x128xf32> to vector<1x8x128xf32>
    %185 = arith.addf %171, %184 : vector<1x8x128xf32>
    %c13_i32 = arith.constant 13 : i32
    %c8_i32_92 = arith.constant 8 : i32
    %186 = arith.muli %c13_i32, %c8_i32_92 : i32
    %187 = tpu.assume_multiple %186, 8 : i32
    %188 = arith.index_cast %187 : i32 to index
    %c0_93 = arith.constant 0 : index
    %c0_94 = arith.constant 0 : index
    %189 = vector.load %arg2[%188, %c0_93, %c0_94] : memref<256x8x128xf32, #tpu.memory_space<vmem>>, vector<8x8x128xf32>
    %190 = arith.index_cast %187 : i32 to index
    %c0_95 = arith.constant 0 : index
    %c0_96 = arith.constant 0 : index
    %191 = vector.load %arg3[%190, %c0_95, %c0_96] : memref<256x8x128xf32, #tpu.memory_space<vmem>>, vector<8x8x128xf32>
    %192 = arith.subf %189, %191 : vector<8x8x128xf32>
    %193 = arith.mulf %192, %192 : vector<8x8x128xf32>
    %cst_97 = arith.constant 9.99999997E-7 : f32
    %194 = vector.broadcast %cst_97 : f32 to vector<8x8x128xf32>
    %195 = arith.addf %193, %194 : vector<8x8x128xf32>
    %196 = math.sqrt %195 : vector<8x8x128xf32>
    %cst_98 = arith.constant dense<0.000000e+00> : vector<8x128xf32>
    %197 = vector.multi_reduction <add>, %196, %cst_98 [0] : vector<8x8x128xf32> to vector<8x128xf32>
    %198 = vector.shape_cast %197 : vector<8x128xf32> to vector<1x8x128xf32>
    %199 = arith.addf %185, %198 : vector<1x8x128xf32>
    %c14_i32 = arith.constant 14 : i32
    %c8_i32_99 = arith.constant 8 : i32
    %200 = arith.muli %c14_i32, %c8_i32_99 : i32
    %201 = tpu.assume_multiple %200, 8 : i32
    %202 = arith.index_cast %201 : i32 to index
    %c0_100 = arith.constant 0 : index
    %c0_101 = arith.constant 0 : index
    %203 = vector.load %arg2[%202, %c0_100, %c0_101] : memref<256x8x128xf32, #tpu.memory_space<vmem>>, vector<8x8x128xf32>
    %204 = arith.index_cast %201 : i32 to index
    %c0_102 = arith.constant 0 : index
    %c0_103 = arith.constant 0 : index
    %205 = vector.load %arg3[%204, %c0_102, %c0_103] : memref<256x8x128xf32, #tpu.memory_space<vmem>>, vector<8x8x128xf32>
    %206 = arith.subf %203, %205 : vector<8x8x128xf32>
    %207 = arith.mulf %206, %206 : vector<8x8x128xf32>
    %cst_104 = arith.constant 9.99999997E-7 : f32
    %208 = vector.broadcast %cst_104 : f32 to vector<8x8x128xf32>
    %209 = arith.addf %207, %208 : vector<8x8x128xf32>
    %210 = math.sqrt %209 : vector<8x8x128xf32>
    %cst_105 = arith.constant dense<0.000000e+00> : vector<8x128xf32>
    %211 = vector.multi_reduction <add>, %210, %cst_105 [0] : vector<8x8x128xf32> to vector<8x128xf32>
    %212 = vector.shape_cast %211 : vector<8x128xf32> to vector<1x8x128xf32>
    %213 = arith.addf %199, %212 : vector<1x8x128xf32>
    %c15_i32 = arith.constant 15 : i32
    %c8_i32_106 = arith.constant 8 : i32
    %214 = arith.muli %c15_i32, %c8_i32_106 : i32
    %215 = tpu.assume_multiple %214, 8 : i32
    %216 = arith.index_cast %215 : i32 to index
    %c0_107 = arith.constant 0 : index
    %c0_108 = arith.constant 0 : index
    %217 = vector.load %arg2[%216, %c0_107, %c0_108] : memref<256x8x128xf32, #tpu.memory_space<vmem>>, vector<8x8x128xf32>
    %218 = arith.index_cast %215 : i32 to index
    %c0_109 = arith.constant 0 : index
    %c0_110 = arith.constant 0 : index
    %219 = vector.load %arg3[%218, %c0_109, %c0_110] : memref<256x8x128xf32, #tpu.memory_space<vmem>>, vector<8x8x128xf32>
    %220 = arith.subf %217, %219 : vector<8x8x128xf32>
    %221 = arith.mulf %220, %220 : vector<8x8x128xf32>
    %cst_111 = arith.constant 9.99999997E-7 : f32
    %222 = vector.broadcast %cst_111 : f32 to vector<8x8x128xf32>
    %223 = arith.addf %221, %222 : vector<8x8x128xf32>
    %224 = math.sqrt %223 : vector<8x8x128xf32>
    %cst_112 = arith.constant dense<0.000000e+00> : vector<8x128xf32>
    %225 = vector.multi_reduction <add>, %224, %cst_112 [0] : vector<8x8x128xf32> to vector<8x128xf32>
    %226 = vector.shape_cast %225 : vector<8x128xf32> to vector<1x8x128xf32>
    %227 = arith.addf %213, %226 : vector<1x8x128xf32>
    %c16_i32 = arith.constant 16 : i32
    %c8_i32_113 = arith.constant 8 : i32
    %228 = arith.muli %c16_i32, %c8_i32_113 : i32
    %229 = tpu.assume_multiple %228, 8 : i32
    %230 = arith.index_cast %229 : i32 to index
    %c0_114 = arith.constant 0 : index
    %c0_115 = arith.constant 0 : index
    %231 = vector.load %arg2[%230, %c0_114, %c0_115] : memref<256x8x128xf32, #tpu.memory_space<vmem>>, vector<8x8x128xf32>
    %232 = arith.index_cast %229 : i32 to index
    %c0_116 = arith.constant 0 : index
    %c0_117 = arith.constant 0 : index
    %233 = vector.load %arg3[%232, %c0_116, %c0_117] : memref<256x8x128xf32, #tpu.memory_space<vmem>>, vector<8x8x128xf32>
    %234 = arith.subf %231, %233 : vector<8x8x128xf32>
    %235 = arith.mulf %234, %234 : vector<8x8x128xf32>
    %cst_118 = arith.constant 9.99999997E-7 : f32
    %236 = vector.broadcast %cst_118 : f32 to vector<8x8x128xf32>
    %237 = arith.addf %235, %236 : vector<8x8x128xf32>
    %238 = math.sqrt %237 : vector<8x8x128xf32>
    %cst_119 = arith.constant dense<0.000000e+00> : vector<8x128xf32>
    %239 = vector.multi_reduction <add>, %238, %cst_119 [0] : vector<8x8x128xf32> to vector<8x128xf32>
    %240 = vector.shape_cast %239 : vector<8x128xf32> to vector<1x8x128xf32>
    %241 = arith.addf %227, %240 : vector<1x8x128xf32>
    %c17_i32 = arith.constant 17 : i32
    %c8_i32_120 = arith.constant 8 : i32
    %242 = arith.muli %c17_i32, %c8_i32_120 : i32
    %243 = tpu.assume_multiple %242, 8 : i32
    %244 = arith.index_cast %243 : i32 to index
    %c0_121 = arith.constant 0 : index
    %c0_122 = arith.constant 0 : index
    %245 = vector.load %arg2[%244, %c0_121, %c0_122] : memref<256x8x128xf32, #tpu.memory_space<vmem>>, vector<8x8x128xf32>
    %246 = arith.index_cast %243 : i32 to index
    %c0_123 = arith.constant 0 : index
    %c0_124 = arith.constant 0 : index
    %247 = vector.load %arg3[%246, %c0_123, %c0_124] : memref<256x8x128xf32, #tpu.memory_space<vmem>>, vector<8x8x128xf32>
    %248 = arith.subf %245, %247 : vector<8x8x128xf32>
    %249 = arith.mulf %248, %248 : vector<8x8x128xf32>
    %cst_125 = arith.constant 9.99999997E-7 : f32
    %250 = vector.broadcast %cst_125 : f32 to vector<8x8x128xf32>
    %251 = arith.addf %249, %250 : vector<8x8x128xf32>
    %252 = math.sqrt %251 : vector<8x8x128xf32>
    %cst_126 = arith.constant dense<0.000000e+00> : vector<8x128xf32>
    %253 = vector.multi_reduction <add>, %252, %cst_126 [0] : vector<8x8x128xf32> to vector<8x128xf32>
    %254 = vector.shape_cast %253 : vector<8x128xf32> to vector<1x8x128xf32>
    %255 = arith.addf %241, %254 : vector<1x8x128xf32>
    %c18_i32 = arith.constant 18 : i32
    %c8_i32_127 = arith.constant 8 : i32
    %256 = arith.muli %c18_i32, %c8_i32_127 : i32
    %257 = tpu.assume_multiple %256, 8 : i32
    %258 = arith.index_cast %257 : i32 to index
    %c0_128 = arith.constant 0 : index
    %c0_129 = arith.constant 0 : index
    %259 = vector.load %arg2[%258, %c0_128, %c0_129] : memref<256x8x128xf32, #tpu.memory_space<vmem>>, vector<8x8x128xf32>
    %260 = arith.index_cast %257 : i32 to index
    %c0_130 = arith.constant 0 : index
    %c0_131 = arith.constant 0 : index
    %261 = vector.load %arg3[%260, %c0_130, %c0_131] : memref<256x8x128xf32, #tpu.memory_space<vmem>>, vector<8x8x128xf32>
    %262 = arith.subf %259, %261 : vector<8x8x128xf32>
    %263 = arith.mulf %262, %262 : vector<8x8x128xf32>
    %cst_132 = arith.constant 9.99999997E-7 : f32
    %264 = vector.broadcast %cst_132 : f32 to vector<8x8x128xf32>
    %265 = arith.addf %263, %264 : vector<8x8x128xf32>
    %266 = math.sqrt %265 : vector<8x8x128xf32>
    %cst_133 = arith.constant dense<0.000000e+00> : vector<8x128xf32>
    %267 = vector.multi_reduction <add>, %266, %cst_133 [0] : vector<8x8x128xf32> to vector<8x128xf32>
    %268 = vector.shape_cast %267 : vector<8x128xf32> to vector<1x8x128xf32>
    %269 = arith.addf %255, %268 : vector<1x8x128xf32>
    %c19_i32 = arith.constant 19 : i32
    %c8_i32_134 = arith.constant 8 : i32
    %270 = arith.muli %c19_i32, %c8_i32_134 : i32
    %271 = tpu.assume_multiple %270, 8 : i32
    %272 = arith.index_cast %271 : i32 to index
    %c0_135 = arith.constant 0 : index
    %c0_136 = arith.constant 0 : index
    %273 = vector.load %arg2[%272, %c0_135, %c0_136] : memref<256x8x128xf32, #tpu.memory_space<vmem>>, vector<8x8x128xf32>
    %274 = arith.index_cast %271 : i32 to index
    %c0_137 = arith.constant 0 : index
    %c0_138 = arith.constant 0 : index
    %275 = vector.load %arg3[%274, %c0_137, %c0_138] : memref<256x8x128xf32, #tpu.memory_space<vmem>>, vector<8x8x128xf32>
    %276 = arith.subf %273, %275 : vector<8x8x128xf32>
    %277 = arith.mulf %276, %276 : vector<8x8x128xf32>
    %cst_139 = arith.constant 9.99999997E-7 : f32
    %278 = vector.broadcast %cst_139 : f32 to vector<8x8x128xf32>
    %279 = arith.addf %277, %278 : vector<8x8x128xf32>
    %280 = math.sqrt %279 : vector<8x8x128xf32>
    %cst_140 = arith.constant dense<0.000000e+00> : vector<8x128xf32>
    %281 = vector.multi_reduction <add>, %280, %cst_140 [0] : vector<8x8x128xf32> to vector<8x128xf32>
    %282 = vector.shape_cast %281 : vector<8x128xf32> to vector<1x8x128xf32>
    %283 = arith.addf %269, %282 : vector<1x8x128xf32>
    %c20_i32 = arith.constant 20 : i32
    %c8_i32_141 = arith.constant 8 : i32
    %284 = arith.muli %c20_i32, %c8_i32_141 : i32
    %285 = tpu.assume_multiple %284, 8 : i32
    %286 = arith.index_cast %285 : i32 to index
    %c0_142 = arith.constant 0 : index
    %c0_143 = arith.constant 0 : index
    %287 = vector.load %arg2[%286, %c0_142, %c0_143] : memref<256x8x128xf32, #tpu.memory_space<vmem>>, vector<8x8x128xf32>
    %288 = arith.index_cast %285 : i32 to index
    %c0_144 = arith.constant 0 : index
    %c0_145 = arith.constant 0 : index
    %289 = vector.load %arg3[%288, %c0_144, %c0_145] : memref<256x8x128xf32, #tpu.memory_space<vmem>>, vector<8x8x128xf32>
    %290 = arith.subf %287, %289 : vector<8x8x128xf32>
    %291 = arith.mulf %290, %290 : vector<8x8x128xf32>
    %cst_146 = arith.constant 9.99999997E-7 : f32
    %292 = vector.broadcast %cst_146 : f32 to vector<8x8x128xf32>
    %293 = arith.addf %291, %292 : vector<8x8x128xf32>
    %294 = math.sqrt %293 : vector<8x8x128xf32>
    %cst_147 = arith.constant dense<0.000000e+00> : vector<8x128xf32>
    %295 = vector.multi_reduction <add>, %294, %cst_147 [0] : vector<8x8x128xf32> to vector<8x128xf32>
    %296 = vector.shape_cast %295 : vector<8x128xf32> to vector<1x8x128xf32>
    %297 = arith.addf %283, %296 : vector<1x8x128xf32>
    %c21_i32 = arith.constant 21 : i32
    %c8_i32_148 = arith.constant 8 : i32
    %298 = arith.muli %c21_i32, %c8_i32_148 : i32
    %299 = tpu.assume_multiple %298, 8 : i32
    %300 = arith.index_cast %299 : i32 to index
    %c0_149 = arith.constant 0 : index
    %c0_150 = arith.constant 0 : index
    %301 = vector.load %arg2[%300, %c0_149, %c0_150] : memref<256x8x128xf32, #tpu.memory_space<vmem>>, vector<8x8x128xf32>
    %302 = arith.index_cast %299 : i32 to index
    %c0_151 = arith.constant 0 : index
    %c0_152 = arith.constant 0 : index
    %303 = vector.load %arg3[%302, %c0_151, %c0_152] : memref<256x8x128xf32, #tpu.memory_space<vmem>>, vector<8x8x128xf32>
    %304 = arith.subf %301, %303 : vector<8x8x128xf32>
    %305 = arith.mulf %304, %304 : vector<8x8x128xf32>
    %cst_153 = arith.constant 9.99999997E-7 : f32
    %306 = vector.broadcast %cst_153 : f32 to vector<8x8x128xf32>
    %307 = arith.addf %305, %306 : vector<8x8x128xf32>
    %308 = math.sqrt %307 : vector<8x8x128xf32>
    %cst_154 = arith.constant dense<0.000000e+00> : vector<8x128xf32>
    %309 = vector.multi_reduction <add>, %308, %cst_154 [0] : vector<8x8x128xf32> to vector<8x128xf32>
    %310 = vector.shape_cast %309 : vector<8x128xf32> to vector<1x8x128xf32>
    %311 = arith.addf %297, %310 : vector<1x8x128xf32>
    %c22_i32 = arith.constant 22 : i32
    %c8_i32_155 = arith.constant 8 : i32
    %312 = arith.muli %c22_i32, %c8_i32_155 : i32
    %313 = tpu.assume_multiple %312, 8 : i32
    %314 = arith.index_cast %313 : i32 to index
    %c0_156 = arith.constant 0 : index
    %c0_157 = arith.constant 0 : index
    %315 = vector.load %arg2[%314, %c0_156, %c0_157] : memref<256x8x128xf32, #tpu.memory_space<vmem>>, vector<8x8x128xf32>
    %316 = arith.index_cast %313 : i32 to index
    %c0_158 = arith.constant 0 : index
    %c0_159 = arith.constant 0 : index
    %317 = vector.load %arg3[%316, %c0_158, %c0_159] : memref<256x8x128xf32, #tpu.memory_space<vmem>>, vector<8x8x128xf32>
    %318 = arith.subf %315, %317 : vector<8x8x128xf32>
    %319 = arith.mulf %318, %318 : vector<8x8x128xf32>
    %cst_160 = arith.constant 9.99999997E-7 : f32
    %320 = vector.broadcast %cst_160 : f32 to vector<8x8x128xf32>
    %321 = arith.addf %319, %320 : vector<8x8x128xf32>
    %322 = math.sqrt %321 : vector<8x8x128xf32>
    %cst_161 = arith.constant dense<0.000000e+00> : vector<8x128xf32>
    %323 = vector.multi_reduction <add>, %322, %cst_161 [0] : vector<8x8x128xf32> to vector<8x128xf32>
    %324 = vector.shape_cast %323 : vector<8x128xf32> to vector<1x8x128xf32>
    %325 = arith.addf %311, %324 : vector<1x8x128xf32>
    %c23_i32 = arith.constant 23 : i32
    %c8_i32_162 = arith.constant 8 : i32
    %326 = arith.muli %c23_i32, %c8_i32_162 : i32
    %327 = tpu.assume_multiple %326, 8 : i32
    %328 = arith.index_cast %327 : i32 to index
    %c0_163 = arith.constant 0 : index
    %c0_164 = arith.constant 0 : index
    %329 = vector.load %arg2[%328, %c0_163, %c0_164] : memref<256x8x128xf32, #tpu.memory_space<vmem>>, vector<8x8x128xf32>
    %330 = arith.index_cast %327 : i32 to index
    %c0_165 = arith.constant 0 : index
    %c0_166 = arith.constant 0 : index
    %331 = vector.load %arg3[%330, %c0_165, %c0_166] : memref<256x8x128xf32, #tpu.memory_space<vmem>>, vector<8x8x128xf32>
    %332 = arith.subf %329, %331 : vector<8x8x128xf32>
    %333 = arith.mulf %332, %332 : vector<8x8x128xf32>
    %cst_167 = arith.constant 9.99999997E-7 : f32
    %334 = vector.broadcast %cst_167 : f32 to vector<8x8x128xf32>
    %335 = arith.addf %333, %334 : vector<8x8x128xf32>
    %336 = math.sqrt %335 : vector<8x8x128xf32>
    %cst_168 = arith.constant dense<0.000000e+00> : vector<8x128xf32>
    %337 = vector.multi_reduction <add>, %336, %cst_168 [0] : vector<8x8x128xf32> to vector<8x128xf32>
    %338 = vector.shape_cast %337 : vector<8x128xf32> to vector<1x8x128xf32>
    %339 = arith.addf %325, %338 : vector<1x8x128xf32>
    %c24_i32 = arith.constant 24 : i32
    %c8_i32_169 = arith.constant 8 : i32
    %340 = arith.muli %c24_i32, %c8_i32_169 : i32
    %341 = tpu.assume_multiple %340, 8 : i32
    %342 = arith.index_cast %341 : i32 to index
    %c0_170 = arith.constant 0 : index
    %c0_171 = arith.constant 0 : index
    %343 = vector.load %arg2[%342, %c0_170, %c0_171] : memref<256x8x128xf32, #tpu.memory_space<vmem>>, vector<8x8x128xf32>
    %344 = arith.index_cast %341 : i32 to index
    %c0_172 = arith.constant 0 : index
    %c0_173 = arith.constant 0 : index
    %345 = vector.load %arg3[%344, %c0_172, %c0_173] : memref<256x8x128xf32, #tpu.memory_space<vmem>>, vector<8x8x128xf32>
    %346 = arith.subf %343, %345 : vector<8x8x128xf32>
    %347 = arith.mulf %346, %346 : vector<8x8x128xf32>
    %cst_174 = arith.constant 9.99999997E-7 : f32
    %348 = vector.broadcast %cst_174 : f32 to vector<8x8x128xf32>
    %349 = arith.addf %347, %348 : vector<8x8x128xf32>
    %350 = math.sqrt %349 : vector<8x8x128xf32>
    %cst_175 = arith.constant dense<0.000000e+00> : vector<8x128xf32>
    %351 = vector.multi_reduction <add>, %350, %cst_175 [0] : vector<8x8x128xf32> to vector<8x128xf32>
    %352 = vector.shape_cast %351 : vector<8x128xf32> to vector<1x8x128xf32>
    %353 = arith.addf %339, %352 : vector<1x8x128xf32>
    %c25_i32 = arith.constant 25 : i32
    %c8_i32_176 = arith.constant 8 : i32
    %354 = arith.muli %c25_i32, %c8_i32_176 : i32
    %355 = tpu.assume_multiple %354, 8 : i32
    %356 = arith.index_cast %355 : i32 to index
    %c0_177 = arith.constant 0 : index
    %c0_178 = arith.constant 0 : index
    %357 = vector.load %arg2[%356, %c0_177, %c0_178] : memref<256x8x128xf32, #tpu.memory_space<vmem>>, vector<8x8x128xf32>
    %358 = arith.index_cast %355 : i32 to index
    %c0_179 = arith.constant 0 : index
    %c0_180 = arith.constant 0 : index
    %359 = vector.load %arg3[%358, %c0_179, %c0_180] : memref<256x8x128xf32, #tpu.memory_space<vmem>>, vector<8x8x128xf32>
    %360 = arith.subf %357, %359 : vector<8x8x128xf32>
    %361 = arith.mulf %360, %360 : vector<8x8x128xf32>
    %cst_181 = arith.constant 9.99999997E-7 : f32
    %362 = vector.broadcast %cst_181 : f32 to vector<8x8x128xf32>
    %363 = arith.addf %361, %362 : vector<8x8x128xf32>
    %364 = math.sqrt %363 : vector<8x8x128xf32>
    %cst_182 = arith.constant dense<0.000000e+00> : vector<8x128xf32>
    %365 = vector.multi_reduction <add>, %364, %cst_182 [0] : vector<8x8x128xf32> to vector<8x128xf32>
    %366 = vector.shape_cast %365 : vector<8x128xf32> to vector<1x8x128xf32>
    %367 = arith.addf %353, %366 : vector<1x8x128xf32>
    %c26_i32 = arith.constant 26 : i32
    %c8_i32_183 = arith.constant 8 : i32
    %368 = arith.muli %c26_i32, %c8_i32_183 : i32
    %369 = tpu.assume_multiple %368, 8 : i32
    %370 = arith.index_cast %369 : i32 to index
    %c0_184 = arith.constant 0 : index
    %c0_185 = arith.constant 0 : index
    %371 = vector.load %arg2[%370, %c0_184, %c0_185] : memref<256x8x128xf32, #tpu.memory_space<vmem>>, vector<8x8x128xf32>
    %372 = arith.index_cast %369 : i32 to index
    %c0_186 = arith.constant 0 : index
    %c0_187 = arith.constant 0 : index
    %373 = vector.load %arg3[%372, %c0_186, %c0_187] : memref<256x8x128xf32, #tpu.memory_space<vmem>>, vector<8x8x128xf32>
    %374 = arith.subf %371, %373 : vector<8x8x128xf32>
    %375 = arith.mulf %374, %374 : vector<8x8x128xf32>
    %cst_188 = arith.constant 9.99999997E-7 : f32
    %376 = vector.broadcast %cst_188 : f32 to vector<8x8x128xf32>
    %377 = arith.addf %375, %376 : vector<8x8x128xf32>
    %378 = math.sqrt %377 : vector<8x8x128xf32>
    %cst_189 = arith.constant dense<0.000000e+00> : vector<8x128xf32>
    %379 = vector.multi_reduction <add>, %378, %cst_189 [0] : vector<8x8x128xf32> to vector<8x128xf32>
    %380 = vector.shape_cast %379 : vector<8x128xf32> to vector<1x8x128xf32>
    %381 = arith.addf %367, %380 : vector<1x8x128xf32>
    %c27_i32 = arith.constant 27 : i32
    %c8_i32_190 = arith.constant 8 : i32
    %382 = arith.muli %c27_i32, %c8_i32_190 : i32
    %383 = tpu.assume_multiple %382, 8 : i32
    %384 = arith.index_cast %383 : i32 to index
    %c0_191 = arith.constant 0 : index
    %c0_192 = arith.constant 0 : index
    %385 = vector.load %arg2[%384, %c0_191, %c0_192] : memref<256x8x128xf32, #tpu.memory_space<vmem>>, vector<8x8x128xf32>
    %386 = arith.index_cast %383 : i32 to index
    %c0_193 = arith.constant 0 : index
    %c0_194 = arith.constant 0 : index
    %387 = vector.load %arg3[%386, %c0_193, %c0_194] : memref<256x8x128xf32, #tpu.memory_space<vmem>>, vector<8x8x128xf32>
    %388 = arith.subf %385, %387 : vector<8x8x128xf32>
    %389 = arith.mulf %388, %388 : vector<8x8x128xf32>
    %cst_195 = arith.constant 9.99999997E-7 : f32
    %390 = vector.broadcast %cst_195 : f32 to vector<8x8x128xf32>
    %391 = arith.addf %389, %390 : vector<8x8x128xf32>
    %392 = math.sqrt %391 : vector<8x8x128xf32>
    %cst_196 = arith.constant dense<0.000000e+00> : vector<8x128xf32>
    %393 = vector.multi_reduction <add>, %392, %cst_196 [0] : vector<8x8x128xf32> to vector<8x128xf32>
    %394 = vector.shape_cast %393 : vector<8x128xf32> to vector<1x8x128xf32>
    %395 = arith.addf %381, %394 : vector<1x8x128xf32>
    %c28_i32 = arith.constant 28 : i32
    %c8_i32_197 = arith.constant 8 : i32
    %396 = arith.muli %c28_i32, %c8_i32_197 : i32
    %397 = tpu.assume_multiple %396, 8 : i32
    %398 = arith.index_cast %397 : i32 to index
    %c0_198 = arith.constant 0 : index
    %c0_199 = arith.constant 0 : index
    %399 = vector.load %arg2[%398, %c0_198, %c0_199] : memref<256x8x128xf32, #tpu.memory_space<vmem>>, vector<8x8x128xf32>
    %400 = arith.index_cast %397 : i32 to index
    %c0_200 = arith.constant 0 : index
    %c0_201 = arith.constant 0 : index
    %401 = vector.load %arg3[%400, %c0_200, %c0_201] : memref<256x8x128xf32, #tpu.memory_space<vmem>>, vector<8x8x128xf32>
    %402 = arith.subf %399, %401 : vector<8x8x128xf32>
    %403 = arith.mulf %402, %402 : vector<8x8x128xf32>
    %cst_202 = arith.constant 9.99999997E-7 : f32
    %404 = vector.broadcast %cst_202 : f32 to vector<8x8x128xf32>
    %405 = arith.addf %403, %404 : vector<8x8x128xf32>
    %406 = math.sqrt %405 : vector<8x8x128xf32>
    %cst_203 = arith.constant dense<0.000000e+00> : vector<8x128xf32>
    %407 = vector.multi_reduction <add>, %406, %cst_203 [0] : vector<8x8x128xf32> to vector<8x128xf32>
    %408 = vector.shape_cast %407 : vector<8x128xf32> to vector<1x8x128xf32>
    %409 = arith.addf %395, %408 : vector<1x8x128xf32>
    %c29_i32 = arith.constant 29 : i32
    %c8_i32_204 = arith.constant 8 : i32
    %410 = arith.muli %c29_i32, %c8_i32_204 : i32
    %411 = tpu.assume_multiple %410, 8 : i32
    %412 = arith.index_cast %411 : i32 to index
    %c0_205 = arith.constant 0 : index
    %c0_206 = arith.constant 0 : index
    %413 = vector.load %arg2[%412, %c0_205, %c0_206] : memref<256x8x128xf32, #tpu.memory_space<vmem>>, vector<8x8x128xf32>
    %414 = arith.index_cast %411 : i32 to index
    %c0_207 = arith.constant 0 : index
    %c0_208 = arith.constant 0 : index
    %415 = vector.load %arg3[%414, %c0_207, %c0_208] : memref<256x8x128xf32, #tpu.memory_space<vmem>>, vector<8x8x128xf32>
    %416 = arith.subf %413, %415 : vector<8x8x128xf32>
    %417 = arith.mulf %416, %416 : vector<8x8x128xf32>
    %cst_209 = arith.constant 9.99999997E-7 : f32
    %418 = vector.broadcast %cst_209 : f32 to vector<8x8x128xf32>
    %419 = arith.addf %417, %418 : vector<8x8x128xf32>
    %420 = math.sqrt %419 : vector<8x8x128xf32>
    %cst_210 = arith.constant dense<0.000000e+00> : vector<8x128xf32>
    %421 = vector.multi_reduction <add>, %420, %cst_210 [0] : vector<8x8x128xf32> to vector<8x128xf32>
    %422 = vector.shape_cast %421 : vector<8x128xf32> to vector<1x8x128xf32>
    %423 = arith.addf %409, %422 : vector<1x8x128xf32>
    %c30_i32 = arith.constant 30 : i32
    %c8_i32_211 = arith.constant 8 : i32
    %424 = arith.muli %c30_i32, %c8_i32_211 : i32
    %425 = tpu.assume_multiple %424, 8 : i32
    %426 = arith.index_cast %425 : i32 to index
    %c0_212 = arith.constant 0 : index
    %c0_213 = arith.constant 0 : index
    %427 = vector.load %arg2[%426, %c0_212, %c0_213] : memref<256x8x128xf32, #tpu.memory_space<vmem>>, vector<8x8x128xf32>
    %428 = arith.index_cast %425 : i32 to index
    %c0_214 = arith.constant 0 : index
    %c0_215 = arith.constant 0 : index
    %429 = vector.load %arg3[%428, %c0_214, %c0_215] : memref<256x8x128xf32, #tpu.memory_space<vmem>>, vector<8x8x128xf32>
    %430 = arith.subf %427, %429 : vector<8x8x128xf32>
    %431 = arith.mulf %430, %430 : vector<8x8x128xf32>
    %cst_216 = arith.constant 9.99999997E-7 : f32
    %432 = vector.broadcast %cst_216 : f32 to vector<8x8x128xf32>
    %433 = arith.addf %431, %432 : vector<8x8x128xf32>
    %434 = math.sqrt %433 : vector<8x8x128xf32>
    %cst_217 = arith.constant dense<0.000000e+00> : vector<8x128xf32>
    %435 = vector.multi_reduction <add>, %434, %cst_217 [0] : vector<8x8x128xf32> to vector<8x128xf32>
    %436 = vector.shape_cast %435 : vector<8x128xf32> to vector<1x8x128xf32>
    %437 = arith.addf %423, %436 : vector<1x8x128xf32>
    %c31_i32 = arith.constant 31 : i32
    %c8_i32_218 = arith.constant 8 : i32
    %438 = arith.muli %c31_i32, %c8_i32_218 : i32
    %439 = tpu.assume_multiple %438, 8 : i32
    %440 = arith.index_cast %439 : i32 to index
    %c0_219 = arith.constant 0 : index
    %c0_220 = arith.constant 0 : index
    %441 = vector.load %arg2[%440, %c0_219, %c0_220] : memref<256x8x128xf32, #tpu.memory_space<vmem>>, vector<8x8x128xf32>
    %442 = arith.index_cast %439 : i32 to index
    %c0_221 = arith.constant 0 : index
    %c0_222 = arith.constant 0 : index
    %443 = vector.load %arg3[%442, %c0_221, %c0_222] : memref<256x8x128xf32, #tpu.memory_space<vmem>>, vector<8x8x128xf32>
    %444 = arith.subf %441, %443 : vector<8x8x128xf32>
    %445 = arith.mulf %444, %444 : vector<8x8x128xf32>
    %cst_223 = arith.constant 9.99999997E-7 : f32
    %446 = vector.broadcast %cst_223 : f32 to vector<8x8x128xf32>
    %447 = arith.addf %445, %446 : vector<8x8x128xf32>
    %448 = math.sqrt %447 : vector<8x8x128xf32>
    %cst_224 = arith.constant dense<0.000000e+00> : vector<8x128xf32>
    %449 = vector.multi_reduction <add>, %448, %cst_224 [0] : vector<8x8x128xf32> to vector<8x128xf32>
    %450 = vector.shape_cast %449 : vector<8x128xf32> to vector<1x8x128xf32>
    %451 = arith.addf %437, %450 : vector<1x8x128xf32>
    %c32_i32 = arith.constant 32 : i32
    %c0_225 = arith.constant 0 : index
    %c0_226 = arith.constant 0 : index
    %c0_227 = arith.constant 0 : index
    %452 = vector.load %arg4[%c0_225, %c0_226, %c0_227] : memref<1x8x128xf32, #tpu.memory_space<vmem>>, vector<1x8x128xf32>
    %453 = arith.addf %452, %451 : vector<1x8x128xf32>
    %c0_228 = arith.constant 0 : index
    %c0_229 = arith.constant 0 : index
    %c0_230 = arith.constant 0 : index
    %454 = vector.load %arg4[%c0_228, %c0_229, %c0_230] : memref<1x8x128xf32, #tpu.memory_space<vmem>>, vector<1x8x128xf32>
    tpu.vector_store %arg4[%c0_228, %c0_229, %c0_230], %453 {strides = array<i32>} : memref<1x8x128xf32, #tpu.memory_space<vmem>>, vector<1x8x128xf32>,
    return
  }
  func.func @transform_0(%arg0: i32, %arg1: i32) -> (i32, i32, i32) {
    %c1_i32 = arith.constant 1 : i32
    %0 = arith.muli %arg0, %c1_i32 : i32
    %1 = arith.addi %0, %arg1 : i32
    %c0_i32 = arith.constant 0 : i32
    %c0_i32_0 = arith.constant 0 : i32
    %c0_i32_1 = arith.constant 0 : i32
    return %1, %c0_i32, %c0_i32_0 : i32, i32, i32
  }
  func.func @transform_1(%arg0: i32, %arg1: i32) -> (i32, i32, i32) {
    %c1_i32 = arith.constant 1 : i32
    %0 = arith.muli %arg0, %c1_i32 : i32
    %1 = arith.addi %0, %arg1 : i32
    %c0_i32 = arith.constant 0 : i32
    %c0_i32_0 = arith.constant 0 : i32
    %c0_i32_1 = arith.constant 0 : i32
    return %1, %c0_i32, %c0_i32_0 : i32, i32, i32
  }
  func.func @transform_2(%arg0: i32, %arg1: i32) -> (i32, i32, i32) {
    %c0_i32 = arith.constant 0 : i32
    %c0_i32_0 = arith.constant 0 : i32
    %c0_i32_1 = arith.constant 0 : i32
    return %arg0, %c0_i32, %c0_i32_0 : i32, i32, i32
  }
}

</mosaic_0001>

<bundles_post_ra>
// kernel: tpu_custom_call.1
= control target key start
LH: loop header
LB: loop body
LE: loop exit
PB: predicated region body
PF: predicated region fallthrough
CT: control target
= control target key end

     0   :  { %7 = vsyncpa [#allocation3], 0  ;;  %s8861_s0 = inlined_call_operand.hbm [shape: f32[512,8,128], index: 0, kind: input, shape index: {}]   ;;  %s8862_s1 = inlined_call_operand.hbm [shape: f32[512,8,128], index: 1, kind: input, shape index: {}]   ;;  %s8863_s2 = inlined_call_operand.hbm [shape: f32[2,8,128], index: 2, kind: output, shape index: {}]  }
   0x1   :  { %9 = vsyncpa [#allocation3 + $0x1], 0 }
   0x2   :  { %10 = vsyncpa [#allocation6], 0 }
   0x3   :  { %12 = vsyncpa [#allocation6 + $0x1], 0 }
   0x4   :  { %13 = vsyncpa [#allocation4], 0 }
   0x5   :  { %15 = vsyncpa [#allocation4 + $0x1], 0  ;;  %s5095_s9 = smov 0   ;;  %s5097_s10 = smov 0  }
   0x6   :  { %s5099_s11 = smov 0   ;;  %s5101_s12 = smov 0  }
   0x7   :  { %s5103_s13 = smov 0   ;;  %s5105_s14 = smov 0  }
   0x8 LB: > { %s3835_s15 = sadd.s32 4294967295, %s5073_s14   ;;  %s3836_s16 = sadd.s32 4294967294, %s5073_s14   ;;  %s5073_s14 = sphi %s5105_s14, %s21_s14   ;;  %s5069_s13 = sphi %s5103_s13, %s8875_s13   ;;  %s5065_s12 = sphi %s5101_s12, %s8874_s12   ;;  %s5061_s11 = sphi %s5099_s11, %s8873_s11   ;;  %s5057_s10 = sphi %s5097_s10, %s8872_s10   ;;  %s5053_s9 = sphi %s5095_s9, %s8871_s9  }
   0x9   : > { %s33_s17 = sadd.s32 1, %s5069_s13  ;;  %s42_s18 = sadd.s32 1, %s5061_s11 }
   0xa   : > { %p35_p0 = scmp.ge.s32.totalorder %s33_s17, 2  ;;  %p49_p1 = scmp.ne.s32.totalorder %s5061_s11, %s5057_s10 }
   0xb   : > { %p50_p2 = scmp.eq.s32.totalorder %s5073_s14, 0  ;;  %p55_p3 = scmp.ne.s32.totalorder %s5057_s10, %s5053_s9 }
   0xc   : > { %s8877_s17 = smov (%p35_p0, %s33_s17), 0  ;;  %p56_p5 = scmp.eq.s32.totalorder %s3835_s15, 0 }
   0xd   : > { %p5136_p4 = por %p50_p2, %p49_p1  ;;  %s39_s20 = ssub.s32 %s5069_s13, %s8877_s17 }
   0xe   : > { %p107_p6 = scmp.eq.s32.totalorder %s3835_s15, 1  ;;  %p40_p7 = scmp.eq.s32.totalorder %s39_s20, 0 }
   0xf   : > { %p5142_p8 = por %p56_p5, %p55_p3  ;;  %p113_p10 = scmp.eq.s32.totalorder %s3836_s16, 1 }
  0x10   : > { %p5146_p9 = por %p107_p6, %p49_p1  ;;  %p4368_p13 = scmp.lt.s32.totalorder %s5073_s14, 2 }
  0x11   : > { %s5151_s23 = scalar_select %p40_p7, %s5061_s11, %s42_s18  }
  0x12   : > { %p5153_p11 = por %p113_p10, %p55_p3  ;;  %s5160_s25 = sand.u32 1, %s5061_s11  }
  0x13   : > { %s3839_s26 = sshll.u32 %s5160_s25, 11  ;;  %s4349_s27 = sshll.u32 %s5069_s13, 15 }
  0x14   : > { %s144_s30 = scalar_lea.hbm %s8861_s0, %s4349_s27  ;;  %s137_s3 = scalar_lea.vmem [#allocation2], %s3839_s26 }
  0x15   : > { %s145_s4 = sshll.u32 %s137_s3, 4  ;;  %p5173_p0 = pnand %p4368_p13, %p5136_p4  ;;  %s146_s4 = int_to_ptr.vmem [resolvable:$true] %s145_s4 }
  0x16   : > { %p3845_p1 = scmp.ge.s32.totalorder %s5073_s14, 1  ;;  %s134_s6 = scalar_lea.sflag [#allocation3], %s5160_s25 }
  0x17   : > { %p4935_p2 = pneg %p5173_p0  ;;  %s4946_s7 = scalar_lea.vmem %s146_s4, 32768 }
  0x18   : > { %p4947_p3 = scmp.ne.s32.totalorder %s146_s4, %s4946_s7  ;;  %s5075_s8 = smov [#allocation2]  }
  0x19   : > { %s4951_s15 = sshll.u32 %s5075_s8, 4  ;;  %s4952_s15 = int_to_ptr.vmem [resolvable:$false] %s4951_s15 }
  0x1a   : > { %p4949_p5 = pnand %p4947_p3, %p4935_p2  ;;  %s4953_s16 = scalar_lea.vmem %s4952_s15, 65536 }
  0x1b   : > { %p4954_p4 = scmp.lt.s32.totalorder %s146_s4, %s4952_s15  ;;  %p4955_p7 = scmp.lt.s32.totalorder %s4953_s16, %s4946_s7 }
  0x1c   : > { %p4950_p6 = pneg %p4949_p5 }
  0x1d   : > { %p4956_p10 = por %p4955_p7, %p4954_p4 }
  0x1f   : > { %p4957_p13 = pnand %p4956_p10, %p4950_p6 }
  0x21   : > { %4960 = shalt.err (!%p4957_p13)
}
  0x22   : > { %s5076_s18 = smov 128   ;;  %s5077_s19 = smov 8  }
  0x23   : > { %4360 = dma.hbm_to_vmem [thread:$0]  (!%p5173_p0), %s144_s30, 32768, %s146_s4, %s134_s6, %s5076_s18, %s5076_s18, %s5077_s19  }
  0x24   : > { %p175_p3 = scmp.lt.s32.totalorder %s5073_s14, 3  ;;  %s166_s29 = scalar_lea.hbm %s8862_s1, %s4349_s27 }
  0x25   : > { %s159_s7 = scalar_lea.vmem [#allocation5], %s3839_s26  ;;  %s156_s15 = scalar_lea.sflag [#allocation6], %s5160_s25 }
  0x26   : > { %p5194_p5 = pnand %p3845_p1, %p175_p3  ;;  %s167_s8 = sshll.u32 %s159_s7, 4  ;;  %s168_s8 = int_to_ptr.vmem [resolvable:$true] %s167_s8 }
  0x27   : > { %s4974_s16 = scalar_lea.vmem %s168_s8, 32768  ;;  %s5078_s30 = smov [#allocation5]  }
  0x28   : > { %p4975_p6 = scmp.ne.s32.totalorder %s168_s8, %s4974_s16  ;;  %s4979_s4 = sshll.u32 %s5078_s30, 4  ;;  %s4980_s4 = int_to_ptr.vmem [resolvable:$false] %s4979_s4 }
  0x29   : > { %s4981_s27 = scalar_lea.vmem %s4980_s4, 65536  ;;  %p4982_p10 = scmp.lt.s32.totalorder %s168_s8, %s4980_s4 }
  0x2a   : > { %p4977_p4 = pnand %p4975_p6, %p4935_p2  ;;  %p4983_p1 = scmp.lt.s32.totalorder %s4981_s27, %s4974_s16 }
  0x2c   : > { %p4978_p7 = pneg %p4977_p4  ;;  %p4984_p13 = por %p4983_p1, %p4982_p10 }
  0x2e   : > { %p4985_p3 = pnand %p4984_p13, %p4978_p7 }
  0x30   : > { %4988 = shalt.err (!%p4985_p3)
}
  0x31   : > { %4363 = dma.hbm_to_vmem [thread:$0]  (!%p5173_p0), %s166_s29, 32768, %s168_s8, %s156_s15, %s5076_s18, %s5076_s18, %s5077_s19  }
  0x32   : > { %179 = sbr.rel (%p5194_p5) target bundleno = 787 (0x313), region = 28  ;;  %s5209_s25 = sand.u32 (!%p5194_p5), 1, %s5057_s10  }
  0x33   : > { %s3846_s26 = sshll.u32 (!%p5194_p5), %s5209_s25, 11  ;;  %s182_s6 = scalar_lea.sflag (!%p5194_p5), [#allocation3], %s5209_s25 }
  0x34   : > { %s5213_s20 = scalar_lea.vmem (!%p5194_p5), [#allocation2], %s3846_s26 }
  0x37   : > { %5040 = dma.done.wait (%p5142_p8), %s182_s6, 32768  }
  0x38   : > { %5042 = vsyncadd (%p5142_p8), %s182_s6, 4294934528  ;;  %s191_s5 = scalar_lea.sflag [#allocation6], %s5209_s25  ;;  %s5220_s18 = scalar_lea.vmem [#allocation5], %s3846_s26 }
  0x39   : > { %5044 = dma.done.wait (%p5142_p8), %s191_s5, 32768  }
  0x3a   : > { %5046 = vsyncadd (%p5142_p8), %s191_s5, 4294934528  ;;  %v231_v0 = vld [vmem:[%s5213_s20] sm:$0xff]  ;;  %v232_v1 = vld [vmem:[%s5213_s20 + $0x8] sm:$0xff]  ;;  %s3848_s21 = sshll.u32 %s5209_s25, 3  ;;  %s4346_s19 = sshll.u32 %s5065_s12, 7 }
  0x3b   : > { %v233_v2 = vld [vmem:[%s5213_s20 + $0x10] sm:$0xff]  ;;  %v234_v3 = vld [vmem:[%s5213_s20 + $0x18] sm:$0xff]  ;;  %v240_v4 = vld [vmem:[%s5220_s18] sm:$0xff]  ;;  %s219_s28 = scalar_lea.vmem [#allocation7], %s3848_s21  ;;  %s3668_s8 = scalar_lea.hbm %s8863_s2, %s4346_s19 }
  0x3c   : > { %v241_v5 = vld [vmem:[%s5220_s18 + $0x8] sm:$0xff]  ;;  %v242_v6 = vld [vmem:[%s5220_s18 + $0x10] sm:$0xff]  ;;  %v243_v7 = vld [vmem:[%s5220_s18 + $0x18] sm:$0xff]  ;;  %v248_v8 = vsub.f32 %v231_v0, %v240_v4  ;;  %s3670_s29 = sshll.u32 %s219_s28, 4  ;;  %s3657_s15 = scalar_lea.sflag [#allocation4], %s5209_s25  ;;  %s3671_s29 = int_to_ptr.vmem [resolvable:$true] %s3670_s29 }
  0x3d   : > { %v249_v9 = vsub.f32 %v232_v1, %v241_v5  ;;  %v250_v10 = vsub.f32 %v233_v2, %v242_v6  ;;  %v251_v11 = vsub.f32 %v234_v3, %v243_v7  ;;  %v235_v13 = vld [vmem:[%s5213_s20 + $0x20] sm:$0xff]  ;;  %v236_v18 = vld [vmem:[%s5213_s20 + $0x28] sm:$0xff]  ;;  %v237_v21 = vld [vmem:[%s5213_s20 + $0x30] sm:$0xff]  ;;  %s4989_s16 = scalar_lea.vmem %s3671_s29, 128  ;;  %s5079_s30 = smov [#allocation7]  }
  0x3e   : > { %v256_v12 = vmul.f32 %v248_v8, %v248_v8  ;;  %v244_v14 = vld [vmem:[%s5220_s18 + $0x20] sm:$0xff]  ;;  %v245_v19 = vld [vmem:[%s5220_s18 + $0x28] sm:$0xff]  ;;  %v246_v22 = vld [vmem:[%s5220_s18 + $0x30] sm:$0xff]  ;;  %p4990_p8 = scmp.ne.s32.totalorder %s3671_s29, %s4989_s16  ;;  %s4993_s4 = sshll.u32 %s5079_s30, 4  ;;  %s4994_s4 = int_to_ptr.vmem [resolvable:$false] %s4993_s4 }
  0x3f   : > { %v257_v15 = vmul.f32 %v249_v9, %v249_v9  ;;  %v258_v16 = vmul.f32 %v250_v10, %v250_v10  ;;  %v252_v23 = vsub.f32 %v235_v13, %v244_v14  ;;  %v259_v24 = vmul.f32 %v251_v11, %v251_v11  ;;  %v238_v26 = vld [vmem:[%s5213_s20 + $0x38] sm:$0xff]  ;;  %v3849_v33 = vld [vmem:[%s5213_s20 + $0x40] sm:$0xff]  ;;  %v3850_v35 = vld [vmem:[%s5213_s20 + $0x48] sm:$0xff]  ;;  %s4995_s27 = scalar_lea.vmem %s4994_s4, 256  ;;  %p4996_p5 = scmp.lt.s32.totalorder %s3671_s29, %s4994_s4 }
  0x40   : > { %v5236_v17 = vadd.f32 1e-06, %v256_v12  ;;  %v247_v27 = vld [vmem:[%s5220_s18 + $0x38] sm:$0xff]  ;;  %v253_v28 = vsub.f32 %v236_v18, %v245_v19  ;;  %v254_v29 = vsub.f32 %v237_v21, %v246_v22  ;;  %v3857_v36 = vld [vmem:[%s5220_s18 + $0x40] sm:$0xff]  ;;  %v3858_v37 = vld [vmem:[%s5220_s18 + $0x48] sm:$0xff]  ;;  %p4991_p0 = pnand %p4990_p8, %p5146_p9  ;;  %p4997_p6 = scmp.lt.s32.totalorder %s4995_s27, %s4989_s16 }
  0x41   : > { %v5240_v20 = vadd.f32 1e-06, %v257_v15  ;;  %v5244_v25 = vadd.f32 1e-06, %v258_v16  ;;  %v255_v30 = vsub.f32 %v238_v26, %v247_v27  ;;  %v260_v31 = vmul.f32 %v252_v23, %v252_v23  ;;  %v3851_v41 = vld [vmem:[%s5213_s20 + $0x50] sm:$0xff]  ;;  %v3852_v50 = vld [vmem:[%s5213_s20 + $0x58] sm:$0xff] }
  0x42   : > { %4421 = vrsqrt.f32 %v5236_v17  ;;  %v5250_v32 = vadd.f32 1e-06, %v259_v24  ;;  %v261_v34 = vmul.f32 %v253_v28, %v253_v28  ;;  %v262_v38 = vmul.f32 %v254_v29, %v254_v29  ;;  %v3859_v42 = vld [vmem:[%s5220_s18 + $0x50] sm:$0xff]  ;;  %v3860_v51 = vld [vmem:[%s5220_s18 + $0x58] sm:$0xff]  ;;  %v3853_v60 = vld [vmem:[%s5213_s20 + $0x60] sm:$0xff]  ;;  %p4992_p2 = pneg %p4991_p0  ;;  %p4998_p4 = por %p4997_p6, %p4996_p5 }
  0x43   : > { %4423 = vrsqrt.f32 %v5240_v20  ;;  %v263_v39 = vmul.f32 %v255_v30, %v255_v30  ;;  %v5257_v40 = vadd.f32 1e-06, %v260_v31  ;;  %v355_v43 = vsub.f32 %v3849_v33, %v3857_v36  ;;  %v3861_v61 = vld [vmem:[%s5220_s18 + $0x60] sm:$0xff]  ;;  %v3854_v0 = vld [vmem:[%s5213_s20 + $0x68] sm:$0xff]  ;;  %v3855_v1 = vld [vmem:[%s5213_s20 + $0x70] sm:$0xff] }
  0x44   : > { %4425 = vrsqrt.f32 %v5244_v25  ;;  %v356_v44 = vsub.f32 %v3850_v35, %v3858_v37  ;;  %v5262_v45 = vadd.f32 1e-06, %v261_v34  ;;  %v5264_v46 = vadd.f32 1e-06, %v262_v38  ;;  %v3862_v4 = vld [vmem:[%s5220_s18 + $0x68] sm:$0xff]  ;;  %v3863_v5 = vld [vmem:[%s5220_s18 + $0x70] sm:$0xff]  ;;  %p4999_p7 = pnand %p4998_p4, %p4992_p2 }
  0x45   : > { %4427 = vrsqrt.f32 %v5250_v32  ;;  %v357_v47 = vsub.f32 %v3851_v41, %v3859_v42  ;;  %v363_v48 = vmul.f32 %v355_v43, %v355_v43  ;;  %v5266_v49 = vadd.f32 1e-06, %v263_v39  ;;  %v3856_v6 = vld [vmem:[%s5213_s20 + $0x78] sm:$0xff]  ;;  %v3865_v35 = vld [vmem:[%s5213_s20 + $0x80] sm:$0xff] }
  0x46   : > { %4429 = vrsqrt.f32 %v5257_v40  ;;  %v364_v52 = vmul.f32 %v356_v44, %v356_v44  ;;  %v358_v55 = vsub.f32 %v3852_v50, %v3860_v51  ;;  %vm274_vm0 = vcmp.eq.f32.partialorder %v5236_v17, inf  ;;  %v3864_v7 = vld [vmem:[%s5220_s18 + $0x78] sm:$0xff]  ;;  %v3873_v36 = vld [vmem:[%s5220_s18 + $0x80] sm:$0xff]  ;;  %v3866_v44 = vld [vmem:[%s5213_s20 + $0x88] sm:$0xff] }
  0x47   : > { %4431 = vrsqrt.f32 %v5262_v45  ;;  %v365_v56 = vmul.f32 %v357_v47, %v357_v47  ;;  %v5273_v57 = vadd.f32 1e-06, %v363_v48  ;;  %vm276_vm1 = vcmp.eq.f32.partialorder %v5236_v17, 0.0  ;;  %v3874_v47 = vld [vmem:[%s5220_s18 + $0x88] sm:$0xff] }
  0x48   : > { %4433 = vrsqrt.f32 %v5264_v46  ;;  %v5280_v62 = vadd.f32 1e-06, %v364_v52  ;;  %vm281_vm2 = vcmp.eq.f32.partialorder %v5240_v20, inf  ;;  %v277_v2 = vand.u32 2147483648, %v5236_v17 }
  0x49   : > { %4435 = vrsqrt.f32 %v5266_v49  ;;  %vm283_vm3 = vcmp.eq.f32.partialorder %v5240_v20, 0.0  ;;  %v284_v3 = vand.u32 2147483648, %v5240_v20  ;;  %vm288_vm4 = vcmp.eq.f32.partialorder %v5244_v25, inf }
  0x4a   : > { %v359_v8 = vsub.f32 %v3853_v60, %v3861_v61  ;;  %v366_v9 = vmul.f32 %v358_v55, %v358_v55  ;;  %v5295_v10 = vadd.f32 1e-06, %v365_v56  ;;  %4437 = vrsqrt.f32 %v5273_v57 }
  0x4b   : > { %4439 = vrsqrt.f32 %v5280_v62  ;;  %vm290_vm5 = vcmp.eq.f32.partialorder %v5244_v25, 0.0  ;;  %v291_v15 = vand.u32 2147483648, %v5244_v25  ;;  %v360_v16 = vsub.f32 %v3854_v0, %v3862_v4 }
  0x4c   : > { %v361_v18 = vsub.f32 %v3855_v1, %v3863_v5  ;;  %vm295_vm6 = vcmp.eq.f32.partialorder %v5250_v32, inf  ;;  %vm297_vm7 = vcmp.eq.f32.partialorder %v5250_v32, 0.0  ;;  %v298_v19 = vand.u32 2147483648, %v5250_v32 }
  0x4d   : > { %v362_v21 = vsub.f32 %v3856_v6, %v3864_v7  ;;  %vm302_vm8 = vcmp.eq.f32.partialorder %v5257_v40, inf  ;;  %v367_v24 = vmul.f32 %v359_v8, %v359_v8  ;;  %v5320_v28 = vadd.f32 1e-06, %v366_v9  ;;  %v3868_v7 = vld [vmem:[%s5213_s20 + $0x98] sm:$0xff] }
  0x4e   : > { %4441 = vrsqrt.f32 %v5295_v10  ;;  %vm304_vm9 = vcmp.eq.f32.partialorder %v5257_v40, 0.0  ;;  %v368_v29 = vmul.f32 %v360_v16, %v360_v16  ;;  %v369_v30 = vmul.f32 %v361_v18, %v361_v18  ;;  %v3876_v8 = vld [vmem:[%s5220_s18 + $0x98] sm:$0xff] }
  0x4f   : > { %v4422_v53 = vpop.eup %4421  ;;  %vm309_vm10 = vcmp.eq.f32.partialorder %v5262_v45, inf  ;;  %v312_v31 = vand.u32 2147483648, %v5262_v45  ;;  %v370_v34 = vmul.f32 %v362_v21, %v362_v21  ;;  %vm311_vm11 = vcmp.eq.f32.partialorder %v5262_v45, 0.0 }
  0x50   : > { %v4424_v54 = vpop.eup %4423  ;;  %v273_v58 = vmul.f32 %v4422_v53, %v5236_v17  ;;  %vm316_vm12 = vcmp.eq.f32.partialorder %v5264_v46, inf  ;;  %v319_v39 = vand.u32 2147483648, %v5264_v46  ;;  %vm323_vm13 = vcmp.eq.f32.partialorder %v5266_v49, inf }
  0x51   : > { %v280_v59 = vmul.f32 %v4424_v54, %v5240_v20  ;;  %v4426_v63 = vpop.eup %4425  ;;  %vm318_vm14 = vcmp.eq.f32.partialorder %v5264_v46, 0.0  ;;  %vm325_vm15 = vcmp.eq.f32.partialorder %v5266_v49, 0.0  ;;  %4443 = vrsqrt.f32 %v5320_v28 }
  0x52   : > { %v275_v11 = vsel %vm274_vm0, %v5236_v17, %v273_v58  ;;  %v287_v13 = vmul.f32 %v4426_v63, %v5244_v25  ;;  %v4428_v14 = vpop.eup %4427  ;;  %v326_v50 = vand.u32 2147483648, %v5266_v49  ;;  %v5347_v51 = vadd.f32 1e-06, %v368_v29  ;;  %v3867_v58 = vld [vmem:[%s5213_s20 + $0x90] sm:$0xff] }
  0x53   : > { %v282_v12 = vsel %vm281_vm2, %v5240_v20, %v280_v59  ;;  %v278_v22 = vsel %vm276_vm1, %v277_v2, %v275_v11  ;;  %v294_v27 = vmul.f32 %v4428_v14, %v5250_v32  ;;  %v4430_v17 = vpop.eup %4429  ;;  %v305_v20 = vand.u32 2147483648, %v5257_v40  ;;  %v3875_v59 = vld [vmem:[%s5220_s18 + $0x90] sm:$0xff] }
  0x54   : > { %v285_v23 = vsel %vm283_vm3, %v284_v3, %v282_v12  ;;  %v289_v26 = vsel %vm288_vm4, %v5244_v25, %v287_v13  ;;  %v4432_v37 = vpop.eup %4431  ;;  %v301_v43 = vmul.f32 %v4430_v17, %v5257_v40  ;;  %v5341_v25 = vadd.f32 1e-06, %v367_v24  ;;  %v3869_v17 = vld [vmem:[%s5213_s20 + $0xa0] sm:$0xff] }
  0x55   : > { %v328_v33 = vadd.f32 %v285_v23, %v278_v22  ;;  %v292_v38 = vsel %vm290_vm5, %v291_v15, %v289_v26  ;;  %v4434_v41 = vpop.eup %4433  ;;  %v296_v42 = vsel %vm295_vm6, %v5250_v32, %v294_v27  ;;  %v5349_v52 = vadd.f32 1e-06, %v369_v30 }
  0x56   : > { %v4436_v48 = vpop.eup %4435  ;;  %v462_v53 = vsub.f32 %v3865_v35, %v3873_v36  ;;  %v5351_v55 = vadd.f32 1e-06, %v370_v34  ;;  %vm381_vm0 = vcmp.eq.f32.partialorder %v5273_v57, inf  ;;  %v384_v56 = vand.u32 2147483648, %v5273_v57  ;;  %v3872_v34 = vld [vmem:[%s5213_s20 + $0xb8] sm:$0xff] }
  0x57   : > { %v329_v54 = vadd.f32 %v328_v33, %v292_v38  ;;  %v299_v60 = vsel %vm297_vm7, %v298_v19, %v296_v42  ;;  %v308_v61 = vmul.f32 %v4432_v37, %v5262_v45  ;;  %vm383_vm1 = vcmp.eq.f32.partialorder %v5273_v57, 0.0  ;;  %v4438_v0 = vpop.eup %4437  ;;  %v3871_v33 = vld [vmem:[%s5213_s20 + $0xb0] sm:$0xff]  ;;  %v3880_v37 = vld [vmem:[%s5220_s18 + $0xb8] sm:$0xff] }
  0x58   : > { %vm388_vm2 = vcmp.eq.f32.partialorder %v5280_v62, inf  ;;  %v463_v63 = vsub.f32 %v3866_v44, %v3874_v47  ;;  %v303_v1 = vsel %vm302_vm8, %v5257_v40, %v301_v43  ;;  %v315_v2 = vmul.f32 %v4434_v41, %v5264_v46  ;;  %v4440_v32 = vpop.eup %4439 }
  0x59   : > { %v322_v3 = vmul.f32 %v4436_v48, %v5266_v49  ;;  %4445 = vrsqrt.f32 %v5341_v25  ;;  %vm390_vm3 = vcmp.eq.f32.partialorder %v5280_v62, 0.0  ;;  %v391_v4 = vand.u32 2147483648, %v5280_v62 }
  0x5a   : > { %vm395_vm4 = vcmp.eq.f32.partialorder %v5295_v10, inf  ;;  %v464_v5 = vsub.f32 %v3867_v58, %v3875_v59  ;;  %v330_v6 = vadd.f32 %v329_v54, %v299_v60  ;;  %4447 = vrsqrt.f32 %v5347_v51 }
  0x5b   : > { %v470_v9 = vmul.f32 %v462_v53, %v462_v53  ;;  %v471_v11 = vmul.f32 %v463_v63, %v463_v63  ;;  %v306_v12 = vsel %vm304_vm9, %v305_v20, %v303_v1  ;;  %v310_v13 = vsel %vm309_vm10, %v5262_v45, %v308_v61  ;;  %v4442_v18 = vpop.eup %4441  ;;  %v3877_v20 = vld [vmem:[%s5220_s18 + $0xa0] sm:$0xff] }
  0x5c   : > { %v380_v14 = vmul.f32 %v4438_v0, %v5273_v57  ;;  %4449 = vrsqrt.f32 %v5349_v52  ;;  %v317_v15 = vsel %vm316_vm12, %v5264_v46, %v315_v2  ;;  %v324_v16 = vsel %vm323_vm13, %v5266_v49, %v322_v3  ;;  %v3878_v46 = vld [vmem:[%s5220_s18 + $0xa8] sm:$0xff]  ;;  %v3879_v49 = vld [vmem:[%s5220_s18 + $0xb0] sm:$0xff] }
  0x5d   : > { %v387_v40 = vmul.f32 %v4440_v32, %v5280_v62  ;;  %4451 = vrsqrt.f32 %v5351_v55  ;;  %v465_v19 = vsub.f32 %v3868_v7, %v3876_v8  ;;  %v472_v21 = vmul.f32 %v464_v5, %v464_v5  ;;  %v3881_v8 = vld [vmem:[%s5213_s20 + $0xc0] sm:$0xff] }
  0x5e   : > { %v5389_v22 = vadd.f32 1e-06, %v470_v9  ;;  %v5391_v23 = vadd.f32 1e-06, %v471_v11  ;;  %v313_v24 = vsel %vm311_vm11, %v312_v31, %v310_v13  ;;  %v331_v26 = vadd.f32 %v330_v6, %v306_v12  ;;  %v3870_v31 = vld [vmem:[%s5213_s20 + $0xa8] sm:$0xff]  ;;  %v4444_v38 = vpop.eup %4443  ;;  %v3889_v13 = vld [vmem:[%s5220_s18 + $0xc0] sm:$0xff] }
  0x5f   : > { %vm397_vm5 = vcmp.eq.f32.partialorder %v5295_v10, 0.0  ;;  %v398_v27 = vand.u32 2147483648, %v5295_v10  ;;  %v320_v29 = vsel %vm318_vm14, %v319_v39, %v317_v15  ;;  %v327_v30 = vsel %vm325_vm15, %v326_v50, %v324_v16  ;;  %v3882_v12 = vld [vmem:[%s5213_s20 + $0xc8] sm:$0xff] }
  0x60   : > { %v382_v45 = vsel %vm381_vm0, %v5273_v57, %v380_v14  ;;  %vm402_vm6 = vcmp.eq.f32.partialorder %v5320_v28, inf  ;;  %v389_v35 = vsel %vm388_vm2, %v5280_v62, %v387_v40  ;;  %v394_v36 = vmul.f32 %v4442_v18, %v5295_v10  ;;  %v3883_v18 = vld [vmem:[%s5213_s20 + $0xd0] sm:$0xff] }
  0x61   : > { %vm404_vm7 = vcmp.eq.f32.partialorder %v5320_v28, 0.0  ;;  %4453 = vrsqrt.f32 %v5389_v22  ;;  %v466_v39 = vsub.f32 %v3869_v17, %v3877_v20  ;;  %v473_v41 = vmul.f32 %v465_v19, %v465_v19  ;;  %v3890_v19 = vld [vmem:[%s5220_s18 + $0xc8] sm:$0xff] }
  0x62   : > { %v5423_v42 = vadd.f32 1e-06, %v472_v21  ;;  %4455 = vrsqrt.f32 %v5391_v23  ;;  %v332_v43 = vadd.f32 %v331_v26, %v313_v24  ;;  %v385_v44 = vsel %vm383_vm1, %v384_v56, %v382_v45  ;;  %v3891_v21 = vld [vmem:[%s5220_s18 + $0xd0] sm:$0xff] }
  0x63   : > { %v405_v47 = vand.u32 2147483648, %v5320_v28  ;;  %vm409_vm8 = vcmp.eq.f32.partialorder %v5341_v25, inf  ;;  %v392_v48 = vsel %vm390_vm3, %v391_v4, %v389_v35  ;;  %v467_v50 = vsub.f32 %v3870_v31, %v3878_v46  ;;  %v3884_v46 = vld [vmem:[%s5213_s20 + $0xd8] sm:$0xff] }
  0x64   : > { %v468_v53 = vsub.f32 %v3871_v33, %v3879_v49  ;;  %v469_v54 = vsub.f32 %v3872_v34, %v3880_v37  ;;  %v396_v58 = vsel %vm395_vm4, %v5295_v10, %v394_v36  ;;  %v401_v59 = vmul.f32 %v4444_v38, %v5320_v28  ;;  %v3892_v49 = vld [vmem:[%s5220_s18 + $0xd8] sm:$0xff] }
  0x65   : > { %vm411_vm9 = vcmp.eq.f32.partialorder %v5341_v25, 0.0  ;;  %v412_v57 = vand.u32 2147483648, %v5341_v25  ;;  %vm416_vm10 = vcmp.eq.f32.partialorder %v5347_v51, inf  ;;  %v474_v60 = vmul.f32 %v466_v39, %v466_v39 }
  0x66   : > { %v4446_v56 = vpop.eup %4445  ;;  %v5441_v61 = vadd.f32 1e-06, %v473_v41  ;;  %4457 = vrsqrt.f32 %v5423_v42  ;;  %v333_v62 = vadd.f32 %v332_v43, %v320_v29  ;;  %vm418_vm11 = vcmp.eq.f32.partialorder %v5347_v51, 0.0 }
  0x67   : > { %v419_v63 = vand.u32 2147483648, %v5347_v51  ;;  %vm423_vm12 = vcmp.eq.f32.partialorder %v5349_v52, inf  ;;  %v435_v0 = vadd.f32 %v392_v48, %v385_v44  ;;  %v4448_v1 = vpop.eup %4447  ;;  %v399_v2 = vsel %vm397_vm5, %v398_v27, %v396_v58 }
  0x68   : > { %v475_v3 = vmul.f32 %v467_v50, %v467_v50  ;;  %v476_v32 = vmul.f32 %v468_v53, %v468_v53  ;;  %v477_v4 = vmul.f32 %v469_v54, %v469_v54  ;;  %v403_v6 = vsel %vm402_vm6, %v5320_v28, %v401_v59  ;;  %v3885_v50 = vld [vmem:[%s5213_s20 + $0xe0] sm:$0xff] }
  0x69   : > { %v4450_v5 = vpop.eup %4449  ;;  %v408_v7 = vmul.f32 %v4446_v56, %v5341_v25  ;;  %vm425_vm13 = vcmp.eq.f32.partialorder %v5349_v52, 0.0  ;;  %v426_v10 = vand.u32 2147483648, %v5349_v52  ;;  %vm430_vm14 = vcmp.eq.f32.partialorder %v5351_v55, inf  ;;  %v3893_v53 = vld [vmem:[%s5220_s18 + $0xe0] sm:$0xff] }
  0x6a   : > { %v4452_v9 = vpop.eup %4451  ;;  %vm432_vm15 = vcmp.eq.f32.partialorder %v5351_v55, 0.0  ;;  %v5458_v11 = vadd.f32 1e-06, %v474_v60  ;;  %4459 = vrsqrt.f32 %v5441_v61  ;;  %v5463_v14 = vadd.f32 %v333_v62, %v327_v30 }
  0x6b   : > { %v415_v15 = vmul.f32 %v4448_v1, %v5347_v51  ;;  %v433_v16 = vand.u32 2147483648, %v5351_v55  ;;  %v436_v40 = vadd.f32 %v435_v0, %v399_v2  ;;  %v406_v24 = vsel %vm404_vm7, %v405_v47, %v403_v6  ;;  %v3886_v1 = vld [vmem:[%s5213_s20 + $0xe8] sm:$0xff] }
  0x6c   : > { %v5472_v26 = vadd.f32 1e-06, %v475_v3  ;;  %v5474_v27 = vadd.f32 1e-06, %v476_v32  ;;  %v5476_v17 = vadd.f32 1e-06, %v477_v4  ;;  %v410_v20 = vsel %vm409_vm8, %v5341_v25, %v408_v7 }
  0x6d   : > { %v422_v29 = vmul.f32 %v4450_v5, %v5349_v52  ;;  %vm488_vm0 = vcmp.eq.f32.partialorder %v5389_v22, inf  ;;  %v569_v30 = vsub.f32 %v3881_v8, %v3889_v13  ;;  %v429_v28 = vmul.f32 %v4452_v9, %v5351_v55  ;;  %v3887_v32 = vld [vmem:[%s5213_s20 + $0xf0] sm:$0xff]  ;;  %v3894_v4 = vld [vmem:[%s5220_s18 + $0xe8] sm:$0xff]  ;;  %v3896_v13 = vld [vmem:[%s5220_s18 + $0xf8] sm:$0xff] }
  0x6e   : > { %v4454_v45 = vpop.eup %4453  ;;  %vm490_vm1 = vcmp.eq.f32.partialorder %v5389_v22, 0.0  ;;  %4461 = vrsqrt.f32 %v5458_v11  ;;  %v570_v31 = vsub.f32 %v3882_v12, %v3890_v19  ;;  %v417_v34 = vsel %vm416_vm10, %v5347_v51, %v415_v15  ;;  %v3888_v12 = vld [vmem:[%s5213_s20 + $0xf8] sm:$0xff] }
  0x6f   : > { %v4456_v33 = vpop.eup %4455  ;;  %v437_v35 = vadd.f32 %v436_v40, %v406_v24  ;;  %v491_v36 = vand.u32 2147483648, %v5389_v22  ;;  %v571_v37 = vsub.f32 %v3883_v18, %v3891_v21  ;;  %v413_v38 = vsel %vm411_vm9, %v412_v57, %v410_v20 }
  0x70   : > { %4463 = vrsqrt.f32 %v5472_v26  ;;  %v577_v39 = vmul.f32 %v569_v30, %v569_v30  ;;  %v578_v41 = vmul.f32 %v570_v31, %v570_v31  ;;  %v424_v43 = vsel %vm423_vm12, %v5349_v52, %v422_v29 }
  0x71   : > { %v487_v44 = vmul.f32 %v4454_v45, %v5389_v22  ;;  %vm495_vm2 = vcmp.eq.f32.partialorder %v5391_v23, inf  ;;  %vm497_vm3 = vcmp.eq.f32.partialorder %v5391_v23, 0.0  ;;  %v420_v47 = vsel %vm418_vm11, %v419_v63, %v417_v34 }
  0x72   : > { %v431_v25 = vsel %vm430_vm14, %v5351_v55, %v429_v28  ;;  %v494_v48 = vmul.f32 %v4456_v33, %v5391_v23  ;;  %v572_v54 = vsub.f32 %v3884_v46, %v3892_v49  ;;  %v438_v59 = vadd.f32 %v437_v35, %v413_v38  ;;  %v3895_v55 = vld [vmem:[%s5220_s18 + $0xf0] sm:$0xff] }
  0x73   : > { %v4458_v58 = vpop.eup %4457  ;;  %v579_v57 = vmul.f32 %v571_v37, %v571_v37  ;;  %v5509_v56 = vadd.f32 1e-06, %v577_v39  ;;  %v5511_v51 = vadd.f32 1e-06, %v578_v41  ;;  %v427_v60 = vsel %vm425_vm13, %v426_v10, %v424_v43  ;;  %v3897_v43 = vld [vmem:[%s5213_s20 + $0x100] sm:$0xff] }
  0x74   : > { %v498_v62 = vand.u32 2147483648, %v5391_v23  ;;  %vm502_vm4 = vcmp.eq.f32.partialorder %v5423_v42, inf  ;;  %4465 = vrsqrt.f32 %v5474_v27  ;;  %v434_v63 = vsel %vm432_vm15, %v433_v16, %v431_v25 }
  0x75   : > { %v489_v0 = vsel %vm488_vm0, %v5389_v22, %v487_v44  ;;  %4467 = vrsqrt.f32 %v5476_v17  ;;  %v573_v2 = vsub.f32 %v3885_v50, %v3893_v53  ;;  %v496_v52 = vsel %vm495_vm2, %v5391_v23, %v494_v48  ;;  %v3905_v44 = vld [vmem:[%s5220_s18 + $0x100] sm:$0xff]  ;;  %v3898_v50 = vld [vmem:[%s5213_s20 + $0x108] sm:$0xff] }
  0x76   : > { %v501_v3 = vmul.f32 %v4458_v58, %v5423_v42  ;;  %v580_v5 = vmul.f32 %v572_v54, %v572_v54  ;;  %4469 = vrsqrt.f32 %v5509_v56  ;;  %v439_v7 = vadd.f32 %v438_v59, %v420_v47  ;;  %v3906_v53 = vld [vmem:[%s5220_s18 + $0x108] sm:$0xff] }
  0x77   : > { %v4460_v6 = vpop.eup %4459  ;;  %vm504_vm5 = vcmp.eq.f32.partialorder %v5423_v42, 0.0  ;;  %v5534_v10 = vadd.f32 1e-06, %v579_v57  ;;  %4471 = vrsqrt.f32 %v5511_v51  ;;  %v505_v8 = vand.u32 2147483648, %v5423_v42 }
  0x78   : > { %vm509_vm6 = vcmp.eq.f32.partialorder %v5441_v61, inf  ;;  %vm511_vm7 = vcmp.eq.f32.partialorder %v5441_v61, 0.0  ;;  %v512_v9 = vand.u32 2147483648, %v5441_v61  ;;  %v492_v15 = vsel %vm490_vm1, %v491_v36, %v489_v0 }
  0x79   : > { %v499_v16 = vsel %vm497_vm3, %v498_v62, %v496_v52  ;;  %v574_v40 = vsub.f32 %v3886_v1, %v3894_v4  ;;  %v575_v18 = vsub.f32 %v3887_v32, %v3895_v55  ;;  %v503_v19 = vsel %vm502_vm4, %v5423_v42, %v501_v3  ;;  %v3899_v62 = vld [vmem:[%s5213_s20 + $0x110] sm:$0xff] }
  0x7a   : > { %v508_v21 = vmul.f32 %v4460_v6, %v5441_v61  ;;  %v581_v24 = vmul.f32 %v573_v2, %v573_v2  ;;  %v5551_v20 = vadd.f32 1e-06, %v580_v5  ;;  %v440_v30 = vadd.f32 %v439_v7, %v427_v60 }
  0x7b   : > { %v4462_v29 = vpop.eup %4461  ;;  %vm516_vm8 = vcmp.eq.f32.partialorder %v5458_v11, inf  ;;  %v576_v22 = vsub.f32 %v3888_v12, %v3896_v13  ;;  %4473 = vrsqrt.f32 %v5534_v10  ;;  %vm518_vm9 = vcmp.eq.f32.partialorder %v5458_v11, 0.0 }
  0x7c   : > { %v519_v23 = vand.u32 2147483648, %v5458_v11  ;;  %vm523_vm10 = vcmp.eq.f32.partialorder %v5472_v26, inf  ;;  %v542_v45 = vadd.f32 %v499_v16, %v492_v15  ;;  %v506_v31 = vsel %vm504_vm5, %v505_v8, %v503_v19  ;;  %v3900_v8 = vld [vmem:[%s5213_s20 + $0x118] sm:$0xff] }
  0x7d   : > { %v4464_v28 = vpop.eup %4463  ;;  %vm525_vm11 = vcmp.eq.f32.partialorder %v5472_v26, 0.0  ;;  %v582_v33 = vmul.f32 %v574_v40, %v574_v40  ;;  %v583_v34 = vmul.f32 %v575_v18, %v575_v18  ;;  %v510_v35 = vsel %vm509_vm6, %v5441_v61, %v508_v21 }
  0x7e   : > { %v515_v36 = vmul.f32 %v4462_v29, %v5458_v11  ;;  %v5565_v46 = vadd.f32 1e-06, %v581_v24  ;;  %4475 = vrsqrt.f32 %v5551_v20  ;;  %v5568_v49 = vadd.f32 %v440_v30, %v434_v63  ;;  %v3907_v63 = vld [vmem:[%s5220_s18 + $0x110] sm:$0xff] }
  0x7f   : > { %v526_v42 = vand.u32 2147483648, %v5472_v26  ;;  %vm530_vm12 = vcmp.eq.f32.partialorder %v5474_v27, inf  ;;  %v584_v37 = vmul.f32 %v576_v22, %v576_v22  ;;  %v522_v38 = vmul.f32 %v4464_v28, %v5472_v26 }
  0x80   : > { %vm532_vm13 = vcmp.eq.f32.partialorder %v5474_v27, 0.0  ;;  %v533_v39 = vand.u32 2147483648, %v5474_v27  ;;  %v543_v41 = vadd.f32 %v542_v45, %v506_v31  ;;  %v513_v25 = vsel %vm511_vm7, %v512_v9, %v510_v35  ;;  %v3908_v9 = vld [vmem:[%s5220_s18 + $0x118] sm:$0xff]  ;;  %v3909_v45 = vld [vmem:[%s5220_s18 + $0x120] sm:$0xff] }
  0x81   : > { %v4466_v47 = vpop.eup %4465  ;;  %vm537_vm14 = vcmp.eq.f32.partialorder %v5476_v17, inf  ;;  %vm539_vm15 = vcmp.eq.f32.partialorder %v5476_v17, 0.0  ;;  %v5581_v48 = vadd.f32 1e-06, %v582_v33  ;;  %v517_v58 = vsel %vm516_vm8, %v5458_v11, %v515_v36 }
  0x82   : > { %v4468_v54 = vpop.eup %4467  ;;  %v540_v59 = vand.u32 2147483648, %v5476_v17  ;;  %v5589_v57 = vadd.f32 1e-06, %v583_v34  ;;  %4477 = vrsqrt.f32 %v5565_v46  ;;  %v5592_v60 = vadd.f32 1e-06, %v584_v37 }
  0x83   : > { %v4470_v61 = vpop.eup %4469  ;;  %vm595_vm0 = vcmp.eq.f32.partialorder %v5509_v56, inf  ;;  %vm597_vm1 = vcmp.eq.f32.partialorder %v5509_v56, 0.0  ;;  %v676_v0 = vsub.f32 %v3897_v43, %v3905_v44  ;;  %v524_v2 = vsel %vm523_vm10, %v5472_v26, %v522_v38  ;;  %v3910_v38 = vld [vmem:[%s5220_s18 + $0x128] sm:$0xff]  ;;  %v3903_v43 = vld [vmem:[%s5213_s20 + $0x130] sm:$0xff] }
  0x84   : > { %v4472_v1 = vpop.eup %4471  ;;  %v529_v52 = vmul.f32 %v4466_v47, %v5474_v27  ;;  %v544_v3 = vadd.f32 %v543_v41, %v513_v25  ;;  %v677_v32 = vsub.f32 %v3898_v50, %v3906_v53  ;;  %v520_v4 = vsel %vm518_vm9, %v519_v23, %v517_v58  ;;  %v3901_v23 = vld [vmem:[%s5213_s20 + $0x120] sm:$0xff]  ;;  %v3911_v44 = vld [vmem:[%s5220_s18 + $0x130] sm:$0xff]  ;;  %v3904_v53 = vld [vmem:[%s5213_s20 + $0x138] sm:$0xff] }
  0x85   : > { %v536_v55 = vmul.f32 %v4468_v54, %v5476_v17  ;;  %v598_v5 = vand.u32 2147483648, %v5509_v56  ;;  %4479 = vrsqrt.f32 %v5581_v48  ;;  %v594_v6 = vmul.f32 %v4470_v61, %v5509_v56  ;;  %v3912_v54 = vld [vmem:[%s5220_s18 + $0x138] sm:$0xff] }
  0x86   : > { %v601_v7 = vmul.f32 %v4472_v1, %v5511_v51  ;;  %v678_v12 = vsub.f32 %v3899_v62, %v3907_v63  ;;  %v684_v13 = vmul.f32 %v676_v0, %v676_v0  ;;  %v527_v15 = vsel %vm525_vm11, %v526_v42, %v524_v2 }
  0x87   : > { %vm602_vm2 = vcmp.eq.f32.partialorder %v5511_v51, inf  ;;  %vm604_vm3 = vcmp.eq.f32.partialorder %v5511_v51, 0.0  ;;  %v685_v11 = vmul.f32 %v677_v32, %v677_v32  ;;  %v531_v40 = vsel %vm530_vm12, %v5474_v27, %v529_v52 }
  0x88   : > { %v4474_v16 = vpop.eup %4473  ;;  %v545_v18 = vadd.f32 %v544_v3, %v520_v4  ;;  %v605_v19 = vand.u32 2147483648, %v5511_v51  ;;  %4481 = vrsqrt.f32 %v5589_v57  ;;  %v538_v26 = vsel %vm537_vm14, %v5476_v17, %v536_v55 }
  0x89   : > { %4483 = vrsqrt.f32 %v5592_v60  ;;  %v679_v21 = vsub.f32 %v3900_v8, %v3908_v9  ;;  %v5624_v24 = vadd.f32 1e-06, %v684_v13  ;;  %v596_v29 = vsel %vm595_vm0, %v5509_v56, %v594_v6  ;;  %v3913_v9 = vld [vmem:[%s5213_s20 + $0x140] sm:$0xff] }
  0x8a   : > { %v603_v30 = vsel %vm602_vm2, %v5511_v51, %v601_v7  ;;  %v608_v22 = vmul.f32 %v4474_v16, %v5534_v10  ;;  %v686_v28 = vmul.f32 %v678_v12, %v678_v12  ;;  %v5635_v33 = vadd.f32 %v5568_v49, %v5463_v14  ;;  %v3902_v49 = vld [vmem:[%s5213_s20 + $0x128] sm:$0xff]  ;;  %v3921_v12 = vld [vmem:[%s5220_s18 + $0x140] sm:$0xff] }
  0x8b   : > { %v4476_v31 = vpop.eup %4475  ;;  %v534_v34 = vsel %vm532_vm13, %v533_v39, %v531_v40  ;;  %vm609_vm4 = vcmp.eq.f32.partialorder %v5534_v10, inf  ;;  %v5640_v35 = vadd.f32 1e-06, %v685_v11  ;;  %v541_v36 = vsel %vm539_vm15, %v540_v59, %v538_v26 }
  0x8c   : > { %v546_v42 = vadd.f32 %v545_v18, %v527_v15  ;;  %vm611_vm5 = vcmp.eq.f32.partialorder %v5534_v10, 0.0  ;;  %v612_v37 = vand.u32 2147483648, %v5534_v10  ;;  %v599_v14 = vsel %vm597_vm1, %v598_v5, %v596_v29  ;;  %v3914_v18 = vld [vmem:[%s5213_s20 + $0x148] sm:$0xff] }
  0x8d   : > { %v606_v27 = vsel %vm604_vm3, %v605_v19, %v603_v30  ;;  %v680_v39 = vsub.f32 %v3901_v23, %v3909_v45  ;;  %4485 = vrsqrt.f32 %v5624_v24  ;;  %v610_v17 = vsel %vm609_vm4, %v5534_v10, %v608_v22  ;;  %v3922_v19 = vld [vmem:[%s5220_s18 + $0x148] sm:$0xff]  ;;  %v3915_v30 = vld [vmem:[%s5213_s20 + $0x150] sm:$0xff] }
  0x8e   : > { %v615_v41 = vmul.f32 %v4476_v31, %v5551_v20  ;;  %v687_v47 = vmul.f32 %v679_v21, %v679_v21  ;;  %v5657_v25 = vadd.f32 1e-06, %v686_v28  ;;  %vm616_vm6 = vcmp.eq.f32.partialorder %v5551_v20, inf  ;;  %v3923_v22 = vld [vmem:[%s5220_s18 + $0x150] sm:$0xff] }
  0x8f   : > { %v4478_v56 = vpop.eup %4477  ;;  %vm618_vm7 = vcmp.eq.f32.partialorder %v5551_v20, 0.0  ;;  %v619_v51 = vand.u32 2147483648, %v5551_v20  ;;  %4487 = vrsqrt.f32 %v5640_v35  ;;  %vm623_vm8 = vcmp.eq.f32.partialorder %v5565_v46, inf }
  0x90   : > { %vm625_vm9 = vcmp.eq.f32.partialorder %v5565_v46, 0.0  ;;  %v649_v50 = vadd.f32 %v606_v27, %v599_v14  ;;  %v681_v58 = vsub.f32 %v3902_v49, %v3910_v38  ;;  %v547_v59 = vadd.f32 %v546_v42, %v534_v34 }
  0x91   : > { %v613_v61 = vsel %vm611_vm5, %v612_v37, %v610_v17  ;;  %v682_v62 = vsub.f32 %v3903_v43, %v3911_v44  ;;  %v688_v63 = vmul.f32 %v680_v39, %v680_v39  ;;  %v617_v1 = vsel %vm616_vm6, %v5551_v20, %v615_v41 }
  0x92   : > { %v4480_v0 = vpop.eup %4479  ;;  %v622_v2 = vmul.f32 %v4478_v56, %v5565_v46  ;;  %v5671_v52 = vadd.f32 1e-06, %v687_v47  ;;  %4489 = vrsqrt.f32 %v5657_v25  ;;  %v626_v3 = vand.u32 2147483648, %v5565_v46 }
  0x93   : > { %vm630_vm10 = vcmp.eq.f32.partialorder %v5581_v48, inf  ;;  %vm632_vm11 = vcmp.eq.f32.partialorder %v5581_v48, 0.0  ;;  %v683_v10 = vsub.f32 %v3904_v53, %v3912_v54  ;;  %v633_v32 = vand.u32 2147483648, %v5581_v48  ;;  %v3917_v53 = vld [vmem:[%s5213_s20 + $0x160] sm:$0xff] }
  0x94   : > { %vm637_vm12 = vcmp.eq.f32.partialorder %v5589_v57, inf  ;;  %v650_v4 = vadd.f32 %v649_v50, %v613_v61  ;;  %v689_v55 = vmul.f32 %v681_v58, %v681_v58  ;;  %v548_v6 = vadd.f32 %v547_v59, %v541_v36  ;;  %v3925_v54 = vld [vmem:[%s5220_s18 + $0x160] sm:$0xff] }
  0x95   : > { %v4482_v5 = vpop.eup %4481  ;;  %v620_v7 = vsel %vm618_vm7, %v619_v51, %v617_v1  ;;  %vm639_vm13 = vcmp.eq.f32.partialorder %v5589_v57, 0.0  ;;  %v690_v8 = vmul.f32 %v682_v62, %v682_v62  ;;  %v624_v15 = vsel %vm623_vm8, %v5565_v46, %v622_v2  ;;  %v3916_v46 = vld [vmem:[%s5213_s20 + $0x158] sm:$0xff] }
  0x96   : > { %v4484_v13 = vpop.eup %4483  ;;  %v629_v11 = vmul.f32 %v4480_v0, %v5581_v48  ;;  %v5688_v16 = vadd.f32 1e-06, %v688_v63  ;;  %4491 = vrsqrt.f32 %v5671_v52  ;;  %v640_v20 = vand.u32 2147483648, %v5589_v57 }
  0x97   : > { %vm644_vm14 = vcmp.eq.f32.partialorder %v5592_v60, inf  ;;  %vm646_vm15 = vcmp.eq.f32.partialorder %v5592_v60, 0.0  ;;  %v691_v40 = vmul.f32 %v683_v10, %v683_v10  ;;  %v647_v26 = vand.u32 2147483648, %v5592_v60  ;;  %v3918_v10 = vld [vmem:[%s5213_s20 + $0x168] sm:$0xff] }
  0x98   : > { %v651_v21 = vadd.f32 %v650_v4, %v620_v7  ;;  %v5697_v29 = vadd.f32 1e-06, %v689_v55  ;;  %v783_v23 = vsub.f32 %v3913_v9, %v3921_v12  ;;  %v5702_v45 = vadd.f32 %v548_v6, %v5635_v33  ;;  %v3924_v33 = vld [vmem:[%s5220_s18 + $0x158] sm:$0xff]  ;;  %v3919_v55 = vld [vmem:[%s5213_s20 + $0x170] sm:$0xff] }
  0x99   : > { %v627_v28 = vsel %vm625_vm9, %v626_v3, %v624_v15  ;;  %v636_v31 = vmul.f32 %v4482_v5, %v5589_v57  ;;  %v5707_v34 = vadd.f32 1e-06, %v690_v8  ;;  %v631_v42 = vsel %vm630_vm10, %v5581_v48, %v629_v11  ;;  %v3926_v5 = vld [vmem:[%s5220_s18 + $0x168] sm:$0xff]  ;;  %v3927_v6 = vld [vmem:[%s5220_s18 + $0x170] sm:$0xff]  ;;  %v3928_v15 = vld [vmem:[%s5220_s18 + $0x178] sm:$0xff] }
  0x9a   : > { %v4486_v36 = vpop.eup %4485  ;;  %v643_v37 = vmul.f32 %v4484_v13, %v5592_v60  ;;  %4493 = vrsqrt.f32 %v5688_v16  ;;  %v784_v14 = vsub.f32 %v3914_v18, %v3922_v19  ;;  %v5714_v27 = vadd.f32 1e-06, %v691_v40  ;;  %v3920_v13 = vld [vmem:[%s5213_s20 + $0x178] sm:$0xff] }
  0x9b   : > { %vm702_vm0 = vcmp.eq.f32.partialorder %v5624_v24, inf  ;;  %vm704_vm1 = vcmp.eq.f32.partialorder %v5624_v24, 0.0  ;;  %v785_v49 = vsub.f32 %v3915_v30, %v3923_v22  ;;  %v652_v39 = vadd.f32 %v651_v21, %v627_v28 }
  0x9c   : > { %v4488_v38 = vpop.eup %4487  ;;  %4495 = vrsqrt.f32 %v5697_v29  ;;  %v791_v17 = vmul.f32 %v783_v23, %v783_v23  ;;  %v792_v41 = vmul.f32 %v784_v14, %v784_v14  ;;  %v634_v43 = vsel %vm632_vm11, %v633_v32, %v631_v42 }
  0x9d   : > { %v638_v44 = vsel %vm637_vm12, %v5589_v57, %v636_v31  ;;  %v701_v47 = vmul.f32 %v4486_v36, %v5624_v24  ;;  %v705_v56 = vand.u32 2147483648, %v5624_v24  ;;  %v645_v51 = vsel %vm644_vm14, %v5592_v60, %v643_v37 }
  0x9e   : > { %v708_v50 = vmul.f32 %v4488_v38, %v5640_v35  ;;  %v786_v58 = vsub.f32 %v3916_v46, %v3924_v33  ;;  %v5734_v48 = vadd.f32 1e-06, %v791_v17  ;;  %vm709_vm2 = vcmp.eq.f32.partialorder %v5640_v35, inf }
  0x9f   : > { %v4490_v59 = vpop.eup %4489  ;;  %vm711_vm3 = vcmp.eq.f32.partialorder %v5640_v35, 0.0  ;;  %v793_v61 = vmul.f32 %v785_v49, %v785_v49  ;;  %v5738_v62 = vadd.f32 1e-06, %v792_v41  ;;  %v641_v63 = vsel %vm639_vm13, %v640_v20, %v638_v44  ;;  %v3937_v44 = vld [vmem:[%s5220_s18 + $0x180] sm:$0xff] }
  0xa0   : > { %v653_v0 = vadd.f32 %v652_v39, %v634_v43  ;;  %v712_v1 = vand.u32 2147483648, %v5640_v35  ;;  %4497 = vrsqrt.f32 %v5707_v34  ;;  %v648_v2 = vsel %vm646_vm15, %v647_v26, %v645_v51  ;;  %v3929_v43 = vld [vmem:[%s5213_s20 + $0x180] sm:$0xff] }
  0xa1   : > { %v703_v3 = vsel %vm702_vm0, %v5624_v24, %v701_v47  ;;  %4499 = vrsqrt.f32 %v5714_v27  ;;  %v787_v32 = vsub.f32 %v3917_v53, %v3925_v54  ;;  %v710_v4 = vsel %vm709_vm2, %v5640_v35, %v708_v50  ;;  %v3930_v50 = vld [vmem:[%s5213_s20 + $0x188] sm:$0xff] }
  0xa2   : > { %v715_v57 = vmul.f32 %v4490_v59, %v5657_v25  ;;  %v794_v7 = vmul.f32 %v786_v58, %v786_v58  ;;  %4501 = vrsqrt.f32 %v5734_v48  ;;  %vm716_vm4 = vcmp.eq.f32.partialorder %v5657_v25, inf  ;;  %v3938_v53 = vld [vmem:[%s5220_s18 + $0x188] sm:$0xff] }
  0xa3   : > { %v4492_v60 = vpop.eup %4491  ;;  %vm718_vm5 = vcmp.eq.f32.partialorder %v5657_v25, 0.0  ;;  %v5759_v8 = vadd.f32 1e-06, %v793_v61  ;;  %4503 = vrsqrt.f32 %v5738_v62  ;;  %v654_v9 = vadd.f32 %v653_v0, %v641_v63  ;;  %v3931_v0 = vld [vmem:[%s5213_s20 + $0x190] sm:$0xff] }
  0xa4   : > { %v719_v12 = vand.u32 2147483648, %v5657_v25  ;;  %vm723_vm6 = vcmp.eq.f32.partialorder %v5671_v52, inf  ;;  %vm725_vm7 = vcmp.eq.f32.partialorder %v5671_v52, 0.0  ;;  %v706_v11 = vsel %vm704_vm1, %v705_v56, %v703_v3 }
  0xa5   : > { %v713_v20 = vsel %vm711_vm3, %v712_v1, %v710_v4  ;;  %v788_v40 = vsub.f32 %v3918_v10, %v3926_v5  ;;  %v789_v18 = vsub.f32 %v3919_v55, %v3927_v6  ;;  %v717_v19 = vsel %vm716_vm4, %v5657_v25, %v715_v57  ;;  %v3939_v1 = vld [vmem:[%s5220_s18 + $0x190] sm:$0xff] }
  0xa6   : > { %v722_v26 = vmul.f32 %v4492_v60, %v5671_v52  ;;  %v795_v21 = vmul.f32 %v787_v32, %v787_v32  ;;  %v5773_v30 = vadd.f32 1e-06, %v794_v7  ;;  %v726_v23 = vand.u32 2147483648, %v5671_v52 }
  0xa7   : > { %v4494_v22 = vpop.eup %4493  ;;  %vm730_vm8 = vcmp.eq.f32.partialorder %v5688_v16, inf  ;;  %v790_v28 = vsub.f32 %v3920_v13, %v3928_v15  ;;  %4505 = vrsqrt.f32 %v5759_v8  ;;  %vm732_vm9 = vcmp.eq.f32.partialorder %v5688_v16, 0.0 }
  0xa8   : > { %v733_v24 = vand.u32 2147483648, %v5688_v16  ;;  %vm737_vm10 = vcmp.eq.f32.partialorder %v5697_v29, inf  ;;  %v756_v35 = vadd.f32 %v713_v20, %v706_v11  ;;  %v5781_v36 = vadd.f32 %v654_v9, %v648_v2  ;;  %v3932_v9 = vld [vmem:[%s5213_s20 + $0x198] sm:$0xff] }
  0xa9   : > { %v4496_v31 = vpop.eup %4495  ;;  %v720_v42 = vsel %vm718_vm5, %v719_v12, %v717_v19  ;;  %v796_v37 = vmul.f32 %v788_v40, %v788_v40  ;;  %v797_v14 = vmul.f32 %v789_v18, %v789_v18  ;;  %v724_v46 = vsel %vm723_vm6, %v5671_v52, %v722_v26  ;;  %v3940_v12 = vld [vmem:[%s5220_s18 + $0x198] sm:$0xff] }
  0xaa   : > { %v729_v33 = vmul.f32 %v4494_v22, %v5688_v16  ;;  %v5789_v49 = vadd.f32 1e-06, %v795_v21  ;;  %4507 = vrsqrt.f32 %v5773_v30  ;;  %vm739_vm11 = vcmp.eq.f32.partialorder %v5697_v29, 0.0 }
  0xab   : > { %v740_v25 = vand.u32 2147483648, %v5697_v29  ;;  %vm744_vm12 = vcmp.eq.f32.partialorder %v5707_v34, inf  ;;  %v798_v38 = vmul.f32 %v790_v28, %v790_v28  ;;  %v736_v39 = vmul.f32 %v4496_v31, %v5697_v29 }
  0xac   : > { %vm746_vm13 = vcmp.eq.f32.partialorder %v5707_v34, 0.0  ;;  %v747_v17 = vand.u32 2147483648, %v5707_v34  ;;  %v757_v41 = vadd.f32 %v756_v35, %v720_v42  ;;  %v727_v56 = vsel %vm725_vm7, %v726_v23, %v724_v46  ;;  %v3941_v35 = vld [vmem:[%s5220_s18 + $0x1a0] sm:$0xff] }
  0xad   : > { %v4498_v47 = vpop.eup %4497  ;;  %vm751_vm14 = vcmp.eq.f32.partialorder %v5714_v27, inf  ;;  %vm753_vm15 = vcmp.eq.f32.partialorder %v5714_v27, 0.0  ;;  %v5804_v51 = vadd.f32 1e-06, %v796_v37  ;;  %v731_v58 = vsel %vm730_vm8, %v5688_v16, %v729_v33 }
  0xae   : > { %v4500_v54 = vpop.eup %4499  ;;  %v754_v59 = vand.u32 2147483648, %v5714_v27  ;;  %v5812_v61 = vadd.f32 1e-06, %v797_v14  ;;  %4509 = vrsqrt.f32 %v5789_v49  ;;  %v5815_v63 = vadd.f32 1e-06, %v798_v38 }
  0xaf   : > { %v4502_v52 = vpop.eup %4501  ;;  %vm809_vm0 = vcmp.eq.f32.partialorder %v5734_v48, inf  ;;  %vm811_vm1 = vcmp.eq.f32.partialorder %v5734_v48, 0.0  ;;  %v890_v2 = vsub.f32 %v3929_v43, %v3937_v44  ;;  %v738_v10 = vsel %vm737_vm10, %v5697_v29, %v736_v39  ;;  %v3942_v39 = vld [vmem:[%s5220_s18 + $0x1a8] sm:$0xff]  ;;  %v3935_v43 = vld [vmem:[%s5213_s20 + $0x1b0] sm:$0xff] }
  0xb0   : > { %v4504_v3 = vpop.eup %4503  ;;  %v743_v32 = vmul.f32 %v4498_v47, %v5707_v34  ;;  %v758_v4 = vadd.f32 %v757_v41, %v727_v56  ;;  %v891_v57 = vsub.f32 %v3930_v50, %v3938_v53  ;;  %v734_v55 = vsel %vm732_vm9, %v733_v24, %v731_v58  ;;  %v3933_v24 = vld [vmem:[%s5213_s20 + $0x1a0] sm:$0xff]  ;;  %v3943_v44 = vld [vmem:[%s5220_s18 + $0x1b0] sm:$0xff]  ;;  %v3936_v53 = vld [vmem:[%s5213_s20 + $0x1b8] sm:$0xff] }
  0xb1   : > { %v750_v5 = vmul.f32 %v4500_v54, %v5714_v27  ;;  %v812_v6 = vand.u32 2147483648, %v5734_v48  ;;  %4511 = vrsqrt.f32 %v5804_v51  ;;  %v808_v7 = vmul.f32 %v4502_v52, %v5734_v48  ;;  %v3944_v54 = vld [vmem:[%s5220_s18 + $0x1b8] sm:$0xff] }
  0xb2   : > { %v815_v60 = vmul.f32 %v4504_v3, %v5738_v62  ;;  %v892_v13 = vsub.f32 %v3931_v0, %v3939_v1  ;;  %v898_v15 = vmul.f32 %v890_v2, %v890_v2  ;;  %v741_v11 = vsel %vm739_vm11, %v740_v25, %v738_v10 }
  0xb3   : > { %vm816_vm2 = vcmp.eq.f32.partialorder %v5738_v62, inf  ;;  %vm818_vm3 = vcmp.eq.f32.partialorder %v5738_v62, 0.0  ;;  %v899_v16 = vmul.f32 %v891_v57, %v891_v57  ;;  %v745_v40 = vsel %vm744_vm12, %v5707_v34, %v743_v32 }
  0xb4   : > { %v4506_v20 = vpop.eup %4505  ;;  %v759_v18 = vadd.f32 %v758_v4, %v734_v55  ;;  %v819_v19 = vand.u32 2147483648, %v5738_v62  ;;  %4513 = vrsqrt.f32 %v5812_v61  ;;  %v752_v29 = vsel %vm751_vm14, %v5714_v27, %v750_v5 }
  0xb5   : > { %4515 = vrsqrt.f32 %v5815_v63  ;;  %v893_v26 = vsub.f32 %v3932_v9, %v3940_v12  ;;  %v5847_v21 = vadd.f32 1e-06, %v898_v15  ;;  %v810_v22 = vsel %vm809_vm0, %v5734_v48, %v808_v7  ;;  %v3945_v12 = vld [vmem:[%s5213_s20 + $0x1c0] sm:$0xff] }
  0xb6   : > { %v817_v23 = vsel %vm816_vm2, %v5738_v62, %v815_v60  ;;  %v822_v28 = vmul.f32 %v4506_v20, %v5759_v8  ;;  %v900_v31 = vmul.f32 %v892_v13, %v892_v13  ;;  %v5858_v37 = vadd.f32 %v5781_v36, %v5702_v45  ;;  %v3934_v36 = vld [vmem:[%s5213_s20 + $0x1a8] sm:$0xff]  ;;  %v3953_v13 = vld [vmem:[%s5220_s18 + $0x1c0] sm:$0xff] }
  0xb7   : > { %v4508_v42 = vpop.eup %4507  ;;  %v748_v14 = vsel %vm746_vm13, %v747_v17, %v745_v40  ;;  %vm823_vm4 = vcmp.eq.f32.partialorder %v5759_v8, inf  ;;  %v5863_v46 = vadd.f32 1e-06, %v899_v16  ;;  %v755_v33 = vsel %vm753_vm15, %v754_v59, %v752_v29 }
  0xb8   : > { %v760_v25 = vadd.f32 %v759_v18, %v741_v11  ;;  %vm825_vm5 = vcmp.eq.f32.partialorder %v5759_v8, 0.0  ;;  %v826_v38 = vand.u32 2147483648, %v5759_v8  ;;  %v813_v45 = vsel %vm811_vm1, %v812_v6, %v810_v22  ;;  %v3946_v18 = vld [vmem:[%s5213_s20 + $0x1c8] sm:$0xff] }
  0xb9   : > { %v820_v34 = vsel %vm818_vm3, %v819_v19, %v817_v23  ;;  %v894_v17 = vsub.f32 %v3933_v24, %v3941_v35  ;;  %4517 = vrsqrt.f32 %v5847_v21  ;;  %v824_v27 = vsel %vm823_vm4, %v5759_v8, %v822_v28  ;;  %v3954_v19 = vld [vmem:[%s5220_s18 + $0x1c8] sm:$0xff]  ;;  %v3947_v23 = vld [vmem:[%s5213_s20 + $0x1d0] sm:$0xff] }
  0xba   : > { %v829_v41 = vmul.f32 %v4508_v42, %v5773_v30  ;;  %v901_v47 = vmul.f32 %v893_v26, %v893_v26  ;;  %v5880_v56 = vadd.f32 1e-06, %v900_v31  ;;  %vm830_vm6 = vcmp.eq.f32.partialorder %v5773_v30, inf  ;;  %v3955_v28 = vld [vmem:[%s5220_s18 + $0x1d0] sm:$0xff] }
  0xbb   : > { %v4510_v48 = vpop.eup %4509  ;;  %vm832_vm7 = vcmp.eq.f32.partialorder %v5773_v30, 0.0  ;;  %v833_v62 = vand.u32 2147483648, %v5773_v30  ;;  %4519 = vrsqrt.f32 %v5863_v46  ;;  %vm837_vm8 = vcmp.eq.f32.partialorder %v5789_v49, inf }
  0xbc   : > { %vm839_vm9 = vcmp.eq.f32.partialorder %v5789_v49, 0.0  ;;  %v863_v50 = vadd.f32 %v820_v34, %v813_v45  ;;  %v895_v58 = vsub.f32 %v3934_v36, %v3942_v39  ;;  %v761_v59 = vadd.f32 %v760_v25, %v748_v14 }
  0xbd   : > { %v827_v52 = vsel %vm825_vm5, %v826_v38, %v824_v27  ;;  %v896_v0 = vsub.f32 %v3935_v43, %v3943_v44  ;;  %v902_v1 = vmul.f32 %v894_v17, %v894_v17  ;;  %v831_v3 = vsel %vm830_vm6, %v5773_v30, %v829_v41 }
  0xbe   : > { %v4512_v2 = vpop.eup %4511  ;;  %v836_v10 = vmul.f32 %v4510_v48, %v5789_v49  ;;  %v5894_v32 = vadd.f32 1e-06, %v901_v47  ;;  %4521 = vrsqrt.f32 %v5880_v56  ;;  %v840_v4 = vand.u32 2147483648, %v5789_v49 }
  0xbf   : > { %vm844_vm10 = vcmp.eq.f32.partialorder %v5804_v51, inf  ;;  %vm846_vm11 = vcmp.eq.f32.partialorder %v5804_v51, 0.0  ;;  %v897_v8 = vsub.f32 %v3936_v53, %v3944_v54  ;;  %v847_v57 = vand.u32 2147483648, %v5804_v51  ;;  %v3949_v53 = vld [vmem:[%s5213_s20 + $0x1e0] sm:$0xff] }
  0xc0   : > { %vm851_vm12 = vcmp.eq.f32.partialorder %v5812_v61, inf  ;;  %v864_v55 = vadd.f32 %v863_v50, %v827_v52  ;;  %v903_v5 = vmul.f32 %v895_v58, %v895_v58  ;;  %v762_v7 = vadd.f32 %v761_v59, %v755_v33  ;;  %v3957_v54 = vld [vmem:[%s5220_s18 + $0x1e0] sm:$0xff] }
  0xc1   : > { %v4514_v6 = vpop.eup %4513  ;;  %v834_v60 = vsel %vm832_vm7, %v833_v62, %v831_v3  ;;  %vm853_vm13 = vcmp.eq.f32.partialorder %v5812_v61, 0.0  ;;  %v904_v9 = vmul.f32 %v896_v0, %v896_v0  ;;  %v838_v11 = vsel %vm837_vm8, %v5789_v49, %v836_v10  ;;  %v3948_v49 = vld [vmem:[%s5213_s20 + $0x1d8] sm:$0xff] }
  0xc2   : > { %v4516_v15 = vpop.eup %4515  ;;  %v843_v16 = vmul.f32 %v4512_v2, %v5804_v51  ;;  %v5911_v20 = vadd.f32 1e-06, %v902_v1  ;;  %4523 = vrsqrt.f32 %v5894_v32  ;;  %v854_v30 = vand.u32 2147483648, %v5812_v61 }
  0xc3   : > { %vm858_vm14 = vcmp.eq.f32.partialorder %v5815_v63, inf  ;;  %vm860_vm15 = vcmp.eq.f32.partialorder %v5815_v63, 0.0  ;;  %v905_v40 = vmul.f32 %v897_v8, %v897_v8  ;;  %v861_v29 = vand.u32 2147483648, %v5815_v63  ;;  %v3950_v8 = vld [vmem:[%s5213_s20 + $0x1e8] sm:$0xff] }
  0xc4   : > { %v865_v26 = vadd.f32 %v864_v55, %v834_v60  ;;  %v5920_v22 = vadd.f32 1e-06, %v903_v5  ;;  %v997_v24 = vsub.f32 %v3945_v12, %v3953_v13  ;;  %v5925_v35 = vadd.f32 %v762_v7, %v5858_v37  ;;  %v3956_v37 = vld [vmem:[%s5220_s18 + $0x1d8] sm:$0xff]  ;;  %v3951_v5 = vld [vmem:[%s5213_s20 + $0x1f0] sm:$0xff] }
  0xc5   : > { %v841_v31 = vsel %vm839_vm9, %v840_v4, %v838_v11  ;;  %v850_v42 = vmul.f32 %v4514_v6, %v5812_v61  ;;  %v5930_v14 = vadd.f32 1e-06, %v904_v9  ;;  %v845_v25 = vsel %vm844_vm10, %v5804_v51, %v843_v16  ;;  %v3958_v6 = vld [vmem:[%s5220_s18 + $0x1e8] sm:$0xff]  ;;  %v3959_v7 = vld [vmem:[%s5220_s18 + $0x1f0] sm:$0xff]  ;;  %v3960_v11 = vld [vmem:[%s5220_s18 + $0x1f8] sm:$0xff] }
  0xc6   : > { %v4518_v33 = vpop.eup %4517  ;;  %v857_v38 = vmul.f32 %v4516_v15, %v5815_v63  ;;  %4525 = vrsqrt.f32 %v5911_v20  ;;  %v998_v45 = vsub.f32 %v3946_v18, %v3954_v19  ;;  %v5937_v34 = vadd.f32 1e-06, %v905_v40  ;;  %v3952_v15 = vld [vmem:[%s5213_s20 + $0x1f8] sm:$0xff] }
  0xc7   : > { %vm916_vm0 = vcmp.eq.f32.partialorder %v5847_v21, inf  ;;  %vm918_vm1 = vcmp.eq.f32.partialorder %v5847_v21, 0.0  ;;  %v999_v36 = vsub.f32 %v3947_v23, %v3955_v28  ;;  %v866_v17 = vadd.f32 %v865_v26, %v841_v31 }
  0xc8   : > { %v4520_v39 = vpop.eup %4519  ;;  %4527 = vrsqrt.f32 %v5920_v22  ;;  %v1005_v27 = vmul.f32 %v997_v24, %v997_v24  ;;  %v1006_v41 = vmul.f32 %v998_v45, %v998_v45  ;;  %v848_v43 = vsel %vm846_vm11, %v847_v57, %v845_v25 }
  0xc9   : > { %v852_v44 = vsel %vm851_vm12, %v5812_v61, %v850_v42  ;;  %v915_v47 = vmul.f32 %v4518_v33, %v5847_v21  ;;  %v919_v48 = vand.u32 2147483648, %v5847_v21  ;;  %v859_v62 = vsel %vm858_vm14, %v5815_v63, %v857_v38 }
  0xca   : > { %v922_v50 = vmul.f32 %v4520_v39, %v5863_v46  ;;  %v1000_v58 = vsub.f32 %v3948_v49, %v3956_v37  ;;  %v5957_v51 = vadd.f32 1e-06, %v1005_v27  ;;  %vm923_vm2 = vcmp.eq.f32.partialorder %v5863_v46, inf }
  0xcb   : > { %v4522_v59 = vpop.eup %4521  ;;  %vm925_vm3 = vcmp.eq.f32.partialorder %v5863_v46, 0.0  ;;  %v1007_v52 = vmul.f32 %v999_v36, %v999_v36  ;;  %v5961_v0 = vadd.f32 1e-06, %v1006_v41  ;;  %v855_v1 = vsel %vm853_vm13, %v854_v30, %v852_v44  ;;  %v3969_v44 = vld [vmem:[%s5220_s18 + $0x200] sm:$0xff] }
  0xcc   : > { %v867_v2 = vadd.f32 %v866_v17, %v848_v43  ;;  %v926_v3 = vand.u32 2147483648, %v5863_v46  ;;  %4529 = vrsqrt.f32 %v5930_v14  ;;  %v862_v10 = vsel %vm860_vm15, %v861_v29, %v859_v62  ;;  %v3961_v43 = vld [vmem:[%s5213_s20 + $0x200] sm:$0xff] }
  0xcd   : > { %v917_v4 = vsel %vm916_vm0, %v5847_v21, %v915_v47  ;;  %4531 = vrsqrt.f32 %v5937_v34  ;;  %v1001_v57 = vsub.f32 %v3949_v53, %v3957_v54  ;;  %v924_v55 = vsel %vm923_vm2, %v5863_v46, %v922_v50  ;;  %v3962_v50 = vld [vmem:[%s5213_s20 + $0x208] sm:$0xff] }
  0xce   : > { %v929_v61 = vmul.f32 %v4522_v59, %v5880_v56  ;;  %v1008_v60 = vmul.f32 %v1000_v58, %v1000_v58  ;;  %4533 = vrsqrt.f32 %v5957_v51  ;;  %vm930_vm4 = vcmp.eq.f32.partialorder %v5880_v56, inf  ;;  %v3970_v53 = vld [vmem:[%s5220_s18 + $0x208] sm:$0xff] }
  0xcf   : > { %v4524_v63 = vpop.eup %4523  ;;  %vm932_vm5 = vcmp.eq.f32.partialorder %v5880_v56, 0.0  ;;  %v5982_v9 = vadd.f32 1e-06, %v1007_v52  ;;  %4535 = vrsqrt.f32 %v5961_v0  ;;  %v868_v12 = vadd.f32 %v867_v2, %v855_v1  ;;  %v3963_v2 = vld [vmem:[%s5213_s20 + $0x210] sm:$0xff] }
  0xd0   : > { %v933_v13 = vand.u32 2147483648, %v5880_v56  ;;  %vm937_vm6 = vcmp.eq.f32.partialorder %v5894_v32, inf  ;;  %vm939_vm7 = vcmp.eq.f32.partialorder %v5894_v32, 0.0  ;;  %v920_v16 = vsel %vm918_vm1, %v919_v48, %v917_v4 }
  0xd1   : > { %v927_v30 = vsel %vm925_vm3, %v926_v3, %v924_v55  ;;  %v1002_v40 = vsub.f32 %v3950_v8, %v3958_v6  ;;  %v1003_v18 = vsub.f32 %v3951_v5, %v3959_v7  ;;  %v931_v19 = vsel %vm930_vm4, %v5880_v56, %v929_v61  ;;  %v3971_v3 = vld [vmem:[%s5220_s18 + $0x210] sm:$0xff] }
  0xd2   : > { %v936_v29 = vmul.f32 %v4524_v63, %v5894_v32  ;;  %v1009_v26 = vmul.f32 %v1001_v57, %v1001_v57  ;;  %v5996_v23 = vadd.f32 1e-06, %v1008_v60  ;;  %v940_v24 = vand.u32 2147483648, %v5894_v32 }
  0xd3   : > { %v4526_v28 = vpop.eup %4525  ;;  %vm944_vm8 = vcmp.eq.f32.partialorder %v5911_v20, inf  ;;  %v1004_v31 = vsub.f32 %v3952_v15, %v3960_v11  ;;  %4537 = vrsqrt.f32 %v5982_v9  ;;  %vm946_vm9 = vcmp.eq.f32.partialorder %v5911_v20, 0.0 }
  0xd4   : > { %v947_v21 = vand.u32 2147483648, %v5911_v20  ;;  %vm951_vm10 = vcmp.eq.f32.partialorder %v5920_v22, inf  ;;  %v970_v46 = vadd.f32 %v927_v30, %v920_v16  ;;  %v6004_v33 = vadd.f32 %v868_v12, %v862_v10  ;;  %v3964_v12 = vld [vmem:[%s5213_s20 + $0x218] sm:$0xff] }
  0xd5   : > { %v4528_v42 = vpop.eup %4527  ;;  %v934_v25 = vsel %vm932_vm5, %v933_v13, %v931_v19  ;;  %v1010_v38 = vmul.f32 %v1002_v40, %v1002_v40  ;;  %v1011_v45 = vmul.f32 %v1003_v18, %v1003_v18  ;;  %v938_v49 = vsel %vm937_vm6, %v5894_v32, %v936_v29  ;;  %v3972_v13 = vld [vmem:[%s5220_s18 + $0x218] sm:$0xff] }
  0xd6   : > { %v943_v37 = vmul.f32 %v4526_v28, %v5911_v20  ;;  %v6012_v36 = vadd.f32 1e-06, %v1009_v26  ;;  %4539 = vrsqrt.f32 %v5996_v23  ;;  %vm953_vm11 = vcmp.eq.f32.partialorder %v5920_v22, 0.0 }
  0xd7   : > { %v954_v56 = vand.u32 2147483648, %v5920_v22  ;;  %vm958_vm12 = vcmp.eq.f32.partialorder %v5930_v14, inf  ;;  %v1012_v39 = vmul.f32 %v1004_v31, %v1004_v31  ;;  %v950_v17 = vmul.f32 %v4528_v42, %v5920_v22 }
  0xd8   : > { %vm960_vm13 = vcmp.eq.f32.partialorder %v5930_v14, 0.0  ;;  %v961_v27 = vand.u32 2147483648, %v5930_v14  ;;  %v971_v41 = vadd.f32 %v970_v46, %v934_v25  ;;  %v941_v48 = vsel %vm939_vm7, %v940_v24, %v938_v49  ;;  %v3973_v46 = vld [vmem:[%s5220_s18 + $0x220] sm:$0xff] }
  0xd9   : > { %v4530_v47 = vpop.eup %4529  ;;  %vm965_vm14 = vcmp.eq.f32.partialorder %v5937_v34, inf  ;;  %vm967_vm15 = vcmp.eq.f32.partialorder %v5937_v34, 0.0  ;;  %v6027_v62 = vadd.f32 1e-06, %v1010_v38  ;;  %v945_v58 = vsel %vm944_vm8, %v5911_v20, %v943_v37 }
  0xda   : > { %v4532_v54 = vpop.eup %4531  ;;  %v968_v59 = vand.u32 2147483648, %v5937_v34  ;;  %v6035_v52 = vadd.f32 1e-06, %v1011_v45  ;;  %4541 = vrsqrt.f32 %v6012_v36  ;;  %v6038_v1 = vadd.f32 1e-06, %v1012_v39 }
  0xdb   : > { %v4534_v32 = vpop.eup %4533  ;;  %vm1023_vm0 = vcmp.eq.f32.partialorder %v5957_v51, inf  ;;  %vm1025_vm1 = vcmp.eq.f32.partialorder %v5957_v51, 0.0  ;;  %v1104_v10 = vsub.f32 %v3961_v43, %v3969_v44  ;;  %v952_v8 = vsel %vm951_vm10, %v5920_v22, %v950_v17  ;;  %v3974_v17 = vld [vmem:[%s5220_s18 + $0x228] sm:$0xff]  ;;  %v3967_v43 = vld [vmem:[%s5213_s20 + $0x230] sm:$0xff] }
  0xdc   : > { %v4536_v4 = vpop.eup %4535  ;;  %v957_v57 = vmul.f32 %v4530_v47, %v5930_v14  ;;  %v972_v55 = vadd.f32 %v971_v41, %v941_v48  ;;  %v1105_v61 = vsub.f32 %v3962_v50, %v3970_v53  ;;  %v948_v5 = vsel %vm946_vm9, %v947_v21, %v945_v58  ;;  %v3965_v21 = vld [vmem:[%s5213_s20 + $0x220] sm:$0xff]  ;;  %v3975_v44 = vld [vmem:[%s5220_s18 + $0x230] sm:$0xff]  ;;  %v3968_v53 = vld [vmem:[%s5213_s20 + $0x238] sm:$0xff] }
  0xdd   : > { %v964_v6 = vmul.f32 %v4532_v54, %v5937_v34  ;;  %v1026_v7 = vand.u32 2147483648, %v5957_v51  ;;  %4543 = vrsqrt.f32 %v6027_v62  ;;  %v1022_v60 = vmul.f32 %v4534_v32, %v5957_v51  ;;  %v3976_v54 = vld [vmem:[%s5220_s18 + $0x238] sm:$0xff] }
  0xde   : > { %v1029_v63 = vmul.f32 %v4536_v4, %v5961_v0  ;;  %v1106_v15 = vsub.f32 %v3963_v2, %v3971_v3  ;;  %v1112_v11 = vmul.f32 %v1104_v10, %v1104_v10  ;;  %v955_v16 = vsel %vm953_vm11, %v954_v56, %v952_v8 }
  0xdf   : > { %vm1030_vm2 = vcmp.eq.f32.partialorder %v5961_v0, inf  ;;  %vm1032_vm3 = vcmp.eq.f32.partialorder %v5961_v0, 0.0  ;;  %v1113_v20 = vmul.f32 %v1105_v61, %v1105_v61  ;;  %v959_v40 = vsel %vm958_vm12, %v5930_v14, %v957_v57 }
  0xe0   : > { %v4538_v30 = vpop.eup %4537  ;;  %v973_v18 = vadd.f32 %v972_v55, %v948_v5  ;;  %v1033_v19 = vand.u32 2147483648, %v5961_v0  ;;  %4545 = vrsqrt.f32 %v6035_v52  ;;  %v966_v22 = vsel %vm965_vm14, %v5937_v34, %v964_v6 }
  0xe1   : > { %4547 = vrsqrt.f32 %v6038_v1  ;;  %v1107_v29 = vsub.f32 %v3964_v12, %v3972_v13  ;;  %v6070_v26 = vadd.f32 1e-06, %v1112_v11  ;;  %v1024_v28 = vsel %vm1023_vm0, %v5957_v51, %v1022_v60  ;;  %v3977_v13 = vld [vmem:[%s5213_s20 + $0x240] sm:$0xff] }
  0xe2   : > { %v1031_v24 = vsel %vm1030_vm2, %v5961_v0, %v1029_v63  ;;  %v1036_v31 = vmul.f32 %v4538_v30, %v5982_v9  ;;  %v1114_v42 = vmul.f32 %v1106_v15, %v1106_v15  ;;  %v6081_v38 = vadd.f32 %v6004_v33, %v5925_v35  ;;  %v3966_v33 = vld [vmem:[%s5213_s20 + $0x228] sm:$0xff]  ;;  %v3985_v15 = vld [vmem:[%s5220_s18 + $0x240] sm:$0xff] }
  0xe3   : > { %v4540_v25 = vpop.eup %4539  ;;  %v962_v45 = vsel %vm960_vm13, %v961_v27, %v959_v40  ;;  %vm1037_vm4 = vcmp.eq.f32.partialorder %v5982_v9, inf  ;;  %v6086_v49 = vadd.f32 1e-06, %v1113_v20  ;;  %v969_v37 = vsel %vm967_vm15, %v968_v59, %v966_v22 }
  0xe4   : > { %v974_v56 = vadd.f32 %v973_v18, %v955_v16  ;;  %vm1039_vm5 = vcmp.eq.f32.partialorder %v5982_v9, 0.0  ;;  %v1040_v39 = vand.u32 2147483648, %v5982_v9  ;;  %v1027_v35 = vsel %vm1025_vm1, %v1026_v7, %v1024_v28  ;;  %v3978_v18 = vld [vmem:[%s5213_s20 + $0x248] sm:$0xff] }
  0xe5   : > { %v1034_v14 = vsel %vm1032_vm3, %v1033_v19, %v1031_v24  ;;  %v1108_v27 = vsub.f32 %v3965_v21, %v3973_v46  ;;  %4549 = vrsqrt.f32 %v6070_v26  ;;  %v1038_v34 = vsel %vm1037_vm4, %v5982_v9, %v1036_v31  ;;  %v3986_v19 = vld [vmem:[%s5220_s18 + $0x248] sm:$0xff]  ;;  %v3979_v24 = vld [vmem:[%s5213_s20 + $0x250] sm:$0xff] }
  0xe6   : > { %v1043_v41 = vmul.f32 %v4540_v25, %v5996_v23  ;;  %v1115_v47 = vmul.f32 %v1107_v29, %v1107_v29  ;;  %v6103_v48 = vadd.f32 1e-06, %v1114_v42  ;;  %vm1044_vm6 = vcmp.eq.f32.partialorder %v5996_v23, inf  ;;  %v3987_v31 = vld [vmem:[%s5220_s18 + $0x250] sm:$0xff] }
  0xe7   : > { %v4542_v51 = vpop.eup %4541  ;;  %vm1046_vm7 = vcmp.eq.f32.partialorder %v5996_v23, 0.0  ;;  %v1047_v0 = vand.u32 2147483648, %v5996_v23  ;;  %4551 = vrsqrt.f32 %v6086_v49  ;;  %vm1051_vm8 = vcmp.eq.f32.partialorder %v6012_v36, inf }
  0xe8   : > { %vm1053_vm9 = vcmp.eq.f32.partialorder %v6012_v36, 0.0  ;;  %v1077_v50 = vadd.f32 %v1034_v14, %v1027_v35  ;;  %v1109_v58 = vsub.f32 %v3966_v33, %v3974_v17  ;;  %v975_v59 = vadd.f32 %v974_v56, %v962_v45 }
  0xe9   : > { %v1041_v32 = vsel %vm1039_vm5, %v1040_v39, %v1038_v34  ;;  %v1110_v2 = vsub.f32 %v3967_v43, %v3975_v44  ;;  %v1116_v3 = vmul.f32 %v1108_v27, %v1108_v27  ;;  %v1045_v4 = vsel %vm1044_vm6, %v5996_v23, %v1043_v41 }
  0xea   : > { %v4544_v10 = vpop.eup %4543  ;;  %v1050_v8 = vmul.f32 %v4542_v51, %v6012_v36  ;;  %v6117_v57 = vadd.f32 1e-06, %v1115_v47  ;;  %4553 = vrsqrt.f32 %v6103_v48  ;;  %v1054_v55 = vand.u32 2147483648, %v6012_v36 }
  0xeb   : > { %vm1058_vm10 = vcmp.eq.f32.partialorder %v6027_v62, inf  ;;  %vm1060_vm11 = vcmp.eq.f32.partialorder %v6027_v62, 0.0  ;;  %v1111_v9 = vsub.f32 %v3968_v53, %v3976_v54  ;;  %v1061_v61 = vand.u32 2147483648, %v6027_v62  ;;  %v3981_v53 = vld [vmem:[%s5213_s20 + $0x260] sm:$0xff] }
  0xec   : > { %vm1065_vm12 = vcmp.eq.f32.partialorder %v6035_v52, inf  ;;  %v1078_v5 = vadd.f32 %v1077_v50, %v1041_v32  ;;  %v1117_v6 = vmul.f32 %v1109_v58, %v1109_v58  ;;  %v976_v60 = vadd.f32 %v975_v59, %v969_v37  ;;  %v3989_v54 = vld [vmem:[%s5220_s18 + $0x260] sm:$0xff] }
  0xed   : > { %v4546_v7 = vpop.eup %4545  ;;  %v1048_v63 = vsel %vm1046_vm7, %v1047_v0, %v1045_v4  ;;  %vm1067_vm13 = vcmp.eq.f32.partialorder %v6035_v52, 0.0  ;;  %v1118_v12 = vmul.f32 %v1110_v2, %v1110_v2  ;;  %v1052_v16 = vsel %vm1051_vm8, %v6012_v36, %v1050_v8  ;;  %v3980_v36 = vld [vmem:[%s5213_s20 + $0x258] sm:$0xff] }
  0xee   : > { %v4548_v11 = vpop.eup %4547  ;;  %v1057_v20 = vmul.f32 %v4544_v10, %v6027_v62  ;;  %v6134_v30 = vadd.f32 1e-06, %v1116_v3  ;;  %4555 = vrsqrt.f32 %v6117_v57  ;;  %v1068_v23 = vand.u32 2147483648, %v6035_v52 }
  0xef   : > { %vm1072_vm14 = vcmp.eq.f32.partialorder %v6038_v1, inf  ;;  %vm1074_vm15 = vcmp.eq.f32.partialorder %v6038_v1, 0.0  ;;  %v1119_v40 = vmul.f32 %v1111_v9, %v1111_v9  ;;  %v1075_v22 = vand.u32 2147483648, %v6038_v1  ;;  %v3982_v9 = vld [vmem:[%s5213_s20 + $0x268] sm:$0xff] }
  0xf0   : > { %v1079_v29 = vadd.f32 %v1078_v5, %v1048_v63  ;;  %v6143_v28 = vadd.f32 1e-06, %v1117_v6  ;;  %v1211_v21 = vsub.f32 %v3977_v13, %v3985_v15  ;;  %v6148_v46 = vadd.f32 %v976_v60, %v6081_v38  ;;  %v3988_v38 = vld [vmem:[%s5220_s18 + $0x258] sm:$0xff]  ;;  %v3983_v6 = vld [vmem:[%s5213_s20 + $0x270] sm:$0xff] }
  0xf1   : > { %v1055_v42 = vsel %vm1053_vm9, %v1054_v55, %v1052_v16  ;;  %v1064_v25 = vmul.f32 %v4546_v7, %v6035_v52  ;;  %v6153_v45 = vadd.f32 1e-06, %v1118_v12  ;;  %v1059_v56 = vsel %vm1058_vm10, %v6027_v62, %v1057_v20  ;;  %v3990_v7 = vld [vmem:[%s5220_s18 + $0x268] sm:$0xff]  ;;  %v3991_v60 = vld [vmem:[%s5220_s18 + $0x270] sm:$0xff]  ;;  %v3992_v16 = vld [vmem:[%s5220_s18 + $0x278] sm:$0xff] }
  0xf2   : > { %v4550_v37 = vpop.eup %4549  ;;  %v1071_v39 = vmul.f32 %v4548_v11, %v6038_v1  ;;  %4557 = vrsqrt.f32 %v6134_v30  ;;  %v1212_v35 = vsub.f32 %v3978_v18, %v3986_v19  ;;  %v6160_v14 = vadd.f32 1e-06, %v1119_v40  ;;  %v3984_v11 = vld [vmem:[%s5213_s20 + $0x278] sm:$0xff] }
  0xf3   : > { %vm1130_vm0 = vcmp.eq.f32.partialorder %v6070_v26, inf  ;;  %vm1132_vm1 = vcmp.eq.f32.partialorder %v6070_v26, 0.0  ;;  %v1213_v33 = vsub.f32 %v3979_v24, %v3987_v31  ;;  %v1080_v27 = vadd.f32 %v1079_v29, %v1055_v42 }
  0xf4   : > { %v4552_v17 = vpop.eup %4551  ;;  %4559 = vrsqrt.f32 %v6143_v28  ;;  %v1219_v34 = vmul.f32 %v1211_v21, %v1211_v21  ;;  %v1220_v41 = vmul.f32 %v1212_v35, %v1212_v35  ;;  %v1062_v43 = vsel %vm1060_vm11, %v1061_v61, %v1059_v56 }
  0xf5   : > { %v1066_v44 = vsel %vm1065_vm12, %v6035_v52, %v1064_v25  ;;  %v1129_v47 = vmul.f32 %v4550_v37, %v6070_v26  ;;  %v1133_v51 = vand.u32 2147483648, %v6070_v26  ;;  %v1073_v0 = vsel %vm1072_vm14, %v6038_v1, %v1071_v39 }
  0xf6   : > { %v1136_v50 = vmul.f32 %v4552_v17, %v6086_v49  ;;  %v1214_v58 = vsub.f32 %v3980_v36, %v3988_v38  ;;  %v6180_v62 = vadd.f32 1e-06, %v1219_v34  ;;  %vm1137_vm2 = vcmp.eq.f32.partialorder %v6086_v49, inf }
  0xf7   : > { %v4554_v59 = vpop.eup %4553  ;;  %vm1139_vm3 = vcmp.eq.f32.partialorder %v6086_v49, 0.0  ;;  %v1221_v32 = vmul.f32 %v1213_v33, %v1213_v33  ;;  %v6184_v2 = vadd.f32 1e-06, %v1220_v41  ;;  %v1069_v3 = vsel %vm1067_vm13, %v1068_v23, %v1066_v44  ;;  %v4001_v44 = vld [vmem:[%s5220_s18 + $0x280] sm:$0xff] }
  0xf8   : > { %v1081_v10 = vadd.f32 %v1080_v27, %v1062_v43  ;;  %v1140_v4 = vand.u32 2147483648, %v6086_v49  ;;  %4561 = vrsqrt.f32 %v6153_v45  ;;  %v1076_v8 = vsel %vm1074_vm15, %v1075_v22, %v1073_v0  ;;  %v3993_v43 = vld [vmem:[%s5213_s20 + $0x280] sm:$0xff] }
  0xf9   : > { %v1131_v55 = vsel %vm1130_vm0, %v6070_v26, %v1129_v47  ;;  %4563 = vrsqrt.f32 %v6160_v14  ;;  %v1215_v61 = vsub.f32 %v3981_v53, %v3989_v54  ;;  %v1138_v5 = vsel %vm1137_vm2, %v6086_v49, %v1136_v50  ;;  %v3994_v50 = vld [vmem:[%s5213_s20 + $0x288] sm:$0xff] }
  0xfa   : > { %v1143_v52 = vmul.f32 %v4554_v59, %v6103_v48  ;;  %v1222_v63 = vmul.f32 %v1214_v58, %v1214_v58  ;;  %4565 = vrsqrt.f32 %v6180_v62  ;;  %vm1144_vm4 = vcmp.eq.f32.partialorder %v6103_v48, inf  ;;  %v4002_v53 = vld [vmem:[%s5220_s18 + $0x288] sm:$0xff] }
  0xfb   : > { %v4556_v1 = vpop.eup %4555  ;;  %vm1146_vm5 = vcmp.eq.f32.partialorder %v6103_v48, 0.0  ;;  %v6205_v12 = vadd.f32 1e-06, %v1221_v32  ;;  %4567 = vrsqrt.f32 %v6184_v2  ;;  %v1082_v13 = vadd.f32 %v1081_v10, %v1069_v3  ;;  %v3995_v10 = vld [vmem:[%s5213_s20 + $0x290] sm:$0xff] }
  0xfc   : > { %v1147_v15 = vand.u32 2147483648, %v6103_v48  ;;  %vm1151_vm6 = vcmp.eq.f32.partialorder %v6117_v57, inf  ;;  %vm1153_vm7 = vcmp.eq.f32.partialorder %v6117_v57, 0.0  ;;  %v1134_v20 = vsel %vm1132_vm1, %v1133_v51, %v1131_v55 }
  0xfd   : > { %v1141_v23 = vsel %vm1139_vm3, %v1140_v4, %v1138_v5  ;;  %v1216_v40 = vsub.f32 %v3982_v9, %v3990_v7  ;;  %v1217_v18 = vsub.f32 %v3983_v6, %v3991_v60  ;;  %v1145_v19 = vsel %vm1144_vm4, %v6103_v48, %v1143_v52  ;;  %v4003_v4 = vld [vmem:[%s5220_s18 + $0x290] sm:$0xff] }
  0xfe   : > { %v1150_v22 = vmul.f32 %v4556_v1, %v6117_v57  ;;  %v1223_v29 = vmul.f32 %v1215_v61, %v1215_v61  ;;  %v6219_v24 = vadd.f32 1e-06, %v1222_v63  ;;  %v1154_v21 = vand.u32 2147483648, %v6117_v57 }
  0xff   : > { %v4558_v31 = vpop.eup %4557  ;;  %vm1158_vm8 = vcmp.eq.f32.partialorder %v6134_v30, inf  ;;  %v1218_v42 = vsub.f32 %v3984_v11, %v3992_v16  ;;  %4569 = vrsqrt.f32 %v6205_v12  ;;  %vm1160_vm9 = vcmp.eq.f32.partialorder %v6134_v30, 0.0 }
 0x100   : > { %v1161_v26 = vand.u32 2147483648, %v6134_v30  ;;  %vm1165_vm10 = vcmp.eq.f32.partialorder %v6143_v28, inf  ;;  %v1184_v49 = vadd.f32 %v1141_v23, %v1134_v20  ;;  %v6227_v37 = vadd.f32 %v1082_v13, %v1076_v8  ;;  %v3996_v13 = vld [vmem:[%s5213_s20 + $0x298] sm:$0xff] }
 0x101   : > { %v4560_v25 = vpop.eup %4559  ;;  %v1148_v56 = vsel %vm1146_vm5, %v1147_v15, %v1145_v19  ;;  %v1224_v39 = vmul.f32 %v1216_v40, %v1216_v40  ;;  %v1225_v35 = vmul.f32 %v1217_v18, %v1217_v18  ;;  %v1152_v36 = vsel %vm1151_vm6, %v6117_v57, %v1150_v22  ;;  %v4004_v15 = vld [vmem:[%s5220_s18 + $0x298] sm:$0xff] }
 0x102   : > { %v1157_v38 = vmul.f32 %v4558_v31, %v6134_v30  ;;  %v6235_v33 = vadd.f32 1e-06, %v1223_v29  ;;  %4571 = vrsqrt.f32 %v6219_v24  ;;  %vm1167_vm11 = vcmp.eq.f32.partialorder %v6143_v28, 0.0 }
 0x103   : > { %v1168_v48 = vand.u32 2147483648, %v6143_v28  ;;  %vm1172_vm12 = vcmp.eq.f32.partialorder %v6153_v45, inf  ;;  %v1226_v17 = vmul.f32 %v1218_v42, %v1218_v42  ;;  %v1164_v27 = vmul.f32 %v4560_v25, %v6143_v28 }
 0x104   : > { %vm1174_vm13 = vcmp.eq.f32.partialorder %v6153_v45, 0.0  ;;  %v1175_v34 = vand.u32 2147483648, %v6153_v45  ;;  %v1185_v41 = vadd.f32 %v1184_v49, %v1148_v56  ;;  %v1155_v51 = vsel %vm1153_vm7, %v1154_v21, %v1152_v36  ;;  %v4005_v49 = vld [vmem:[%s5220_s18 + $0x2a0] sm:$0xff] }
 0x105   : > { %v4562_v47 = vpop.eup %4561  ;;  %vm1179_vm14 = vcmp.eq.f32.partialorder %v6160_v14, inf  ;;  %vm1181_vm15 = vcmp.eq.f32.partialorder %v6160_v14, 0.0  ;;  %v6250_v0 = vadd.f32 1e-06, %v1224_v39  ;;  %v1159_v58 = vsel %vm1158_vm8, %v6134_v30, %v1157_v38 }
 0x106   : > { %v4564_v54 = vpop.eup %4563  ;;  %v1182_v59 = vand.u32 2147483648, %v6160_v14  ;;  %v6258_v32 = vadd.f32 1e-06, %v1225_v35  ;;  %4573 = vrsqrt.f32 %v6235_v33  ;;  %v6261_v3 = vadd.f32 1e-06, %v1226_v17 }
 0x107   : > { %v4566_v57 = vpop.eup %4565  ;;  %vm1237_vm0 = vcmp.eq.f32.partialorder %v6180_v62, inf  ;;  %vm1239_vm1 = vcmp.eq.f32.partialorder %v6180_v62, 0.0  ;;  %v1318_v8 = vsub.f32 %v3993_v43, %v4001_v44  ;;  %v1166_v9 = vsel %vm1165_vm10, %v6143_v28, %v1164_v27  ;;  %v4006_v27 = vld [vmem:[%s5220_s18 + $0x2a8] sm:$0xff]  ;;  %v3999_v43 = vld [vmem:[%s5213_s20 + $0x2b0] sm:$0xff] }
 0x108   : > { %v4568_v55 = vpop.eup %4567  ;;  %v1171_v61 = vmul.f32 %v4562_v47, %v6153_v45  ;;  %v1186_v5 = vadd.f32 %v1185_v41, %v1155_v51  ;;  %v1319_v52 = vsub.f32 %v3994_v50, %v4002_v53  ;;  %v1162_v6 = vsel %vm1160_vm9, %v1161_v26, %v1159_v58  ;;  %v3997_v26 = vld [vmem:[%s5213_s20 + $0x2a0] sm:$0xff]  ;;  %v4007_v44 = vld [vmem:[%s5220_s18 + $0x2b0] sm:$0xff]  ;;  %v4000_v53 = vld [vmem:[%s5213_s20 + $0x2b8] sm:$0xff] }
 0x109   : > { %v1178_v7 = vmul.f32 %v4564_v54, %v6160_v14  ;;  %v1240_v60 = vand.u32 2147483648, %v6180_v62  ;;  %4575 = vrsqrt.f32 %v6250_v0  ;;  %v1236_v63 = vmul.f32 %v4566_v57, %v6180_v62  ;;  %v4008_v54 = vld [vmem:[%s5220_s18 + $0x2b8] sm:$0xff] }
 0x10a   : > { %v1243_v1 = vmul.f32 %v4568_v55, %v6184_v2  ;;  %v1320_v11 = vsub.f32 %v3995_v10, %v4003_v4  ;;  %v1326_v16 = vmul.f32 %v1318_v8, %v1318_v8  ;;  %v1169_v20 = vsel %vm1167_vm11, %v1168_v48, %v1166_v9 }
 0x10b   : > { %vm1244_vm2 = vcmp.eq.f32.partialorder %v6184_v2, inf  ;;  %vm1246_vm3 = vcmp.eq.f32.partialorder %v6184_v2, 0.0  ;;  %v1327_v30 = vmul.f32 %v1319_v52, %v1319_v52  ;;  %v1173_v40 = vsel %vm1172_vm12, %v6153_v45, %v1171_v61 }
 0x10c   : > { %v4570_v23 = vpop.eup %4569  ;;  %v1187_v18 = vadd.f32 %v1186_v5, %v1162_v6  ;;  %v1247_v19 = vand.u32 2147483648, %v6184_v2  ;;  %4577 = vrsqrt.f32 %v6258_v32  ;;  %v1180_v28 = vsel %vm1179_vm14, %v6160_v14, %v1178_v7 }
 0x10d   : > { %4579 = vrsqrt.f32 %v6261_v3  ;;  %v1321_v22 = vsub.f32 %v3996_v13, %v4004_v15  ;;  %v6293_v29 = vadd.f32 1e-06, %v1326_v16  ;;  %v1238_v31 = vsel %vm1237_vm0, %v6180_v62, %v1236_v63  ;;  %v4009_v15 = vld [vmem:[%s5213_s20 + $0x2c0] sm:$0xff] }
 0x10e   : > { %v1245_v21 = vsel %vm1244_vm2, %v6184_v2, %v1243_v1  ;;  %v1250_v42 = vmul.f32 %v4570_v23, %v6205_v12  ;;  %v1328_v25 = vmul.f32 %v1320_v11, %v1320_v11  ;;  %v6304_v39 = vadd.f32 %v6227_v37, %v6148_v46  ;;  %v3998_v37 = vld [vmem:[%s5213_s20 + $0x2a8] sm:$0xff]  ;;  %v4017_v11 = vld [vmem:[%s5220_s18 + $0x2c0] sm:$0xff] }
 0x10f   : > { %v4572_v56 = vpop.eup %4571  ;;  %v1176_v35 = vsel %vm1174_vm13, %v1175_v34, %v1173_v40  ;;  %vm1251_vm4 = vcmp.eq.f32.partialorder %v6205_v12, inf  ;;  %v6309_v36 = vadd.f32 1e-06, %v1327_v30  ;;  %v1183_v38 = vsel %vm1181_vm15, %v1182_v59, %v1180_v28 }
 0x110   : > { %v1188_v48 = vadd.f32 %v1187_v18, %v1169_v20  ;;  %vm1253_vm5 = vcmp.eq.f32.partialorder %v6205_v12, 0.0  ;;  %v1254_v17 = vand.u32 2147483648, %v6205_v12  ;;  %v1241_v46 = vsel %vm1239_vm1, %v1240_v60, %v1238_v31  ;;  %v4010_v18 = vld [vmem:[%s5213_s20 + $0x2c8] sm:$0xff] }
 0x111   : > { %v1248_v45 = vsel %vm1246_vm3, %v1247_v19, %v1245_v21  ;;  %v1322_v34 = vsub.f32 %v3997_v26, %v4005_v49  ;;  %4581 = vrsqrt.f32 %v6293_v29  ;;  %v1252_v14 = vsel %vm1251_vm4, %v6205_v12, %v1250_v42  ;;  %v4018_v19 = vld [vmem:[%s5220_s18 + $0x2c8] sm:$0xff]  ;;  %v4011_v21 = vld [vmem:[%s5213_s20 + $0x2d0] sm:$0xff] }
 0x112   : > { %v1257_v41 = vmul.f32 %v4572_v56, %v6219_v24  ;;  %v1329_v47 = vmul.f32 %v1321_v22, %v1321_v22  ;;  %v6326_v51 = vadd.f32 1e-06, %v1328_v25  ;;  %vm1258_vm6 = vcmp.eq.f32.partialorder %v6219_v24, inf  ;;  %v4019_v42 = vld [vmem:[%s5220_s18 + $0x2d0] sm:$0xff] }
 0x113   : > { %v4574_v62 = vpop.eup %4573  ;;  %vm1260_vm7 = vcmp.eq.f32.partialorder %v6219_v24, 0.0  ;;  %v1261_v2 = vand.u32 2147483648, %v6219_v24  ;;  %4583 = vrsqrt.f32 %v6309_v36  ;;  %vm1265_vm8 = vcmp.eq.f32.partialorder %v6235_v33, inf }
 0x114   : > { %vm1267_vm9 = vcmp.eq.f32.partialorder %v6235_v33, 0.0  ;;  %v1291_v50 = vadd.f32 %v1248_v45, %v1241_v46  ;;  %v1323_v58 = vsub.f32 %v3998_v37, %v4006_v27  ;;  %v1189_v59 = vadd.f32 %v1188_v48, %v1176_v35 }
 0x115   : > { %v1255_v57 = vsel %vm1253_vm5, %v1254_v17, %v1252_v14  ;;  %v1324_v10 = vsub.f32 %v3999_v43, %v4007_v44  ;;  %v1330_v4 = vmul.f32 %v1322_v34, %v1322_v34  ;;  %v1259_v55 = vsel %vm1258_vm6, %v6219_v24, %v1257_v41 }
 0x116   : > { %v4576_v8 = vpop.eup %4575  ;;  %v1264_v9 = vmul.f32 %v4574_v62, %v6235_v33  ;;  %v6340_v61 = vadd.f32 1e-06, %v1329_v47  ;;  %4585 = vrsqrt.f32 %v6326_v51  ;;  %v1268_v5 = vand.u32 2147483648, %v6235_v33 }
 0x117   : > { %vm1272_vm10 = vcmp.eq.f32.partialorder %v6250_v0, inf  ;;  %vm1274_vm11 = vcmp.eq.f32.partialorder %v6250_v0, 0.0  ;;  %v1325_v12 = vsub.f32 %v4000_v53, %v4008_v54  ;;  %v1275_v52 = vand.u32 2147483648, %v6250_v0  ;;  %v4013_v53 = vld [vmem:[%s5213_s20 + $0x2e0] sm:$0xff] }
 0x118   : > { %vm1279_vm12 = vcmp.eq.f32.partialorder %v6258_v32, inf  ;;  %v1292_v6 = vadd.f32 %v1291_v50, %v1255_v57  ;;  %v1331_v7 = vmul.f32 %v1323_v58, %v1323_v58  ;;  %v1190_v63 = vadd.f32 %v1189_v59, %v1183_v38  ;;  %v4021_v54 = vld [vmem:[%s5220_s18 + $0x2e0] sm:$0xff] }
 0x119   : > { %v4578_v60 = vpop.eup %4577  ;;  %v1262_v1 = vsel %vm1260_vm7, %v1261_v2, %v1259_v55  ;;  %vm1281_vm13 = vcmp.eq.f32.partialorder %v6258_v32, 0.0  ;;  %v1332_v13 = vmul.f32 %v1324_v10, %v1324_v10  ;;  %v1266_v20 = vsel %vm1265_vm8, %v6235_v33, %v1264_v9  ;;  %v4012_v33 = vld [vmem:[%s5213_s20 + $0x2d8] sm:$0xff] }
 0x11a   : > { %v4580_v16 = vpop.eup %4579  ;;  %v1271_v30 = vmul.f32 %v4576_v8, %v6250_v0  ;;  %v6357_v23 = vadd.f32 1e-06, %v1330_v4  ;;  %4587 = vrsqrt.f32 %v6340_v61  ;;  %v1282_v24 = vand.u32 2147483648, %v6258_v32 }
 0x11b   : > { %vm1286_vm14 = vcmp.eq.f32.partialorder %v6261_v3, inf  ;;  %vm1288_vm15 = vcmp.eq.f32.partialorder %v6261_v3, 0.0  ;;  %v1333_v40 = vmul.f32 %v1325_v12, %v1325_v12  ;;  %v1289_v28 = vand.u32 2147483648, %v6261_v3  ;;  %v4014_v12 = vld [vmem:[%s5213_s20 + $0x2e8] sm:$0xff] }
 0x11c   : > { %v1293_v22 = vadd.f32 %v1292_v6, %v1262_v1  ;;  %v6366_v31 = vadd.f32 1e-06, %v1331_v7  ;;  %v1425_v26 = vsub.f32 %v4009_v15, %v4017_v11  ;;  %v6371_v49 = vadd.f32 %v1190_v63, %v6304_v39  ;;  %v4020_v39 = vld [vmem:[%s5220_s18 + $0x2d8] sm:$0xff]  ;;  %v4015_v7 = vld [vmem:[%s5213_s20 + $0x2f0] sm:$0xff] }
 0x11d   : > { %v1269_v25 = vsel %vm1267_vm9, %v1268_v5, %v1266_v20  ;;  %v1278_v56 = vmul.f32 %v4578_v60, %v6258_v32  ;;  %v6376_v35 = vadd.f32 1e-06, %v1332_v13  ;;  %v1273_v48 = vsel %vm1272_vm10, %v6250_v0, %v1271_v30  ;;  %v4022_v60 = vld [vmem:[%s5220_s18 + $0x2e8] sm:$0xff]  ;;  %v4023_v63 = vld [vmem:[%s5220_s18 + $0x2f0] sm:$0xff]  ;;  %v4024_v20 = vld [vmem:[%s5220_s18 + $0x2f8] sm:$0xff] }
 0x11e   : > { %v4582_v38 = vpop.eup %4581  ;;  %v1285_v17 = vmul.f32 %v4580_v16, %v6261_v3  ;;  %4589 = vrsqrt.f32 %v6357_v23  ;;  %v1426_v46 = vsub.f32 %v4010_v18, %v4018_v19  ;;  %v6383_v45 = vadd.f32 1e-06, %v1333_v40  ;;  %v4016_v16 = vld [vmem:[%s5213_s20 + $0x2f8] sm:$0xff] }
 0x11f   : > { %vm1344_vm0 = vcmp.eq.f32.partialorder %v6293_v29, inf  ;;  %vm1346_vm1 = vcmp.eq.f32.partialorder %v6293_v29, 0.0  ;;  %v1427_v37 = vsub.f32 %v4011_v21, %v4019_v42  ;;  %v1294_v34 = vadd.f32 %v1293_v22, %v1269_v25 }
 0x120   : > { %v4584_v27 = vpop.eup %4583  ;;  %4591 = vrsqrt.f32 %v6366_v31  ;;  %v1433_v14 = vmul.f32 %v1425_v26, %v1425_v26  ;;  %v1434_v41 = vmul.f32 %v1426_v46, %v1426_v46  ;;  %v1276_v43 = vsel %vm1274_vm11, %v1275_v52, %v1273_v48 }
 0x121   : > { %v1280_v44 = vsel %vm1279_vm12, %v6258_v32, %v1278_v56  ;;  %v1343_v47 = vmul.f32 %v4582_v38, %v6293_v29  ;;  %v1347_v62 = vand.u32 2147483648, %v6293_v29  ;;  %v1287_v2 = vsel %vm1286_vm14, %v6261_v3, %v1285_v17 }
 0x122   : > { %v1350_v50 = vmul.f32 %v4584_v27, %v6309_v36  ;;  %v1428_v58 = vsub.f32 %v4012_v33, %v4020_v39  ;;  %v6403_v0 = vadd.f32 1e-06, %v1433_v14  ;;  %vm1351_vm2 = vcmp.eq.f32.partialorder %v6309_v36, inf }
 0x123   : > { %v4586_v59 = vpop.eup %4585  ;;  %4593 = vrsqrt.f32 %v6376_v35  ;;  %v1435_v57 = vmul.f32 %v1427_v37, %v1427_v37  ;;  %v6407_v10 = vadd.f32 1e-06, %v1434_v41  ;;  %v1283_v4 = vsel %vm1281_vm13, %v1282_v24, %v1280_v44 }
 0x124   : > { %v1295_v8 = vadd.f32 %v1294_v34, %v1276_v43  ;;  %vm1353_vm3 = vcmp.eq.f32.partialorder %v6309_v36, 0.0  ;;  %4595 = vrsqrt.f32 %v6383_v45  ;;  %v1290_v55 = vsel %vm1288_vm15, %v1289_v28, %v1287_v2 }
 0x125   : > { %v1345_v9 = vsel %vm1344_vm0, %v6293_v29, %v1343_v47  ;;  %v1354_v5 = vand.u32 2147483648, %v6309_v36  ;;  %v1429_v52 = vsub.f32 %v4013_v53, %v4021_v54  ;;  %v1352_v6 = vsel %vm1351_vm2, %v6309_v36, %v1350_v50  ;;  %v4025_v47 = vld [vmem:[%s5213_s20 + $0x300] sm:$0xff]  ;;  %v4026_v53 = vld [vmem:[%s5213_s20 + $0x308] sm:$0xff] }
 0x126   : > { %v1357_v32 = vmul.f32 %v4586_v59, %v6326_v51  ;;  %v1436_v1 = vmul.f32 %v1428_v58, %v1428_v58  ;;  %4597 = vrsqrt.f32 %v6403_v0  ;;  %vm1358_vm4 = vcmp.eq.f32.partialorder %v6326_v51, inf  ;;  %v4034_v54 = vld [vmem:[%s5220_s18 + $0x308] sm:$0xff] }
 0x127   : > { %v4588_v3 = vpop.eup %4587  ;;  %vm1360_vm5 = vcmp.eq.f32.partialorder %v6326_v51, 0.0  ;;  %v6428_v13 = vadd.f32 1e-06, %v1435_v57  ;;  %4599 = vrsqrt.f32 %v6407_v10  ;;  %v1296_v15 = vadd.f32 %v1295_v8, %v1283_v4 }
 0x128   : > { %v1361_v11 = vand.u32 2147483648, %v6326_v51  ;;  %vm1365_vm6 = vcmp.eq.f32.partialorder %v6340_v61, inf  ;;  %vm1367_vm7 = vcmp.eq.f32.partialorder %v6340_v61, 0.0  ;;  %v1348_v30 = vsel %vm1346_vm1, %v1347_v62, %v1345_v9  ;;  %v4033_v62 = vld [vmem:[%s5220_s18 + $0x300] sm:$0xff]  ;;  %v4035_v9 = vld [vmem:[%s5220_s18 + $0x310] sm:$0xff] }
 0x129   : > { %v1355_v24 = vsel %vm1353_vm3, %v1354_v5, %v1352_v6  ;;  %v1430_v40 = vsub.f32 %v4014_v12, %v4022_v60  ;;  %v1431_v18 = vsub.f32 %v4015_v7, %v4023_v63  ;;  %v1359_v19 = vsel %vm1358_vm4, %v6326_v51, %v1357_v32 }
 0x12a   : > { %v1364_v28 = vmul.f32 %v4588_v3, %v6340_v61  ;;  %v1437_v22 = vmul.f32 %v1429_v52, %v1429_v52  ;;  %v6442_v21 = vadd.f32 1e-06, %v1436_v1  ;;  %v1368_v26 = vand.u32 2147483648, %v6340_v61 }
 0x12b   : > { %v4590_v42 = vpop.eup %4589  ;;  %vm1372_vm8 = vcmp.eq.f32.partialorder %v6357_v23, inf  ;;  %v1432_v25 = vsub.f32 %v4016_v16, %v4024_v20  ;;  %4601 = vrsqrt.f32 %v6428_v13  ;;  %v1297_v29 = vadd.f32 %v1296_v15, %v1290_v55  ;;  %v4027_v55 = vld [vmem:[%s5213_s20 + $0x310] sm:$0xff]  ;;  %v4028_v15 = vld [vmem:[%s5213_s20 + $0x318] sm:$0xff] }
 0x12c   : > { %vm1374_vm9 = vcmp.eq.f32.partialorder %v6357_v23, 0.0  ;;  %v1375_v36 = vand.u32 2147483648, %v6357_v23  ;;  %v1398_v56 = vadd.f32 %v1355_v24, %v1348_v30  ;;  %v1362_v48 = vsel %vm1360_vm5, %v1361_v11, %v1359_v19  ;;  %v4036_v11 = vld [vmem:[%s5220_s18 + $0x318] sm:$0xff] }
 0x12d   : > { %v4592_v38 = vpop.eup %4591  ;;  %vm1379_vm10 = vcmp.eq.f32.partialorder %v6366_v31, inf  ;;  %v1438_v17 = vmul.f32 %v1430_v40, %v1430_v40  ;;  %v1439_v46 = vmul.f32 %v1431_v18, %v1431_v18  ;;  %v1366_v33 = vsel %vm1365_vm6, %v6340_v61, %v1364_v28 }
 0x12e   : > { %v1371_v39 = vmul.f32 %v4590_v42, %v6357_v23  ;;  %v6456_v37 = vadd.f32 1e-06, %v1437_v22  ;;  %4603 = vrsqrt.f32 %v6442_v21  ;;  %vm1381_vm11 = vcmp.eq.f32.partialorder %v6366_v31, 0.0 }
 0x12f   : > { %v1382_v51 = vand.u32 2147483648, %v6366_v31  ;;  %vm1386_vm12 = vcmp.eq.f32.partialorder %v6376_v35, inf  ;;  %v1440_v27 = vmul.f32 %v1432_v25, %v1432_v25  ;;  %v6463_v14 = vadd.f32 %v1297_v29, %v6371_v49  ;;  %v4029_v29 = vld [vmem:[%s5213_s20 + $0x320] sm:$0xff] }
 0x130   : > { %v4594_v34 = vpop.eup %4593  ;;  %v1378_v41 = vmul.f32 %v4592_v38, %v6366_v31  ;;  %vm1388_vm13 = vcmp.eq.f32.partialorder %v6376_v35, 0.0  ;;  %v1389_v43 = vand.u32 2147483648, %v6376_v35  ;;  %v1399_v44 = vadd.f32 %v1398_v56, %v1362_v48 }
 0x131   : > { %v4596_v2 = vpop.eup %4595  ;;  %v1369_v50 = vsel %vm1367_vm7, %v1368_v26, %v1366_v33  ;;  %vm1393_vm14 = vcmp.eq.f32.partialorder %v6383_v45, inf  ;;  %vm1395_vm15 = vcmp.eq.f32.partialorder %v6383_v45, 0.0  ;;  %v6474_v49 = vadd.f32 1e-06, %v1438_v17 }
 0x132   : > { %v1373_v58 = vsel %vm1372_vm8, %v6357_v23, %v1371_v39  ;;  %v1396_v59 = vand.u32 2147483648, %v6383_v45  ;;  %v6482_v57 = vadd.f32 1e-06, %v1439_v46  ;;  %4605 = vrsqrt.f32 %v6456_v37 }
 0x133   : > { %v4598_v61 = vpop.eup %4597  ;;  %v1385_v4 = vmul.f32 %v4594_v34, %v6376_v35  ;;  %v6486_v8 = vadd.f32 1e-06, %v1440_v27  ;;  %vm1451_vm0 = vcmp.eq.f32.partialorder %v6403_v0, inf  ;;  %v1532_v5 = vsub.f32 %v4025_v47, %v4033_v62  ;;  %v4031_v27 = vld [vmem:[%s5213_s20 + $0x330] sm:$0xff]  ;;  %v4038_v34 = vld [vmem:[%s5220_s18 + $0x328] sm:$0xff]  ;;  %v4032_v47 = vld [vmem:[%s5213_s20 + $0x338] sm:$0xff] }
 0x134   : > { %v4600_v12 = vpop.eup %4599  ;;  %v1380_v52 = vsel %vm1379_vm10, %v6366_v31, %v1378_v41  ;;  %v1392_v6 = vmul.f32 %v4596_v2, %v6383_v45  ;;  %v1400_v32 = vadd.f32 %v1399_v44, %v1369_v50  ;;  %v1533_v7 = vsub.f32 %v4026_v53, %v4034_v54  ;;  %v4039_v62 = vld [vmem:[%s5220_s18 + $0x330] sm:$0xff]  ;;  %v4040_v2 = vld [vmem:[%s5220_s18 + $0x338] sm:$0xff] }
 0x135   : > { %v1376_v60 = vsel %vm1374_vm9, %v1375_v36, %v1373_v58  ;;  %vm1453_vm1 = vcmp.eq.f32.partialorder %v6403_v0, 0.0  ;;  %v1454_v63 = vand.u32 2147483648, %v6403_v0  ;;  %4607 = vrsqrt.f32 %v6474_v49  ;;  %v4037_v36 = vld [vmem:[%s5220_s18 + $0x320] sm:$0xff] }
 0x136   : > { %v1450_v1 = vmul.f32 %v4598_v61, %v6403_v0  ;;  %v1457_v3 = vmul.f32 %v4600_v12, %v6407_v10  ;;  %v1534_v16 = vsub.f32 %v4027_v55, %v4035_v9  ;;  %v1540_v20 = vmul.f32 %v1532_v5, %v1532_v5 }
 0x137   : > { %v1383_v30 = vsel %vm1381_vm11, %v1382_v51, %v1380_v52  ;;  %vm1458_vm2 = vcmp.eq.f32.partialorder %v6407_v10, inf  ;;  %vm1460_vm3 = vcmp.eq.f32.partialorder %v6407_v10, 0.0  ;;  %v1541_v23 = vmul.f32 %v1533_v7, %v1533_v7  ;;  %v4030_v51 = vld [vmem:[%s5213_s20 + $0x328] sm:$0xff] }
 0x138   : > { %v4602_v24 = vpop.eup %4601  ;;  %v1387_v40 = vsel %vm1386_vm12, %v6376_v35, %v1385_v4  ;;  %v1394_v18 = vsel %vm1393_vm14, %v6383_v45, %v1392_v6  ;;  %v1401_v19 = vadd.f32 %v1400_v32, %v1376_v60  ;;  %4609 = vrsqrt.f32 %v6482_v57 }
 0x139   : > { %v1461_v31 = vand.u32 2147483648, %v6407_v10  ;;  %4611 = vrsqrt.f32 %v6486_v8  ;;  %v1535_v28 = vsub.f32 %v4028_v15, %v4036_v11  ;;  %v6517_v22 = vadd.f32 1e-06, %v1540_v20  ;;  %v4049_v20 = vld [vmem:[%s5220_s18 + $0x340] sm:$0xff] }
 0x13a   : > { %v1452_v42 = vsel %vm1451_vm0, %v6403_v0, %v1450_v1  ;;  %v1459_v26 = vsel %vm1458_vm2, %v6407_v10, %v1457_v3  ;;  %v1464_v25 = vmul.f32 %v4602_v24, %v6428_v13  ;;  %v1542_v56 = vmul.f32 %v1534_v16, %v1534_v16  ;;  %v4041_v16 = vld [vmem:[%s5213_s20 + $0x340] sm:$0xff] }
 0x13b   : > { %v4604_v38 = vpop.eup %4603  ;;  %v1390_v48 = vsel %vm1388_vm13, %v1389_v43, %v1387_v40  ;;  %v1397_v17 = vsel %vm1395_vm15, %v1396_v59, %v1394_v18  ;;  %vm1465_vm4 = vcmp.eq.f32.partialorder %v6428_v13, inf  ;;  %v6531_v46 = vadd.f32 1e-06, %v1541_v23 }
 0x13c   : > { %v1402_v33 = vadd.f32 %v1401_v19, %v1383_v30  ;;  %vm1467_vm5 = vcmp.eq.f32.partialorder %v6428_v13, 0.0  ;;  %v1468_v39 = vand.u32 2147483648, %v6428_v13  ;;  %vm1472_vm6 = vcmp.eq.f32.partialorder %v6442_v21, inf  ;;  %v4042_v19 = vld [vmem:[%s5213_s20 + $0x348] sm:$0xff] }
 0x13d   : > { %v1455_v35 = vsel %vm1453_vm1, %v1454_v63, %v1452_v42  ;;  %v1462_v45 = vsel %vm1460_vm3, %v1461_v31, %v1459_v26  ;;  %v1536_v41 = vsub.f32 %v4029_v29, %v4037_v36  ;;  %4613 = vrsqrt.f32 %v6517_v22  ;;  %v4050_v31 = vld [vmem:[%s5220_s18 + $0x348] sm:$0xff]  ;;  %v4051_v29 = vld [vmem:[%s5220_s18 + $0x350] sm:$0xff] }
 0x13e   : > { %v1466_v43 = vsel %vm1465_vm4, %v6428_v13, %v1464_v25  ;;  %v1471_v44 = vmul.f32 %v4604_v38, %v6442_v21  ;;  %v1543_v50 = vmul.f32 %v1535_v28, %v1535_v28  ;;  %v6549_v53 = vadd.f32 1e-06, %v1542_v56  ;;  %v4043_v25 = vld [vmem:[%s5213_s20 + $0x350] sm:$0xff] }
 0x13f   : > { %v4606_v0 = vpop.eup %4605  ;;  %vm1474_vm7 = vcmp.eq.f32.partialorder %v6442_v21, 0.0  ;;  %v1475_v10 = vand.u32 2147483648, %v6442_v21  ;;  %vm1479_vm8 = vcmp.eq.f32.partialorder %v6456_v37, inf  ;;  %4615 = vrsqrt.f32 %v6531_v46 }
 0x140   : > { %v1403_v54 = vadd.f32 %v1402_v33, %v1390_v48  ;;  %vm1481_vm9 = vcmp.eq.f32.partialorder %v6456_v37, 0.0  ;;  %v1505_v58 = vadd.f32 %v1462_v45, %v1455_v35  ;;  %v1537_v59 = vsub.f32 %v4030_v51, %v4038_v34  ;;  %v4044_v45 = vld [vmem:[%s5213_s20 + $0x358] sm:$0xff] }
 0x141   : > { %v1469_v61 = vsel %vm1467_vm5, %v1468_v39, %v1466_v43  ;;  %v1538_v4 = vsub.f32 %v4031_v27, %v4039_v62  ;;  %v1539_v55 = vsub.f32 %v4032_v47, %v4040_v2  ;;  %v1544_v9 = vmul.f32 %v1536_v41, %v1536_v41  ;;  %v4052_v51 = vld [vmem:[%s5220_s18 + $0x358] sm:$0xff] }
 0x142   : > { %v4608_v5 = vpop.eup %4607  ;;  %v1473_v12 = vsel %vm1472_vm6, %v6442_v21, %v1471_v44  ;;  %v1478_v52 = vmul.f32 %v4606_v0, %v6456_v37  ;;  %v6562_v6 = vadd.f32 1e-06, %v1543_v50  ;;  %4617 = vrsqrt.f32 %v6549_v53 }
 0x143   : > { %v1482_v32 = vand.u32 2147483648, %v6456_v37  ;;  %vm1486_vm10 = vcmp.eq.f32.partialorder %v6474_v49, inf  ;;  %vm1488_vm11 = vcmp.eq.f32.partialorder %v6474_v49, 0.0  ;;  %v1489_v13 = vand.u32 2147483648, %v6474_v49 }
 0x144   : > { %v1404_v7 = vadd.f32 %v1403_v54, %v1397_v17  ;;  %vm1493_vm12 = vcmp.eq.f32.partialorder %v6482_v57, inf  ;;  %v1506_v60 = vadd.f32 %v1505_v58, %v1469_v61  ;;  %v1545_v63 = vmul.f32 %v1537_v59, %v1537_v59  ;;  %v4053_v54 = vld [vmem:[%s5220_s18 + $0x360] sm:$0xff] }
 0x145   : > { %v4610_v1 = vpop.eup %4609  ;;  %v1476_v3 = vsel %vm1474_vm7, %v1475_v10, %v1473_v12  ;;  %vm1495_vm13 = vcmp.eq.f32.partialorder %v6482_v57, 0.0  ;;  %v1546_v15 = vmul.f32 %v1538_v4, %v1538_v4  ;;  %v1547_v11 = vmul.f32 %v1539_v55, %v1539_v55  ;;  %v4045_v10 = vld [vmem:[%s5213_s20 + $0x360] sm:$0xff] }
 0x146   : > { %v4612_v30 = vpop.eup %4611  ;;  %v1480_v23 = vsel %vm1479_vm8, %v6456_v37, %v1478_v52  ;;  %v1485_v24 = vmul.f32 %v4608_v5, %v6474_v49  ;;  %v6579_v40 = vadd.f32 1e-06, %v1544_v9  ;;  %4619 = vrsqrt.f32 %v6562_v6 }
 0x147   : > { %v1496_v21 = vand.u32 2147483648, %v6482_v57  ;;  %vm1500_vm14 = vcmp.eq.f32.partialorder %v6486_v8, inf  ;;  %vm1502_vm15 = vcmp.eq.f32.partialorder %v6486_v8, 0.0  ;;  %v1503_v18 = vand.u32 2147483648, %v6486_v8 }
 0x148   : > { %v6589_v28 = vadd.f32 %v1404_v7, %v6463_v14  ;;  %v1507_v42 = vadd.f32 %v1506_v60, %v1476_v3  ;;  %v6591_v26 = vadd.f32 1e-06, %v1545_v63  ;;  %v1639_v36 = vsub.f32 %v4041_v16, %v4049_v20  ;;  %v4047_v60 = vld [vmem:[%s5213_s20 + $0x370] sm:$0xff]  ;;  %v4054_v63 = vld [vmem:[%s5220_s18 + $0x368] sm:$0xff] }
 0x149   : > { %v1483_v56 = vsel %vm1481_vm9, %v1482_v32, %v1480_v23  ;;  %v1492_v38 = vmul.f32 %v4610_v1, %v6482_v57  ;;  %v6598_v48 = vadd.f32 1e-06, %v1546_v15  ;;  %v6600_v17 = vadd.f32 1e-06, %v1547_v11  ;;  %v4046_v32 = vld [vmem:[%s5213_s20 + $0x368] sm:$0xff]  ;;  %v4055_v1 = vld [vmem:[%s5220_s18 + $0x370] sm:$0xff] }
 0x14a   : > { %v4614_v33 = vpop.eup %4613  ;;  %v1487_v14 = vsel %vm1486_vm10, %v6474_v49, %v1485_v24  ;;  %v1499_v39 = vmul.f32 %v4612_v30, %v6486_v8  ;;  %4621 = vrsqrt.f32 %v6579_v40  ;;  %v1640_v35 = vsub.f32 %v4042_v19, %v4050_v31  ;;  %v4048_v30 = vld [vmem:[%s5213_s20 + $0x378] sm:$0xff] }
 0x14b   : > { %vm1558_vm0 = vcmp.eq.f32.partialorder %v6517_v22, inf  ;;  %vm1560_vm1 = vcmp.eq.f32.partialorder %v6517_v22, 0.0  ;;  %v1561_v37 = vand.u32 2147483648, %v6517_v22  ;;  %v1641_v27 = vsub.f32 %v4043_v25, %v4051_v29  ;;  %v4056_v23 = vld [vmem:[%s5220_s18 + $0x378] sm:$0xff] }
 0x14c   : > { %v4616_v34 = vpop.eup %4615  ;;  %v1508_v41 = vadd.f32 %v1507_v42, %v1483_v56  ;;  %4623 = vrsqrt.f32 %v6591_v26  ;;  %v1647_v43 = vmul.f32 %v1639_v36, %v1639_v36  ;;  %v1648_v44 = vmul.f32 %v1640_v35, %v1640_v35 }
 0x14d   : > { %v1490_v47 = vsel %vm1488_vm11, %v1489_v13, %v1487_v14  ;;  %v1494_v62 = vsel %vm1493_vm12, %v6482_v57, %v1492_v38  ;;  %v1557_v2 = vmul.f32 %v4614_v33, %v6517_v22  ;;  %4625 = vrsqrt.f32 %v6598_v48 }
 0x14e   : > { %v1501_v50 = vsel %vm1500_vm14, %v6486_v8, %v1499_v39  ;;  %v1564_v0 = vmul.f32 %v4616_v34, %v6531_v46  ;;  %v1642_v58 = vsub.f32 %v4044_v45, %v4052_v51  ;;  %v6626_v49 = vadd.f32 1e-06, %v1647_v43 }
 0x14f   : > { %v4618_v59 = vpop.eup %4617  ;;  %vm1565_vm2 = vcmp.eq.f32.partialorder %v6531_v46, inf  ;;  %vm1567_vm3 = vcmp.eq.f32.partialorder %v6531_v46, 0.0  ;;  %v1649_v61 = vmul.f32 %v1641_v27, %v1641_v27  ;;  %v6630_v4 = vadd.f32 1e-06, %v1648_v44 }
 0x150   : > { %v1497_v55 = vsel %vm1495_vm13, %v1496_v21, %v1494_v62  ;;  %v1509_v9 = vadd.f32 %v1508_v41, %v1490_v47  ;;  %v1568_v5 = vand.u32 2147483648, %v6531_v46  ;;  %4627 = vrsqrt.f32 %v6600_v17  ;;  %v4057_v47 = vld [vmem:[%s5213_s20 + $0x380] sm:$0xff] }
 0x151   : > { %v1504_v12 = vsel %vm1502_vm15, %v1503_v18, %v1501_v50  ;;  %v1559_v52 = vsel %vm1558_vm0, %v6517_v22, %v1557_v2  ;;  %vm1572_vm4 = vcmp.eq.f32.partialorder %v6549_v53, inf  ;;  %v1643_v13 = vsub.f32 %v4045_v10, %v4053_v54  ;;  %v4065_v62 = vld [vmem:[%s5220_s18 + $0x380] sm:$0xff] }
 0x152   : > { %v1566_v7 = vsel %vm1565_vm2, %v6531_v46, %v1564_v0  ;;  %v1571_v57 = vmul.f32 %v4618_v59, %v6549_v53  ;;  %v1650_v3 = vmul.f32 %v1642_v58, %v1642_v58  ;;  %4629 = vrsqrt.f32 %v6626_v49  ;;  %v4066_v58 = vld [vmem:[%s5220_s18 + $0x388] sm:$0xff] }
 0x153   : > { %v4620_v8 = vpop.eup %4619  ;;  %vm1574_vm5 = vcmp.eq.f32.partialorder %v6549_v53, 0.0  ;;  %v1575_v15 = vand.u32 2147483648, %v6549_v53  ;;  %v6651_v11 = vadd.f32 1e-06, %v1649_v61  ;;  %4631 = vrsqrt.f32 %v6630_v4 }
 0x154   : > { %v1510_v16 = vadd.f32 %v1509_v9, %v1497_v55  ;;  %vm1579_vm6 = vcmp.eq.f32.partialorder %v6562_v6, inf  ;;  %vm1581_vm7 = vcmp.eq.f32.partialorder %v6562_v6, 0.0  ;;  %v1582_v20 = vand.u32 2147483648, %v6562_v6 }
 0x155   : > { %v1562_v24 = vsel %vm1560_vm1, %v1561_v37, %v1559_v52  ;;  %v1569_v21 = vsel %vm1567_vm3, %v1568_v5, %v1566_v7  ;;  %v1644_v18 = vsub.f32 %v4046_v32, %v4054_v63  ;;  %v1645_v19 = vsub.f32 %v4047_v60, %v4055_v1  ;;  %v4059_v5 = vld [vmem:[%s5213_s20 + $0x390] sm:$0xff] }
 0x156   : > { %v1573_v31 = vsel %vm1572_vm4, %v6549_v53, %v1571_v57  ;;  %v1578_v42 = vmul.f32 %v4620_v8, %v6562_v6  ;;  %v1651_v25 = vmul.f32 %v1643_v13, %v1643_v13  ;;  %v6667_v29 = vadd.f32 1e-06, %v1650_v3 }
 0x157   : > { %v4622_v36 = vpop.eup %4621  ;;  %vm1586_vm8 = vcmp.eq.f32.partialorder %v6579_v40, inf  ;;  %vm1588_vm9 = vcmp.eq.f32.partialorder %v6579_v40, 0.0  ;;  %v1646_v22 = vsub.f32 %v4048_v30, %v4056_v23  ;;  %4633 = vrsqrt.f32 %v6651_v11 }
 0x158   : > { %v1511_v46 = vadd.f32 %v1510_v16, %v1504_v12  ;;  %v1589_v56 = vand.u32 2147483648, %v6579_v40  ;;  %vm1593_vm10 = vcmp.eq.f32.partialorder %v6591_v26, inf  ;;  %v1612_v38 = vadd.f32 %v1569_v21, %v1562_v24  ;;  %v4067_v12 = vld [vmem:[%s5220_s18 + $0x390] sm:$0xff]  ;;  %v4060_v16 = vld [vmem:[%s5213_s20 + $0x398] sm:$0xff] }
 0x159   : > { %v4624_v33 = vpop.eup %4623  ;;  %v1576_v14 = vsel %vm1574_vm5, %v1575_v15, %v1573_v31  ;;  %vm1595_vm11 = vcmp.eq.f32.partialorder %v6591_v26, 0.0  ;;  %v1596_v39 = vand.u32 2147483648, %v6591_v26  ;;  %v1652_v35 = vmul.f32 %v1644_v18, %v1644_v18 }
 0x15a   : > { %v1653_v37 = vmul.f32 %v1645_v19, %v1645_v19  ;;  %v4626_v45 = vpop.eup %4625  ;;  %v1580_v51 = vsel %vm1579_vm6, %v6562_v6, %v1578_v42  ;;  %v1585_v27 = vmul.f32 %v4622_v36, %v6579_v40  ;;  %v6682_v34 = vadd.f32 1e-06, %v1651_v25 }
 0x15b   : > { %4635 = vrsqrt.f32 %v6667_v29  ;;  %vm1600_vm12 = vcmp.eq.f32.partialorder %v6598_v48, inf  ;;  %vm1602_vm13 = vcmp.eq.f32.partialorder %v6598_v48, 0.0  ;;  %v1603_v53 = vand.u32 2147483648, %v6598_v48 }
 0x15c   : > { %v1654_v41 = vmul.f32 %v1646_v22, %v1646_v22  ;;  %v6689_v43 = vadd.f32 %v1511_v46, %v6589_v28  ;;  %vm1607_vm14 = vcmp.eq.f32.partialorder %v6600_v17, inf  ;;  %vm1609_vm15 = vcmp.eq.f32.partialorder %v6600_v17, 0.0  ;;  %v4058_v28 = vld [vmem:[%s5213_s20 + $0x388] sm:$0xff] }
 0x15d   : > { %v1613_v44 = vadd.f32 %v1612_v38, %v1576_v14  ;;  %v4628_v2 = vpop.eup %4627  ;;  %v1583_v50 = vsel %vm1581_vm7, %v1582_v20, %v1580_v51  ;;  %v1592_v0 = vmul.f32 %v4624_v33, %v6591_v26  ;;  %v1599_v10 = vmul.f32 %v4626_v45, %v6598_v48  ;;  %v4068_v20 = vld [vmem:[%s5220_s18 + $0x398] sm:$0xff]  ;;  %v4069_v38 = vld [vmem:[%s5220_s18 + $0x3a0] sm:$0xff]  ;;  %v4062_v51 = vld [vmem:[%s5213_s20 + $0x3a8] sm:$0xff] }
 0x15e   : > { %v6699_v54 = vadd.f32 1e-06, %v1652_v35  ;;  %v1587_v59 = vsel %vm1586_vm8, %v6579_v40, %v1585_v27  ;;  %v1610_v61 = vand.u32 2147483648, %v6600_v17  ;;  %v6707_v55 = vadd.f32 1e-06, %v1653_v37  ;;  %v4063_v27 = vld [vmem:[%s5213_s20 + $0x3b0] sm:$0xff] }
 0x15f   : > { %4637 = vrsqrt.f32 %v6682_v34  ;;  %v4630_v6 = vpop.eup %4629  ;;  %v6710_v9 = vadd.f32 1e-06, %v1654_v41  ;;  %vm1665_vm0 = vcmp.eq.f32.partialorder %v6626_v49, inf  ;;  %vm1667_vm1 = vcmp.eq.f32.partialorder %v6626_v49, 0.0 }
 0x160   : > { %v1746_v52 = vsub.f32 %v4057_v47, %v4065_v62  ;;  %v4632_v32 = vpop.eup %4631  ;;  %v1606_v13 = vmul.f32 %v4628_v2, %v6600_v17  ;;  %v1614_v7 = vadd.f32 %v1613_v44, %v1583_v50  ;;  %v1668_v57 = vand.u32 2147483648, %v6626_v49  ;;  %v4064_v62 = vld [vmem:[%s5213_s20 + $0x3b8] sm:$0xff]  ;;  %v4071_v2 = vld [vmem:[%s5220_s18 + $0x3b0] sm:$0xff] }
 0x161   : > { %v1747_v60 = vsub.f32 %v4058_v28, %v4066_v58  ;;  %v1590_v63 = vsel %vm1588_vm9, %v1589_v56, %v1587_v59  ;;  %v1594_v1 = vsel %vm1593_vm10, %v6591_v26, %v1592_v0  ;;  %v1601_v3 = vsel %vm1600_vm12, %v6598_v48, %v1599_v10  ;;  %v4061_v56 = vld [vmem:[%s5213_s20 + $0x3a0] sm:$0xff]  ;;  %v4072_v50 = vld [vmem:[%s5220_s18 + $0x3b8] sm:$0xff] }
 0x162   : > { %4639 = vrsqrt.f32 %v6699_v54  ;;  %v1664_v8 = vmul.f32 %v4630_v6, %v6626_v49  ;;  %v1671_v15 = vmul.f32 %v4632_v32, %v6630_v4  ;;  %v1748_v30 = vsub.f32 %v4059_v5, %v4067_v12 }
 0x163   : > { %v1754_v23 = vmul.f32 %v1746_v52, %v1746_v52  ;;  %vm1672_vm2 = vcmp.eq.f32.partialorder %v6630_v4, inf  ;;  %vm1674_vm3 = vcmp.eq.f32.partialorder %v6630_v4, 0.0  ;;  %4641 = vrsqrt.f32 %v6707_v55 }
 0x164   : > { %v1755_v40 = vmul.f32 %v1747_v60, %v1747_v60  ;;  %v4634_v24 = vpop.eup %4633  ;;  %v1597_v21 = vsel %vm1595_vm11, %v1596_v39, %v1594_v1  ;;  %v1608_v18 = vsel %vm1607_vm14, %v6600_v17, %v1606_v13  ;;  %v1615_v19 = vadd.f32 %v1614_v7, %v1590_v63 }
 0x165   : > { %v1675_v31 = vand.u32 2147483648, %v6630_v4  ;;  %v1604_v42 = vsel %vm1602_vm13, %v1603_v53, %v1601_v3  ;;  %4643 = vrsqrt.f32 %v6710_v9  ;;  %v1749_v25 = vsub.f32 %v4060_v16, %v4068_v20  ;;  %v4070_v53 = vld [vmem:[%s5220_s18 + $0x3a8] sm:$0xff] }
 0x166   : > { %v6743_v36 = vadd.f32 1e-06, %v1754_v23  ;;  %v1666_v26 = vsel %vm1665_vm0, %v6626_v49, %v1664_v8  ;;  %v1673_v22 = vsel %vm1672_vm2, %v6630_v4, %v1671_v15  ;;  %v1678_v46 = vmul.f32 %v4634_v24, %v6651_v11  ;;  %v4081_v23 = vld [vmem:[%s5220_s18 + $0x3c0] sm:$0xff] }
 0x167   : > { %v1756_v48 = vmul.f32 %v1748_v30, %v1748_v30  ;;  %v1611_v14 = vsel %vm1609_vm15, %v1610_v61, %v1608_v18  ;;  %vm1679_vm4 = vcmp.eq.f32.partialorder %v6651_v11, inf  ;;  %vm1681_vm5 = vcmp.eq.f32.partialorder %v6651_v11, 0.0  ;;  %v4073_v30 = vld [vmem:[%s5213_s20 + $0x3c0] sm:$0xff] }
 0x168   : > { %v4636_v33 = vpop.eup %4635  ;;  %v6756_v39 = vadd.f32 1e-06, %v1755_v40  ;;  %v1616_v35 = vadd.f32 %v1615_v19, %v1597_v21  ;;  %v1682_v37 = vand.u32 2147483648, %v6651_v11  ;;  %vm1686_vm6 = vcmp.eq.f32.partialorder %v6667_v29, inf }
 0x169   : > { %vm1688_vm7 = vcmp.eq.f32.partialorder %v6667_v29, 0.0  ;;  %v1669_v17 = vsel %vm1667_vm1, %v1668_v57, %v1666_v26  ;;  %v1676_v45 = vsel %vm1674_vm3, %v1675_v31, %v1673_v22  ;;  %v1750_v41 = vsub.f32 %v4061_v56, %v4069_v38  ;;  %v4074_v31 = vld [vmem:[%s5213_s20 + $0x3c8] sm:$0xff]  ;;  %v4083_v56 = vld [vmem:[%s5220_s18 + $0x3d0] sm:$0xff] }
 0x16a   : > { %4645 = vrsqrt.f32 %v6743_v36  ;;  %v1680_v44 = vsel %vm1679_vm4, %v6651_v11, %v1678_v46  ;;  %v1685_v47 = vmul.f32 %v4636_v33, %v6667_v29  ;;  %v1757_v0 = vmul.f32 %v1749_v25, %v1749_v25  ;;  %v4075_v46 = vld [vmem:[%s5213_s20 + $0x3d0] sm:$0xff] }
 0x16b   : > { %v6774_v10 = vadd.f32 1e-06, %v1756_v48  ;;  %v1689_v4 = vand.u32 2147483648, %v6667_v29  ;;  %vm1693_vm8 = vcmp.eq.f32.partialorder %v6682_v34, inf  ;;  %vm1695_vm9 = vcmp.eq.f32.partialorder %v6682_v34, 0.0 }
 0x16c   : > { %v4638_v49 = vpop.eup %4637  ;;  %4647 = vrsqrt.f32 %v6756_v39  ;;  %v1617_v28 = vadd.f32 %v1616_v35, %v1604_v42  ;;  %v1696_v58 = vand.u32 2147483648, %v6682_v34  ;;  %v1719_v59 = vadd.f32 %v1676_v45, %v1669_v17  ;;  %v4082_v42 = vld [vmem:[%s5220_s18 + $0x3c8] sm:$0xff] }
 0x16d   : > { %v1751_v61 = vsub.f32 %v4062_v51, %v4070_v53  ;;  %v1683_v6 = vsel %vm1681_vm5, %v1682_v37, %v1680_v44  ;;  %v1752_v5 = vsub.f32 %v4063_v27, %v4071_v2  ;;  %v1753_v12 = vsub.f32 %v4064_v62, %v4072_v50  ;;  %v4076_v51 = vld [vmem:[%s5213_s20 + $0x3d8] sm:$0xff] }
 0x16e   : > { %v1758_v52 = vmul.f32 %v1750_v41, %v1750_v41  ;;  %v1687_v13 = vsel %vm1686_vm6, %v6667_v29, %v1685_v47  ;;  %v1692_v7 = vmul.f32 %v4638_v49, %v6682_v34  ;;  %v6787_v57 = vadd.f32 1e-06, %v1757_v0  ;;  %v4084_v27 = vld [vmem:[%s5220_s18 + $0x3d8] sm:$0xff] }
 0x16f   : > { %v4640_v32 = vpop.eup %4639  ;;  %4649 = vrsqrt.f32 %v6774_v10  ;;  %vm1700_vm10 = vcmp.eq.f32.partialorder %v6699_v54, inf  ;;  %vm1702_vm11 = vcmp.eq.f32.partialorder %v6699_v54, 0.0  ;;  %v1703_v11 = vand.u32 2147483648, %v6699_v54 }
 0x170   : > { %vm1707_vm12 = vcmp.eq.f32.partialorder %v6707_v55, inf  ;;  %v4642_v60 = vpop.eup %4641  ;;  %v1618_v63 = vadd.f32 %v1617_v28, %v1611_v14  ;;  %vm1709_vm13 = vcmp.eq.f32.partialorder %v6707_v55, 0.0  ;;  %v1720_v1 = vadd.f32 %v1719_v59, %v1683_v6  ;;  %v4085_v28 = vld [vmem:[%s5220_s18 + $0x3e0] sm:$0xff] }
 0x171   : > { %v1759_v3 = vmul.f32 %v1751_v61, %v1751_v61  ;;  %v1690_v8 = vsel %vm1688_vm7, %v1689_v4, %v1687_v13  ;;  %v1710_v15 = vand.u32 2147483648, %v6707_v55  ;;  %v1760_v16 = vmul.f32 %v1752_v5, %v1752_v5  ;;  %v4077_v4 = vld [vmem:[%s5213_s20 + $0x3e0] sm:$0xff]  ;;  %v4078_v13 = vld [vmem:[%s5213_s20 + $0x3e8] sm:$0xff] }
 0x172   : > { %v1761_v20 = vmul.f32 %v1753_v12, %v1753_v12  ;;  %v4644_v40 = vpop.eup %4643  ;;  %v1694_v24 = vsel %vm1693_vm8, %v6682_v34, %v1692_v7  ;;  %v1699_v21 = vmul.f32 %v4640_v32, %v6699_v54  ;;  %v6804_v18 = vadd.f32 1e-06, %v1758_v52  ;;  %v4086_v7 = vld [vmem:[%s5220_s18 + $0x3e8] sm:$0xff] }
 0x173   : > { %4651 = vrsqrt.f32 %v6787_v57  ;;  %v1706_v29 = vmul.f32 %v4642_v60, %v6707_v55  ;;  %vm1714_vm14 = vcmp.eq.f32.partialorder %v6710_v9, inf  ;;  %vm1716_vm15 = vcmp.eq.f32.partialorder %v6710_v9, 0.0 }
 0x174   : > { %v1717_v19 = vand.u32 2147483648, %v6710_v9  ;;  %v6814_v25 = vadd.f32 %v1618_v63, %v6689_v43  ;;  %v1721_v26 = vadd.f32 %v1720_v1, %v1690_v8  ;;  %v6816_v22 = vadd.f32 1e-06, %v1759_v3  ;;  %v4079_v63 = vld [vmem:[%s5213_s20 + $0x3f0] sm:$0xff] }
 0x175   : > { %v1853_v38 = vsub.f32 %v4073_v30, %v4081_v23  ;;  %v1697_v48 = vsel %vm1695_vm9, %v1696_v58, %v1694_v24  ;;  %v1713_v33 = vmul.f32 %v4644_v40, %v6710_v9  ;;  %v6823_v14 = vadd.f32 1e-06, %v1760_v16  ;;  %v4087_v1 = vld [vmem:[%s5220_s18 + $0x3f0] sm:$0xff]  ;;  %v4080_v23 = vld [vmem:[%s5213_s20 + $0x3f8] sm:$0xff] }
 0x176   : > { %v6825_v35 = vadd.f32 1e-06, %v1761_v20  ;;  %v1701_v43 = vsel %vm1700_vm10, %v6699_v54, %v1699_v21  ;;  %vm1772_vm0 = vcmp.eq.f32.partialorder %v6743_v36, inf  ;;  %4653 = vrsqrt.f32 %v6804_v18  ;;  %v4088_v40 = vld [vmem:[%s5220_s18 + $0x3f8] sm:$0xff] }
 0x177   : > { %v4646_v37 = vpop.eup %4645  ;;  %v1854_v17 = vsub.f32 %v4074_v31, %v4082_v42  ;;  %v1708_v34 = vsel %vm1707_vm12, %v6707_v55, %v1706_v29  ;;  %vm1774_vm1 = vcmp.eq.f32.partialorder %v6743_v36, 0.0  ;;  %v1775_v45 = vand.u32 2147483648, %v6743_v36 }
 0x178   : > { %v1855_v53 = vsub.f32 %v4075_v46, %v4083_v56  ;;  %v1722_v44 = vadd.f32 %v1721_v26, %v1697_v48  ;;  %4655 = vrsqrt.f32 %v6816_v22  ;;  %v1861_v47 = vmul.f32 %v1853_v38, %v1853_v38 }
 0x179   : > { %v4648_v41 = vpop.eup %4647  ;;  %v1862_v62 = vmul.f32 %v1854_v17, %v1854_v17  ;;  %v1704_v2 = vsel %vm1702_vm11, %v1703_v11, %v1701_v43  ;;  %v1715_v50 = vsel %vm1714_vm14, %v6710_v9, %v1713_v33  ;;  %v1771_v0 = vmul.f32 %v4646_v37, %v6743_v36 }
 0x17a   : > { %4657 = vrsqrt.f32 %v6823_v14  ;;  %v1778_v49 = vmul.f32 %v4648_v41, %v6756_v39  ;;  %vm1779_vm2 = vcmp.eq.f32.partialorder %v6756_v39, inf  ;;  %v1856_v58 = vsub.f32 %v4076_v51, %v4084_v27 }
 0x17b   : > { %v6851_v59 = vadd.f32 1e-06, %v1861_v47  ;;  %v1711_v61 = vsel %vm1709_vm13, %v1710_v15, %v1708_v34  ;;  %vm1781_vm3 = vcmp.eq.f32.partialorder %v6756_v39, 0.0  ;;  %v1863_v6 = vmul.f32 %v1855_v53, %v1855_v53 }
 0x17c   : > { %v4650_v54 = vpop.eup %4649  ;;  %v6856_v5 = vadd.f32 1e-06, %v1862_v62  ;;  %v1718_v12 = vsel %vm1716_vm15, %v1717_v19, %v1715_v50  ;;  %v1723_v52 = vadd.f32 %v1722_v44, %v1704_v2  ;;  %v1782_v32 = vand.u32 2147483648, %v6756_v39  ;;  %v4089_v2 = vld [vmem:[%s5213_s20 + $0x400] sm:$0xff] }
 0x17d   : > { %4659 = vrsqrt.f32 %v6825_v35  ;;  %v1773_v55 = vsel %vm1772_vm0, %v6743_v36, %v1771_v0  ;;  %vm1786_vm4 = vcmp.eq.f32.partialorder %v6774_v10, inf  ;;  %vm1788_vm5 = vcmp.eq.f32.partialorder %v6774_v10, 0.0  ;;  %v4097_v50 = vld [vmem:[%s5220_s18 + $0x400] sm:$0xff] }
 0x17e   : > { %v1857_v11 = vsub.f32 %v4077_v4, %v4085_v28  ;;  %v1780_v9 = vsel %vm1779_vm2, %v6756_v39, %v1778_v49  ;;  %v1785_v60 = vmul.f32 %v4650_v54, %v6774_v10  ;;  %v1864_v3 = vmul.f32 %v1856_v58, %v1856_v58  ;;  %v4098_v58 = vld [vmem:[%s5220_s18 + $0x408] sm:$0xff] }
 0x17f   : > { %4661 = vrsqrt.f32 %v6851_v59  ;;  %v1789_v15 = vand.u32 2147483648, %v6774_v10  ;;  %vm1793_vm6 = vcmp.eq.f32.partialorder %v6787_v57, inf  ;;  %v6878_v16 = vadd.f32 1e-06, %v1863_v6 }
 0x180   : > { %v4652_v8 = vpop.eup %4651  ;;  %4663 = vrsqrt.f32 %v6856_v5  ;;  %v1724_v20 = vadd.f32 %v1723_v52, %v1711_v61  ;;  %vm1795_vm7 = vcmp.eq.f32.partialorder %v6787_v57, 0.0  ;;  %v1796_v30 = vand.u32 2147483648, %v6787_v57  ;;  %v4091_v52 = vld [vmem:[%s5213_s20 + $0x410] sm:$0xff] }
 0x181   : > { %v1858_v24 = vsub.f32 %v4078_v13, %v4086_v7  ;;  %v1776_v21 = vsel %vm1774_vm1, %v1775_v45, %v1773_v55  ;;  %v1783_v29 = vsel %vm1781_vm3, %v1782_v32, %v1780_v9  ;;  %vm1800_vm8 = vcmp.eq.f32.partialorder %v6804_v18, inf  ;;  %v4099_v32 = vld [vmem:[%s5220_s18 + $0x410] sm:$0xff] }
 0x182   : > { %v1859_v19 = vsub.f32 %v4079_v63, %v4087_v1  ;;  %v1787_v31 = vsel %vm1786_vm4, %v6774_v10, %v1785_v60  ;;  %v1792_v42 = vmul.f32 %v4652_v8, %v6787_v57  ;;  %v1865_v26 = vmul.f32 %v1857_v11, %v1857_v11 }
 0x183   : > { %v6894_v46 = vadd.f32 1e-06, %v1864_v3  ;;  %v4654_v56 = vpop.eup %4653  ;;  %vm1802_vm9 = vcmp.eq.f32.partialorder %v6804_v18, 0.0  ;;  %v1803_v36 = vand.u32 2147483648, %v6804_v18  ;;  %v1860_v38 = vsub.f32 %v4080_v23, %v4088_v40 }
 0x184   : > { %4665 = vrsqrt.f32 %v6878_v16  ;;  %v1725_v39 = vadd.f32 %v1724_v20, %v1718_v12  ;;  %vm1807_vm10 = vcmp.eq.f32.partialorder %v6816_v22, inf  ;;  %v1826_v48 = vadd.f32 %v1783_v29, %v1776_v21  ;;  %v4092_v20 = vld [vmem:[%s5213_s20 + $0x418] sm:$0xff] }
 0x185   : > { %v1866_v33 = vmul.f32 %v1858_v24, %v1858_v24  ;;  %v4656_v37 = vpop.eup %4655  ;;  %v1790_v43 = vsel %vm1788_vm5, %v1789_v15, %v1787_v31  ;;  %vm1809_vm11 = vcmp.eq.f32.partialorder %v6816_v22, 0.0  ;;  %v1810_v17 = vand.u32 2147483648, %v6816_v22 }
 0x186   : > { %v1867_v34 = vmul.f32 %v1859_v19, %v1859_v19  ;;  %v1794_v51 = vsel %vm1793_vm6, %v6787_v57, %v1792_v42  ;;  %v1799_v27 = vmul.f32 %v4654_v56, %v6804_v18  ;;  %v6908_v53 = vadd.f32 1e-06, %v1865_v26  ;;  %v4093_v26 = vld [vmem:[%s5213_s20 + $0x420] sm:$0xff] }
 0x187   : > { %v4658_v45 = vpop.eup %4657  ;;  %4667 = vrsqrt.f32 %v6894_v46  ;;  %vm1814_vm12 = vcmp.eq.f32.partialorder %v6823_v14, inf  ;;  %vm1816_vm13 = vcmp.eq.f32.partialorder %v6823_v14, 0.0  ;;  %v1817_v10 = vand.u32 2147483648, %v6823_v14  ;;  %v4101_v56 = vld [vmem:[%s5220_s18 + $0x420] sm:$0xff] }
 0x188   : > { %v1868_v41 = vmul.f32 %v1860_v38, %v1860_v38  ;;  %v6915_v44 = vadd.f32 %v1725_v39, %v6814_v25  ;;  %vm1821_vm14 = vcmp.eq.f32.partialorder %v6825_v35, inf  ;;  %v1827_v47 = vadd.f32 %v1826_v48, %v1790_v43  ;;  %v4090_v25 = vld [vmem:[%s5213_s20 + $0x408] sm:$0xff] }
 0x189   : > { %v6918_v62 = vadd.f32 1e-06, %v1866_v33  ;;  %v1797_v49 = vsel %vm1795_vm7, %v1796_v30, %v1794_v51  ;;  %v1806_v4 = vmul.f32 %v4656_v37, %v6816_v22  ;;  %v1813_v28 = vmul.f32 %v4658_v45, %v6823_v14  ;;  %v4100_v30 = vld [vmem:[%s5220_s18 + $0x418] sm:$0xff] }
 0x18a   : > { %v4660_v0 = vpop.eup %4659  ;;  %vm1823_vm15 = vcmp.eq.f32.partialorder %v6825_v35, 0.0  ;;  %v1801_v54 = vsel %vm1800_vm8, %v6804_v18, %v1799_v27  ;;  %v1824_v61 = vand.u32 2147483648, %v6825_v35  ;;  %v6933_v6 = vadd.f32 1e-06, %v1867_v34  ;;  %v4094_v27 = vld [vmem:[%s5213_s20 + $0x428] sm:$0xff] }
 0x18b   : > { %4669 = vrsqrt.f32 %v6908_v53  ;;  %v6936_v12 = vadd.f32 1e-06, %v1868_v41  ;;  %vm1879_vm0 = vcmp.eq.f32.partialorder %v6851_v59, inf  ;;  %vm1881_vm1 = vcmp.eq.f32.partialorder %v6851_v59, 0.0 }
 0x18c   : > { %v4662_v57 = vpop.eup %4661  ;;  %v1960_v55 = vsub.f32 %v4089_v2, %v4097_v50  ;;  %v1820_v7 = vmul.f32 %v4660_v0, %v6825_v35  ;;  %v1828_v11 = vadd.f32 %v1827_v47, %v1797_v49  ;;  %4671 = vrsqrt.f32 %v6918_v62  ;;  %v4095_v50 = vld [vmem:[%s5213_s20 + $0x430] sm:$0xff] }
 0x18d   : > { %v4664_v13 = vpop.eup %4663  ;;  %v1961_v9 = vsub.f32 %v4090_v25, %v4098_v58  ;;  %v1804_v60 = vsel %vm1802_vm9, %v1803_v36, %v1801_v54  ;;  %v1808_v63 = vsel %vm1807_vm10, %v6816_v22, %v1806_v4  ;;  %v1815_v1 = vsel %vm1814_vm12, %v6823_v14, %v1813_v28  ;;  %v4103_v0 = vld [vmem:[%s5220_s18 + $0x430] sm:$0xff]  ;;  %v4096_v4 = vld [vmem:[%s5213_s20 + $0x438] sm:$0xff] }
 0x18e   : > { %v1882_v3 = vand.u32 2147483648, %v6851_v59  ;;  %v1878_v8 = vmul.f32 %v4662_v57, %v6851_v59  ;;  %v1885_v15 = vmul.f32 %v4664_v13, %v6856_v5  ;;  %v1962_v18 = vsub.f32 %v4091_v52, %v4099_v32  ;;  %v4104_v28 = vld [vmem:[%s5220_s18 + $0x438] sm:$0xff] }
 0x18f   : > { %v1968_v23 = vmul.f32 %v1960_v55, %v1960_v55  ;;  %vm1886_vm2 = vcmp.eq.f32.partialorder %v6856_v5, inf  ;;  %vm1888_vm3 = vcmp.eq.f32.partialorder %v6856_v5, 0.0  ;;  %4673 = vrsqrt.f32 %v6933_v6 }
 0x190   : > { %v1969_v40 = vmul.f32 %v1961_v9, %v1961_v9  ;;  %v1811_v21 = vsel %vm1809_vm11, %v1810_v17, %v1808_v63  ;;  %v1822_v29 = vsel %vm1821_vm14, %v6825_v35, %v1820_v7  ;;  %v1829_v19 = vadd.f32 %v1828_v11, %v1804_v60 }
 0x191   : > { %v4666_v24 = vpop.eup %4665  ;;  %v1889_v31 = vand.u32 2147483648, %v6856_v5  ;;  %v1818_v42 = vsel %vm1816_vm13, %v1817_v10, %v1815_v1  ;;  %4675 = vrsqrt.f32 %v6936_v12  ;;  %v1963_v36 = vsub.f32 %v4092_v20, %v4100_v30  ;;  %v4102_v10 = vld [vmem:[%s5220_s18 + $0x428] sm:$0xff]  ;;  %v4105_v30 = vld [vmem:[%s5213_s20 + $0x440] sm:$0xff] }
 0x192   : > { %v6971_v38 = vadd.f32 1e-06, %v1968_v23  ;;  %v1880_v22 = vsel %vm1879_vm0, %v6851_v59, %v1878_v8  ;;  %v1887_v39 = vsel %vm1886_vm2, %v6856_v5, %v1885_v15  ;;  %v1892_v14 = vmul.f32 %v4666_v24, %v6878_v16 }
 0x193   : > { %v1970_v48 = vmul.f32 %v1962_v18, %v1962_v18  ;;  %v1825_v37 = vsel %vm1823_vm15, %v1824_v61, %v1822_v29  ;;  %vm1893_vm4 = vcmp.eq.f32.partialorder %v6878_v16, inf  ;;  %vm1895_vm5 = vcmp.eq.f32.partialorder %v6878_v16, 0.0  ;;  %v4113_v18 = vld [vmem:[%s5220_s18 + $0x440] sm:$0xff] }
 0x194   : > { %v4668_v33 = vpop.eup %4667  ;;  %v6984_v43 = vadd.f32 1e-06, %v1969_v40  ;;  %v1830_v17 = vadd.f32 %v1829_v19, %v1811_v21  ;;  %v1896_v34 = vand.u32 2147483648, %v6878_v16  ;;  %vm1900_vm6 = vcmp.eq.f32.partialorder %v6894_v46, inf }
 0x195   : > { %v1964_v45 = vsub.f32 %v4093_v26, %v4101_v56  ;;  %v1883_v51 = vsel %vm1881_vm1, %v1882_v3, %v1880_v22  ;;  %v1890_v35 = vsel %vm1888_vm3, %v1889_v31, %v1887_v39  ;;  %v1971_v41 = vmul.f32 %v1963_v36, %v1963_v36  ;;  %v4106_v31 = vld [vmem:[%s5213_s20 + $0x448] sm:$0xff]  ;;  %v4107_v22 = vld [vmem:[%s5213_s20 + $0x450] sm:$0xff] }
 0x196   : > { %4677 = vrsqrt.f32 %v6971_v38  ;;  %v1894_v47 = vsel %vm1893_vm4, %v6878_v16, %v1892_v14  ;;  %v1899_v2 = vmul.f32 %v4668_v33, %v6894_v46  ;;  %vm1902_vm7 = vcmp.eq.f32.partialorder %v6894_v46, 0.0  ;;  %v4115_v39 = vld [vmem:[%s5220_s18 + $0x450] sm:$0xff] }
 0x197   : > { %v7000_v59 = vadd.f32 1e-06, %v1970_v48  ;;  %v1903_v5 = vand.u32 2147483648, %v6894_v46  ;;  %vm1907_vm8 = vcmp.eq.f32.partialorder %v6908_v53, inf  ;;  %vm1909_vm9 = vcmp.eq.f32.partialorder %v6908_v53, 0.0 }
 0x198   : > { %v4670_v49 = vpop.eup %4669  ;;  %4679 = vrsqrt.f32 %v6984_v43  ;;  %v1831_v25 = vadd.f32 %v1830_v17, %v1818_v42  ;;  %v1910_v58 = vand.u32 2147483648, %v6908_v53  ;;  %v1933_v54 = vadd.f32 %v1890_v35, %v1883_v51  ;;  %v4114_v42 = vld [vmem:[%s5220_s18 + $0x448] sm:$0xff] }
 0x199   : > { %v1965_v61 = vsub.f32 %v4094_v27, %v4102_v10  ;;  %v4672_v57 = vpop.eup %4671  ;;  %v1897_v52 = vsel %vm1895_vm5, %v1896_v34, %v1894_v47  ;;  %v1966_v32 = vsub.f32 %v4095_v50, %v4103_v0  ;;  %v1972_v55 = vmul.f32 %v1964_v45, %v1964_v45  ;;  %v4108_v27 = vld [vmem:[%s5213_s20 + $0x458] sm:$0xff] }
 0x19a   : > { %v7011_v13 = vadd.f32 1e-06, %v1971_v41  ;;  %v1901_v7 = vsel %vm1900_vm6, %v6894_v46, %v1899_v2  ;;  %v1906_v11 = vmul.f32 %v4670_v49, %v6908_v53  ;;  %v1967_v9 = vsub.f32 %v4096_v4, %v4104_v28  ;;  %v4116_v10 = vld [vmem:[%s5220_s18 + $0x458] sm:$0xff] }
 0x19b   : > { %4681 = vrsqrt.f32 %v7000_v59  ;;  %vm1914_vm10 = vcmp.eq.f32.partialorder %v6918_v62, inf  ;;  %vm1916_vm11 = vcmp.eq.f32.partialorder %v6918_v62, 0.0  ;;  %v1917_v16 = vand.u32 2147483648, %v6918_v62 }
 0x19c   : > { %vm1921_vm12 = vcmp.eq.f32.partialorder %v6933_v6, inf  ;;  %v4674_v60 = vpop.eup %4673  ;;  %v1913_v63 = vmul.f32 %v4672_v57, %v6918_v62  ;;  %vm1923_vm13 = vcmp.eq.f32.partialorder %v6933_v6, 0.0  ;;  %v1934_v1 = vadd.f32 %v1933_v54, %v1897_v52  ;;  %v4109_v54 = vld [vmem:[%s5213_s20 + $0x460] sm:$0xff] }
 0x19d   : > { %v1973_v3 = vmul.f32 %v1965_v61, %v1965_v61  ;;  %v1904_v8 = vsel %vm1902_vm7, %v1903_v5, %v1901_v7  ;;  %v1974_v15 = vmul.f32 %v1966_v32, %v1966_v32  ;;  %v7026_v20 = vadd.f32 1e-06, %v1972_v55  ;;  %v4117_v61 = vld [vmem:[%s5220_s18 + $0x460] sm:$0xff] }
 0x19e   : > { %4683 = vrsqrt.f32 %v7011_v13  ;;  %v4676_v23 = vpop.eup %4675  ;;  %v1832_v40 = vadd.f32 %v1831_v25, %v1825_v37  ;;  %v1908_v24 = vsel %vm1907_vm8, %v6908_v53, %v1906_v11  ;;  %v1924_v46 = vand.u32 2147483648, %v6933_v6 }
 0x19f   : > { %v1975_v21 = vmul.f32 %v1967_v9, %v1967_v9  ;;  %v1920_v29 = vmul.f32 %v4674_v60, %v6933_v6  ;;  %vm1928_vm14 = vcmp.eq.f32.partialorder %v6936_v12, inf  ;;  %vm1930_vm15 = vcmp.eq.f32.partialorder %v6936_v12, 0.0  ;;  %v4111_v60 = vld [vmem:[%s5213_s20 + $0x470] sm:$0xff] }
 0x1a0   : > { %v1931_v19 = vand.u32 2147483648, %v6936_v12  ;;  %v1915_v26 = vsel %vm1914_vm10, %v6918_v62, %v1913_v63  ;;  %v1935_v56 = vadd.f32 %v1934_v1, %v1904_v8  ;;  %v7044_v36 = vadd.f32 1e-06, %v1973_v3  ;;  %v4118_v63 = vld [vmem:[%s5220_s18 + $0x468] sm:$0xff]  ;;  %v4119_v1 = vld [vmem:[%s5220_s18 + $0x470] sm:$0xff] }
 0x1a1   : > { %v2067_v14 = vsub.f32 %v4105_v30, %v4113_v18  ;;  %v1911_v48 = vsel %vm1909_vm9, %v1910_v58, %v1908_v24  ;;  %v1927_v33 = vmul.f32 %v4676_v23, %v6936_v12  ;;  %v7051_v37 = vadd.f32 1e-06, %v1974_v15  ;;  %v4112_v30 = vld [vmem:[%s5213_s20 + $0x478] sm:$0xff] }
 0x1a2   : > { %4685 = vrsqrt.f32 %v7026_v20  ;;  %v7055_v34 = vadd.f32 %v1832_v40, %v6915_v44  ;;  %v7057_v45 = vadd.f32 1e-06, %v1975_v21  ;;  %vm1986_vm0 = vcmp.eq.f32.partialorder %v6971_v38, inf  ;;  %v4120_v18 = vld [vmem:[%s5220_s18 + $0x478] sm:$0xff] }
 0x1a3   : > { %v4678_v17 = vpop.eup %4677  ;;  %v2068_v51 = vsub.f32 %v4106_v31, %v4114_v42  ;;  %v1918_v35 = vsel %vm1916_vm11, %v1917_v16, %v1915_v26  ;;  %v1922_v53 = vsel %vm1921_vm12, %v6933_v6, %v1920_v29  ;;  %vm1988_vm1 = vcmp.eq.f32.partialorder %v6971_v38, 0.0  ;;  %v4110_v16 = vld [vmem:[%s5213_s20 + $0x468] sm:$0xff] }
 0x1a4   : > { %v2069_v41 = vsub.f32 %v4107_v22, %v4115_v39  ;;  %v1936_v44 = vadd.f32 %v1935_v56, %v1911_v48  ;;  %4687 = vrsqrt.f32 %v7044_v36  ;;  %v2075_v2 = vmul.f32 %v2067_v14, %v2067_v14 }
 0x1a5   : > { %v4680_v47 = vpop.eup %4679  ;;  %v2076_v50 = vmul.f32 %v2068_v51, %v2068_v51  ;;  %v1929_v62 = vsel %vm1928_vm14, %v6936_v12, %v1927_v33  ;;  %v1985_v0 = vmul.f32 %v4678_v17, %v6971_v38  ;;  %4689 = vrsqrt.f32 %v7051_v37 }
 0x1a6   : > { %v1992_v49 = vmul.f32 %v4680_v47, %v6984_v43  ;;  %v1989_v5 = vand.u32 2147483648, %v6971_v38  ;;  %vm1993_vm2 = vcmp.eq.f32.partialorder %v6984_v43, inf  ;;  %v2070_v4 = vsub.f32 %v4108_v27, %v4116_v10 }
 0x1a7   : > { %v7077_v28 = vadd.f32 1e-06, %v2075_v2  ;;  %v1925_v58 = vsel %vm1923_vm13, %v1924_v46, %v1922_v53  ;;  %vm1995_vm3 = vcmp.eq.f32.partialorder %v6984_v43, 0.0  ;;  %v2077_v57 = vmul.f32 %v2069_v41, %v2069_v41 }
 0x1a8   : > { %v4682_v25 = vpop.eup %4681  ;;  %v7084_v52 = vadd.f32 1e-06, %v2076_v50  ;;  %v1932_v32 = vsel %vm1930_vm15, %v1931_v19, %v1929_v62  ;;  %v1937_v55 = vadd.f32 %v1936_v44, %v1918_v35  ;;  %v1996_v7 = vand.u32 2147483648, %v6984_v43  ;;  %v4121_v62 = vld [vmem:[%s5213_s20 + $0x480] sm:$0xff] }
 0x1a9   : > { %4691 = vrsqrt.f32 %v7057_v45  ;;  %v1987_v6 = vsel %vm1986_vm0, %v6971_v38, %v1985_v0  ;;  %v1994_v11 = vsel %vm1993_vm2, %v6984_v43, %v1992_v49  ;;  %v1999_v9 = vmul.f32 %v4682_v25, %v7000_v59  ;;  %v4129_v0 = vld [vmem:[%s5220_s18 + $0x480] sm:$0xff] }
 0x1aa   : > { %vm2000_vm4 = vcmp.eq.f32.partialorder %v7000_v59, inf  ;;  %vm2002_vm5 = vcmp.eq.f32.partialorder %v7000_v59, 0.0  ;;  %v2071_v3 = vsub.f32 %v4109_v54, %v4117_v61  ;;  %v2078_v8 = vmul.f32 %v2070_v4, %v2070_v4 }
 0x1ab   : > { %v4684_v12 = vpop.eup %4683  ;;  %4693 = vrsqrt.f32 %v7077_v28  ;;  %v2003_v15 = vand.u32 2147483648, %v7000_v59  ;;  %vm2007_vm6 = vcmp.eq.f32.partialorder %v7011_v13, inf  ;;  %v7106_v23 = vadd.f32 1e-06, %v2077_v57 }
 0x1ac   : > { %4695 = vrsqrt.f32 %v7084_v52  ;;  %v1938_v40 = vadd.f32 %v1937_v55, %v1925_v58  ;;  %v1990_v24 = vsel %vm1988_vm1, %v1989_v5, %v1987_v6  ;;  %v1997_v46 = vsel %vm1995_vm3, %v1996_v7, %v1994_v11  ;;  %v4130_v58 = vld [vmem:[%s5220_s18 + $0x488] sm:$0xff]  ;;  %v4123_v7 = vld [vmem:[%s5213_s20 + $0x490] sm:$0xff] }
 0x1ad   : > { %vm2009_vm7 = vcmp.eq.f32.partialorder %v7011_v13, 0.0  ;;  %v2001_v21 = vsel %vm2000_vm4, %v7000_v59, %v1999_v9  ;;  %v2006_v29 = vmul.f32 %v4684_v12, %v7011_v13  ;;  %v2010_v19 = vand.u32 2147483648, %v7011_v13  ;;  %v4131_v6 = vld [vmem:[%s5220_s18 + $0x490] sm:$0xff] }
 0x1ae   : > { %v2072_v31 = vsub.f32 %v4110_v16, %v4118_v63  ;;  %v2073_v26 = vsub.f32 %v4111_v60, %v4119_v1  ;;  %v2074_v56 = vsub.f32 %v4112_v30, %v4120_v18  ;;  %v2079_v22 = vmul.f32 %v2071_v3, %v2071_v3  ;;  %v4132_v30 = vld [vmem:[%s5220_s18 + $0x498] sm:$0xff] }
 0x1af   : > { %v4686_v42 = vpop.eup %4685  ;;  %v7119_v38 = vadd.f32 1e-06, %v2078_v8  ;;  %vm2014_vm8 = vcmp.eq.f32.partialorder %v7026_v20, inf  ;;  %vm2016_vm9 = vcmp.eq.f32.partialorder %v7026_v20, 0.0  ;;  %v2040_v43 = vadd.f32 %v1997_v46, %v1990_v24 }
 0x1b0   : > { %4697 = vrsqrt.f32 %v7106_v23  ;;  %v1939_v39 = vadd.f32 %v1938_v40, %v1932_v32  ;;  %v2004_v14 = vsel %vm2002_vm5, %v2003_v15, %v2001_v21  ;;  %v2017_v48 = vand.u32 2147483648, %v7026_v20  ;;  %v4124_v15 = vld [vmem:[%s5213_s20 + $0x498] sm:$0xff] }
 0x1b1   : > { %vm2021_vm10 = vcmp.eq.f32.partialorder %v7044_v36, inf  ;;  %v4688_v33 = vpop.eup %4687  ;;  %v2008_v17 = vsel %vm2007_vm6, %v7011_v13, %v2006_v29  ;;  %v2013_v51 = vmul.f32 %v4686_v42, %v7026_v20  ;;  %vm2023_vm11 = vcmp.eq.f32.partialorder %v7044_v36, 0.0  ;;  %v4122_v13 = vld [vmem:[%s5213_s20 + $0x488] sm:$0xff] }
 0x1b2   : > { %v2024_v35 = vand.u32 2147483648, %v7044_v36  ;;  %v2080_v53 = vmul.f32 %v2072_v31, %v2072_v31  ;;  %v4690_v59 = vpop.eup %4689  ;;  %v2081_v27 = vmul.f32 %v2073_v26, %v2073_v26  ;;  %v2082_v10 = vmul.f32 %v2074_v56, %v2074_v56 }
 0x1b3   : > { %v7134_v41 = vadd.f32 1e-06, %v2079_v22  ;;  %4699 = vrsqrt.f32 %v7119_v38  ;;  %vm2028_vm12 = vcmp.eq.f32.partialorder %v7051_v37, inf  ;;  %vm2030_vm13 = vcmp.eq.f32.partialorder %v7051_v37, 0.0 }
 0x1b4   : > { %v2031_v47 = vand.u32 2147483648, %v7051_v37  ;;  %v2041_v44 = vadd.f32 %v2040_v43, %v2004_v14  ;;  %v7141_v2 = vadd.f32 %v1939_v39, %v7055_v34  ;;  %v2011_v50 = vsel %vm2009_vm7, %v2010_v19, %v2008_v17  ;;  %v4125_v43 = vld [vmem:[%s5213_s20 + $0x4a0] sm:$0xff] }
 0x1b5   : > { %vm2035_vm14 = vcmp.eq.f32.partialorder %v7057_v45, inf  ;;  %vm2037_vm15 = vcmp.eq.f32.partialorder %v7057_v45, 0.0  ;;  %v2015_v5 = vsel %vm2014_vm8, %v7026_v20, %v2013_v51  ;;  %v2020_v4 = vmul.f32 %v4688_v33, %v7044_v36  ;;  %v4133_v39 = vld [vmem:[%s5220_s18 + $0x4a0] sm:$0xff] }
 0x1b6   : > { %v4692_v49 = vpop.eup %4691  ;;  %v2027_v34 = vmul.f32 %v4690_v59, %v7051_v37  ;;  %v7154_v25 = vadd.f32 1e-06, %v2080_v53  ;;  %v2038_v54 = vand.u32 2147483648, %v7057_v45  ;;  %v7159_v61 = vadd.f32 1e-06, %v2081_v27  ;;  %v4126_v53 = vld [vmem:[%s5213_s20 + $0x4a8] sm:$0xff] }
 0x1b7   : > { %v7161_v57 = vadd.f32 1e-06, %v2082_v10  ;;  %4701 = vrsqrt.f32 %v7134_v41  ;;  %v2042_v55 = vadd.f32 %v2041_v44, %v2011_v50  ;;  %vm2093_vm0 = vcmp.eq.f32.partialorder %v7077_v28, inf  ;;  %v4127_v27 = vld [vmem:[%s5213_s20 + $0x4b0] sm:$0xff]  ;;  %v4134_v10 = vld [vmem:[%s5220_s18 + $0x4a8] sm:$0xff] }
 0x1b8   : > { %v4694_v32 = vpop.eup %4693  ;;  %vm2095_vm1 = vcmp.eq.f32.partialorder %v7077_v28, 0.0  ;;  %v2174_v11 = vsub.f32 %v4121_v62, %v4129_v0  ;;  %v2018_v16 = vsel %vm2016_vm9, %v2017_v48, %v2015_v5  ;;  %v2034_v12 = vmul.f32 %v4692_v49, %v7057_v45  ;;  %v4128_v5 = vld [vmem:[%s5213_s20 + $0x4b8] sm:$0xff] }
 0x1b9   : > { %v4696_v9 = vpop.eup %4695  ;;  %v2096_v60 = vand.u32 2147483648, %v7077_v28  ;;  %v2175_v63 = vsub.f32 %v4122_v13, %v4130_v58  ;;  %v2022_v1 = vsel %vm2021_vm10, %v7044_v36, %v2020_v4  ;;  %v2029_v3 = vsel %vm2028_vm12, %v7051_v37, %v2027_v34  ;;  %v4136_v4 = vld [vmem:[%s5220_s18 + $0x4b8] sm:$0xff] }
 0x1ba   : > { %vm2100_vm2 = vcmp.eq.f32.partialorder %v7084_v52, inf  ;;  %4703 = vrsqrt.f32 %v7154_v25  ;;  %v2092_v20 = vmul.f32 %v4694_v32, %v7077_v28  ;;  %v2099_v8 = vmul.f32 %v4696_v9, %v7084_v52 }
 0x1bb   : > { %v2176_v18 = vsub.f32 %v4123_v7, %v4131_v6  ;;  %v2182_v40 = vmul.f32 %v2174_v11, %v2174_v11  ;;  %v2043_v24 = vadd.f32 %v2042_v55, %v2018_v16  ;;  %vm2102_vm3 = vcmp.eq.f32.partialorder %v7084_v52, 0.0 }
 0x1bc   : > { %4705 = vrsqrt.f32 %v7159_v61  ;;  %v2183_v46 = vmul.f32 %v2175_v63, %v2175_v63  ;;  %v2025_v29 = vsel %vm2023_vm11, %v2024_v35, %v2022_v1  ;;  %v2032_v19 = vsel %vm2030_vm13, %v2031_v47, %v2029_v3  ;;  %v4135_v47 = vld [vmem:[%s5220_s18 + $0x4b0] sm:$0xff] }
 0x1bd   : > { %v4698_v21 = vpop.eup %4697  ;;  %v2036_v31 = vsel %vm2035_vm14, %v7057_v45, %v2034_v12  ;;  %v2103_v42 = vand.u32 2147483648, %v7084_v52  ;;  %vm2107_vm4 = vcmp.eq.f32.partialorder %v7106_v23, inf  ;;  %4707 = vrsqrt.f32 %v7161_v57 }
 0x1be   : > { %v2177_v26 = vsub.f32 %v4124_v15, %v4132_v30  ;;  %v7196_v56 = vadd.f32 1e-06, %v2182_v40  ;;  %v2094_v36 = vsel %vm2093_vm0, %v7077_v28, %v2092_v20  ;;  %v2101_v37 = vsel %vm2100_vm2, %v7084_v52, %v2099_v8  ;;  %v4145_v40 = vld [vmem:[%s5220_s18 + $0x4c0] sm:$0xff] }
 0x1bf   : > { %v2106_v22 = vmul.f32 %v4698_v21, %v7106_v23  ;;  %v2184_v14 = vmul.f32 %v2176_v18, %v2176_v18  ;;  %v2039_v33 = vsel %vm2037_vm15, %v2038_v54, %v2036_v31  ;;  %v2044_v17 = vadd.f32 %v2043_v24, %v2025_v29  ;;  %v4137_v18 = vld [vmem:[%s5213_s20 + $0x4c0] sm:$0xff] }
 0x1c0   : > { %v4700_v48 = vpop.eup %4699  ;;  %vm2109_vm5 = vcmp.eq.f32.partialorder %v7106_v23, 0.0  ;;  %v7210_v51 = vadd.f32 1e-06, %v2183_v46  ;;  %v2110_v35 = vand.u32 2147483648, %v7106_v23  ;;  %vm2114_vm6 = vcmp.eq.f32.partialorder %v7119_v38, inf }
 0x1c1   : > { %vm2116_vm7 = vcmp.eq.f32.partialorder %v7119_v38, 0.0  ;;  %4709 = vrsqrt.f32 %v7196_v56  ;;  %v2097_v45 = vsel %vm2095_vm1, %v2096_v60, %v2094_v36  ;;  %v2104_v59 = vsel %vm2102_vm3, %v2103_v42, %v2101_v37  ;;  %v4138_v42 = vld [vmem:[%s5213_s20 + $0x4c8] sm:$0xff] }
 0x1c2   : > { %v2178_v44 = vsub.f32 %v4125_v43, %v4133_v39  ;;  %v2185_v50 = vmul.f32 %v2177_v26, %v2177_v26  ;;  %v2108_v62 = vsel %vm2107_vm4, %v7106_v23, %v2106_v22  ;;  %v2113_v0 = vmul.f32 %v4700_v48, %v7119_v38  ;;  %v4146_v26 = vld [vmem:[%s5220_s18 + $0x4c8] sm:$0xff]  ;;  %v4139_v43 = vld [vmem:[%s5213_s20 + $0x4d0] sm:$0xff] }
 0x1c3   : > { %v2117_v49 = vand.u32 2147483648, %v7119_v38  ;;  %v7231_v28 = vadd.f32 1e-06, %v2184_v14  ;;  %v2045_v52 = vadd.f32 %v2044_v17, %v2032_v19  ;;  %vm2121_vm8 = vcmp.eq.f32.partialorder %v7134_v41, inf  ;;  %v4147_v39 = vld [vmem:[%s5220_s18 + $0x4d0] sm:$0xff] }
 0x1c4   : > { %v4702_v34 = vpop.eup %4701  ;;  %vm2123_vm9 = vcmp.eq.f32.partialorder %v7134_v41, 0.0  ;;  %4711 = vrsqrt.f32 %v7210_v51  ;;  %v2124_v13 = vand.u32 2147483648, %v7134_v41  ;;  %v2147_v58 = vadd.f32 %v2104_v59, %v2097_v45  ;;  %v4148_v45 = vld [vmem:[%s5220_s18 + $0x4d8] sm:$0xff] }
 0x1c5   : > { %v2179_v54 = vsub.f32 %v4126_v53, %v4134_v10  ;;  %v2180_v32 = vsub.f32 %v4127_v27, %v4135_v47  ;;  %v2111_v55 = vsel %vm2109_vm5, %v2110_v35, %v2108_v62  ;;  %v2181_v7 = vsub.f32 %v4128_v5, %v4136_v4  ;;  %v4140_v53 = vld [vmem:[%s5213_s20 + $0x4d8] sm:$0xff]  ;;  %v4141_v4 = vld [vmem:[%s5213_s20 + $0x4e0] sm:$0xff] }
 0x1c6   : > { %v2186_v6 = vmul.f32 %v2178_v44, %v2178_v44  ;;  %v7239_v11 = vadd.f32 1e-06, %v2185_v50  ;;  %v2115_v16 = vsel %vm2114_vm6, %v7119_v38, %v2113_v0  ;;  %v2120_v12 = vmul.f32 %v4702_v34, %v7134_v41  ;;  %v4149_v34 = vld [vmem:[%s5220_s18 + $0x4e0] sm:$0xff] }
 0x1c7   : > { %v4704_v9 = vpop.eup %4703  ;;  %vm2128_vm10 = vcmp.eq.f32.partialorder %v7154_v25, inf  ;;  %4713 = vrsqrt.f32 %v7231_v28  ;;  %v2046_v60 = vadd.f32 %v2045_v52, %v2039_v33  ;;  %vm2130_vm11 = vcmp.eq.f32.partialorder %v7154_v25, 0.0 }
 0x1c8   : > { %v2131_v23 = vand.u32 2147483648, %v7154_v25  ;;  %vm2135_vm12 = vcmp.eq.f32.partialorder %v7159_v61, inf  ;;  %vm2137_vm13 = vcmp.eq.f32.partialorder %v7159_v61, 0.0  ;;  %v2148_v1 = vadd.f32 %v2147_v58, %v2111_v55 }
 0x1c9   : > { %v4706_v63 = vpop.eup %4705  ;;  %v2187_v3 = vmul.f32 %v2179_v54, %v2179_v54  ;;  %v2188_v20 = vmul.f32 %v2180_v32, %v2180_v32  ;;  %v2118_v8 = vsel %vm2116_vm7, %v2117_v49, %v2115_v16  ;;  %v2189_v15 = vmul.f32 %v2181_v7, %v2181_v7 }
 0x1ca   : > { %v7253_v30 = vadd.f32 1e-06, %v2186_v6  ;;  %4715 = vrsqrt.f32 %v7239_v11  ;;  %v4708_v24 = vpop.eup %4707  ;;  %v2122_v46 = vsel %vm2121_vm8, %v7134_v41, %v2120_v12  ;;  %v2127_v21 = vmul.f32 %v4704_v9, %v7154_v25 }
 0x1cb   : > { %v2138_v38 = vand.u32 2147483648, %v7159_v61  ;;  %vm2142_vm14 = vcmp.eq.f32.partialorder %v7161_v57, inf  ;;  %v7265_v29 = vadd.f32 %v2046_v60, %v7141_v2  ;;  %v2134_v19 = vmul.f32 %v4706_v63, %v7159_v61  ;;  %v4142_v60 = vld [vmem:[%s5213_s20 + $0x4e8] sm:$0xff] }
 0x1cc   : > { %vm2144_vm15 = vcmp.eq.f32.partialorder %v7161_v57, 0.0  ;;  %v2145_v31 = vand.u32 2147483648, %v7161_v57  ;;  %v2149_v36 = vadd.f32 %v2148_v1, %v2118_v8  ;;  %v7272_v37 = vadd.f32 1e-06, %v2187_v3  ;;  %v4143_v8 = vld [vmem:[%s5213_s20 + $0x4f0] sm:$0xff] }
 0x1cd   : > { %v7274_v22 = vadd.f32 1e-06, %v2188_v20  ;;  %v2281_v14 = vsub.f32 %v4137_v18, %v4145_v40  ;;  %v2125_v48 = vsel %vm2123_vm9, %v2124_v13, %v2122_v46  ;;  %v7280_v33 = vadd.f32 1e-06, %v2189_v15  ;;  %v4151_v15 = vld [vmem:[%s5220_s18 + $0x4f0] sm:$0xff]  ;;  %v4144_v18 = vld [vmem:[%s5213_s20 + $0x4f8] sm:$0xff] }
 0x1ce   : > { %v4710_v2 = vpop.eup %4709  ;;  %vm2200_vm0 = vcmp.eq.f32.partialorder %v7196_v56, inf  ;;  %4717 = vrsqrt.f32 %v7253_v30  ;;  %v2129_v17 = vsel %vm2128_vm10, %v7154_v25, %v2127_v21  ;;  %v2141_v35 = vmul.f32 %v4708_v24, %v7161_v57  ;;  %v4152_v40 = vld [vmem:[%s5220_s18 + $0x4f8] sm:$0xff] }
 0x1cf   : > { %vm2202_vm1 = vcmp.eq.f32.partialorder %v7196_v56, 0.0  ;;  %v2282_v41 = vsub.f32 %v4138_v42, %v4146_v26  ;;  %v2136_v59 = vsel %vm2135_vm12, %v7159_v61, %v2134_v19  ;;  %v2203_v27 = vand.u32 2147483648, %v7196_v56 }
 0x1d0   : > { %vm2207_vm2 = vcmp.eq.f32.partialorder %v7210_v51, inf  ;;  %v2283_v10 = vsub.f32 %v4139_v43, %v4147_v39  ;;  %v2150_v44 = vadd.f32 %v2149_v36, %v2125_v48  ;;  %v2199_v50 = vmul.f32 %v4710_v2, %v7196_v56 }
 0x1d1   : > { %v4712_v47 = vpop.eup %4711  ;;  %v2289_v62 = vmul.f32 %v2281_v14, %v2281_v14  ;;  %v2290_v0 = vmul.f32 %v2282_v41, %v2282_v41  ;;  %v2132_v49 = vsel %vm2130_vm11, %v2131_v23, %v2129_v17  ;;  %4719 = vrsqrt.f32 %v7272_v37  ;;  %v4150_v23 = vld [vmem:[%s5220_s18 + $0x4e8] sm:$0xff] }
 0x1d2   : > { %v2206_v5 = vmul.f32 %v4712_v47, %v7210_v51  ;;  %v2284_v52 = vsub.f32 %v4140_v53, %v4148_v45  ;;  %v2139_v13 = vsel %vm2137_vm13, %v2138_v38, %v2136_v59  ;;  %v2143_v58 = vsel %vm2142_vm14, %v7161_v57, %v2141_v35 }
 0x1d3   : > { %vm2209_vm3 = vcmp.eq.f32.partialorder %v7210_v51, 0.0  ;;  %v7309_v25 = vadd.f32 1e-06, %v2289_v62  ;;  %v2210_v32 = vand.u32 2147483648, %v7210_v51  ;;  %4721 = vrsqrt.f32 %v7274_v22 }
 0x1d4   : > { %v4714_v54 = vpop.eup %4713  ;;  %v2291_v55 = vmul.f32 %v2283_v10, %v2283_v10  ;;  %v7313_v7 = vadd.f32 1e-06, %v2290_v0  ;;  %v2151_v61 = vadd.f32 %v2150_v44, %v2132_v49  ;;  %v2201_v6 = vsel %vm2200_vm0, %v7196_v56, %v2199_v50  ;;  %v4153_v0 = vld [vmem:[%s5213_s20 + $0x500] sm:$0xff] }
 0x1d5   : > { %4723 = vrsqrt.f32 %v7280_v33  ;;  %v2285_v9 = vsub.f32 %v4141_v4, %v4149_v34  ;;  %v2208_v16 = vsel %vm2207_vm2, %v7210_v51, %v2206_v5  ;;  %v2213_v12 = vmul.f32 %v4714_v54, %v7231_v28  ;;  %v4161_v49 = vld [vmem:[%s5220_s18 + $0x500] sm:$0xff] }
 0x1d6   : > { %v2292_v63 = vmul.f32 %v2284_v52, %v2284_v52  ;;  %4725 = vrsqrt.f32 %v7309_v25  ;;  %v2146_v3 = vsel %vm2144_vm15, %v2145_v31, %v2143_v58  ;;  %vm2214_vm4 = vcmp.eq.f32.partialorder %v7231_v28, inf  ;;  %v4162_v52 = vld [vmem:[%s5220_s18 + $0x508] sm:$0xff] }
 0x1d7   : > { %v4716_v1 = vpop.eup %4715  ;;  %vm2216_vm5 = vcmp.eq.f32.partialorder %v7231_v28, 0.0  ;;  %v2217_v20 = vand.u32 2147483648, %v7231_v28  ;;  %vm2221_vm6 = vcmp.eq.f32.partialorder %v7239_v11, inf  ;;  %vm2223_vm7 = vcmp.eq.f32.partialorder %v7239_v11, 0.0 }
 0x1d8   : > { %v7337_v24 = vadd.f32 1e-06, %v2291_v55  ;;  %4727 = vrsqrt.f32 %v7313_v7  ;;  %v2152_v57 = vadd.f32 %v2151_v61, %v2139_v13  ;;  %v2204_v46 = vsel %vm2202_vm1, %v2203_v27, %v2201_v6  ;;  %v4155_v6 = vld [vmem:[%s5213_s20 + $0x510] sm:$0xff] }
 0x1d9   : > { %v2211_v21 = vsel %vm2209_vm3, %v2210_v32, %v2208_v16  ;;  %v2286_v38 = vsub.f32 %v4142_v60, %v4150_v23  ;;  %v2215_v19 = vsel %vm2214_vm4, %v7231_v28, %v2213_v12  ;;  %v2220_v31 = vmul.f32 %v4716_v1, %v7239_v11 }
 0x1da   : > { %v2293_v42 = vmul.f32 %v2285_v9, %v2285_v9  ;;  %v7346_v26 = vadd.f32 1e-06, %v2292_v63  ;;  %v2224_v43 = vand.u32 2147483648, %v7239_v11  ;;  %vm2228_vm8 = vcmp.eq.f32.partialorder %v7253_v30, inf  ;;  %v4163_v9 = vld [vmem:[%s5220_s18 + $0x510] sm:$0xff] }
 0x1db   : > { %v4718_v36 = vpop.eup %4717  ;;  %v2287_v39 = vsub.f32 %v4143_v8, %v4151_v15  ;;  %v2288_v14 = vsub.f32 %v4144_v18, %v4152_v40  ;;  %vm2230_vm9 = vcmp.eq.f32.partialorder %v7253_v30, 0.0  ;;  %v2231_v56 = vand.u32 2147483648, %v7253_v30  ;;  %v4156_v15 = vld [vmem:[%s5213_s20 + $0x518] sm:$0xff] }
 0x1dc   : > { %v2254_v51 = vadd.f32 %v2211_v21, %v2204_v46  ;;  %4729 = vrsqrt.f32 %v7337_v24  ;;  %v2153_v2 = vadd.f32 %v2152_v57, %v2146_v3  ;;  %v2218_v48 = vsel %vm2216_vm5, %v2217_v20, %v2215_v19  ;;  %v4164_v18 = vld [vmem:[%s5220_s18 + $0x518] sm:$0xff] }
 0x1dd   : > { %vm2235_vm10 = vcmp.eq.f32.partialorder %v7272_v37, inf  ;;  %v2294_v17 = vmul.f32 %v2286_v38, %v2286_v38  ;;  %v2222_v35 = vsel %vm2221_vm6, %v7239_v11, %v2220_v31  ;;  %v2227_v53 = vmul.f32 %v4718_v36, %v7253_v30  ;;  %v4154_v11 = vld [vmem:[%s5213_s20 + $0x508] sm:$0xff] }
 0x1de   : > { %v7360_v45 = vadd.f32 1e-06, %v2293_v42  ;;  %4731 = vrsqrt.f32 %v7346_v26  ;;  %v4720_v41 = vpop.eup %4719  ;;  %vm2237_vm11 = vcmp.eq.f32.partialorder %v7272_v37, 0.0  ;;  %v2238_v28 = vand.u32 2147483648, %v7272_v37 }
 0x1df   : > { %v2295_v59 = vmul.f32 %v2287_v39, %v2287_v39  ;;  %v2296_v27 = vmul.f32 %v2288_v14, %v2288_v14  ;;  %vm2242_vm12 = vcmp.eq.f32.partialorder %v7274_v22, inf  ;;  %vm2244_vm13 = vcmp.eq.f32.partialorder %v7274_v22, 0.0 }
 0x1e0   : > { %v2245_v10 = vand.u32 2147483648, %v7274_v22  ;;  %v2255_v47 = vadd.f32 %v2254_v51, %v2218_v48  ;;  %v4722_v44 = vpop.eup %4721  ;;  %v7369_v50 = vadd.f32 %v2153_v2, %v7265_v29  ;;  %v2225_v62 = vsel %vm2223_vm7, %v2224_v43, %v2222_v35  ;;  %v4157_v2 = vld [vmem:[%s5213_s20 + $0x520] sm:$0xff] }
 0x1e1   : > { %vm2249_vm14 = vcmp.eq.f32.partialorder %v7280_v33, inf  ;;  %vm2251_vm15 = vcmp.eq.f32.partialorder %v7280_v33, 0.0  ;;  %v2229_v4 = vsel %vm2228_vm8, %v7253_v30, %v2227_v53  ;;  %v2234_v34 = vmul.f32 %v4720_v41, %v7272_v37  ;;  %v4165_v48 = vld [vmem:[%s5220_s18 + $0x520] sm:$0xff] }
 0x1e2   : > { %v4724_v5 = vpop.eup %4723  ;;  %v7381_v29 = vadd.f32 1e-06, %v2294_v17  ;;  %4733 = vrsqrt.f32 %v7360_v45  ;;  %v2252_v58 = vand.u32 2147483648, %v7280_v33  ;;  %v7387_v54 = vadd.f32 1e-06, %v2295_v59 }
 0x1e3   : > { %v4726_v13 = vpop.eup %4725  ;;  %v7389_v32 = vadd.f32 1e-06, %v2296_v27  ;;  %vm2307_vm0 = vcmp.eq.f32.partialorder %v7309_v25, inf  ;;  %v2241_v55 = vmul.f32 %v4722_v44, %v7274_v22  ;;  %v2256_v61 = vadd.f32 %v2255_v47, %v2225_v62  ;;  %v4158_v27 = vld [vmem:[%s5213_s20 + $0x528] sm:$0xff]  ;;  %v4160_v62 = vld [vmem:[%s5213_s20 + $0x538] sm:$0xff] }
 0x1e4   : > { %vm2309_vm1 = vcmp.eq.f32.partialorder %v7309_v25, 0.0  ;;  %v2388_v16 = vsub.f32 %v4153_v0, %v4161_v49  ;;  %v2232_v60 = vsel %vm2230_vm9, %v2231_v56, %v2229_v4  ;;  %v2248_v23 = vmul.f32 %v4724_v5, %v7280_v33  ;;  %v4166_v47 = vld [vmem:[%s5220_s18 + $0x528] sm:$0xff]  ;;  %v4167_v0 = vld [vmem:[%s5220_s18 + $0x530] sm:$0xff] }
 0x1e5   : > { %v4728_v12 = vpop.eup %4727  ;;  %v2310_v63 = vand.u32 2147483648, %v7309_v25  ;;  %v2389_v1 = vsub.f32 %v4154_v11, %v4162_v52  ;;  %v2236_v3 = vsel %vm2235_vm10, %v7272_v37, %v2234_v34  ;;  %v2306_v20 = vmul.f32 %v4726_v13, %v7309_v25 }
 0x1e6   : > { %v2313_v8 = vmul.f32 %v4728_v12, %v7313_v7  ;;  %vm2314_vm2 = vcmp.eq.f32.partialorder %v7313_v7, inf  ;;  %vm2316_vm3 = vcmp.eq.f32.partialorder %v7313_v7, 0.0  ;;  %4735 = vrsqrt.f32 %v7381_v29 }
 0x1e7   : > { %v2390_v30 = vsub.f32 %v4155_v6, %v4163_v9  ;;  %v2396_v40 = vmul.f32 %v2388_v16, %v2388_v16  ;;  %v2243_v57 = vsel %vm2242_vm12, %v7274_v22, %v2241_v55  ;;  %v2257_v46 = vadd.f32 %v2256_v61, %v2232_v60 }
 0x1e8   : > { %4737 = vrsqrt.f32 %v7387_v54  ;;  %v2397_v21 = vmul.f32 %v2389_v1, %v2389_v1  ;;  %v2239_v19 = vsel %vm2237_vm11, %v2238_v28, %v2236_v3  ;;  %v2250_v31 = vsel %vm2249_vm14, %v7280_v33, %v2248_v23 }
 0x1e9   : > { %v4730_v38 = vpop.eup %4729  ;;  %v2317_v42 = vand.u32 2147483648, %v7313_v7  ;;  %v2391_v36 = vsub.f32 %v4156_v15, %v4164_v18  ;;  %v2308_v43 = vsel %vm2307_vm0, %v7309_v25, %v2306_v20  ;;  %v2315_v39 = vsel %vm2314_vm2, %v7313_v7, %v2313_v8  ;;  %v4168_v25 = vld [vmem:[%s5220_s18 + $0x538] sm:$0xff] }
 0x1ea   : > { %v2320_v14 = vmul.f32 %v4730_v38, %v7337_v24  ;;  %v7427_v37 = vadd.f32 1e-06, %v2396_v40  ;;  %v2246_v51 = vsel %vm2244_vm13, %v2245_v10, %v2243_v57  ;;  %vm2321_vm4 = vcmp.eq.f32.partialorder %v7337_v24, inf  ;;  %v4159_v10 = vld [vmem:[%s5213_s20 + $0x530] sm:$0xff]  ;;  %v4169_v57 = vld [vmem:[%s5213_s20 + $0x540] sm:$0xff] }
 0x1eb   : > { %v4732_v56 = vpop.eup %4731  ;;  %4739 = vrsqrt.f32 %v7389_v32  ;;  %v2398_v17 = vmul.f32 %v2390_v30, %v2390_v30  ;;  %v2253_v35 = vsel %vm2251_vm15, %v2252_v58, %v2250_v31  ;;  %v2258_v53 = vadd.f32 %v2257_v46, %v2239_v19  ;;  %v4177_v46 = vld [vmem:[%s5220_s18 + $0x540] sm:$0xff] }
 0x1ec   : > { %vm2323_vm5 = vcmp.eq.f32.partialorder %v7337_v24, 0.0  ;;  %v7438_v41 = vadd.f32 1e-06, %v2397_v21  ;;  %v2311_v22 = vsel %vm2309_vm1, %v2310_v63, %v2308_v43  ;;  %v2318_v28 = vsel %vm2316_vm3, %v2317_v42, %v2315_v39  ;;  %v4178_v43 = vld [vmem:[%s5220_s18 + $0x548] sm:$0xff] }
 0x1ed   : > { %v2324_v59 = vand.u32 2147483648, %v7337_v24  ;;  %4741 = vrsqrt.f32 %v7427_v37  ;;  %v2322_v33 = vsel %vm2321_vm4, %v7337_v24, %v2320_v14  ;;  %v2327_v44 = vmul.f32 %v4732_v56, %v7346_v26 }
 0x1ee   : > { %v2392_v49 = vsub.f32 %v4157_v2, %v4165_v48  ;;  %v2399_v5 = vmul.f32 %v2391_v36, %v2391_v36  ;;  %vm2328_vm6 = vcmp.eq.f32.partialorder %v7346_v26, inf  ;;  %vm2330_vm7 = vcmp.eq.f32.partialorder %v7346_v26, 0.0  ;;  %v4170_v36 = vld [vmem:[%s5213_s20 + $0x548] sm:$0xff]  ;;  %v4179_v2 = vld [vmem:[%s5220_s18 + $0x550] sm:$0xff] }
 0x1ef   : > { %v4734_v7 = vpop.eup %4733  ;;  %v2331_v4 = vand.u32 2147483648, %v7346_v26  ;;  %v7459_v34 = vadd.f32 1e-06, %v2398_v17  ;;  %v2259_v11 = vadd.f32 %v2258_v53, %v2246_v51  ;;  %vm2335_vm8 = vcmp.eq.f32.partialorder %v7360_v45, inf  ;;  %v4171_v51 = vld [vmem:[%s5213_s20 + $0x550] sm:$0xff] }
 0x1f0   : > { %v2361_v52 = vadd.f32 %v2318_v28, %v2311_v22  ;;  %4743 = vrsqrt.f32 %v7438_v41  ;;  %v2325_v13 = vsel %vm2323_vm5, %v2324_v59, %v2322_v33  ;;  %v2393_v58 = vsub.f32 %v4158_v27, %v4166_v47  ;;  %v4172_v22 = vld [vmem:[%s5213_s20 + $0x558] sm:$0xff] }
 0x1f1   : > { %v2394_v55 = vsub.f32 %v4159_v10, %v4167_v0  ;;  %v2395_v61 = vsub.f32 %v4160_v62, %v4168_v25  ;;  %v2329_v6 = vsel %vm2328_vm6, %v7346_v26, %v2327_v44  ;;  %v2334_v9 = vmul.f32 %v4734_v7, %v7360_v45  ;;  %v4180_v28 = vld [vmem:[%s5220_s18 + $0x558] sm:$0xff]  ;;  %v4173_v7 = vld [vmem:[%s5213_s20 + $0x560] sm:$0xff] }
 0x1f2   : > { %v2400_v16 = vmul.f32 %v2392_v49, %v2392_v49  ;;  %v7467_v12 = vadd.f32 1e-06, %v2399_v5  ;;  %vm2337_vm9 = vcmp.eq.f32.partialorder %v7360_v45, 0.0  ;;  %v2338_v60 = vand.u32 2147483648, %v7360_v45 }
 0x1f3   : > { %vm2342_vm10 = vcmp.eq.f32.partialorder %v7381_v29, inf  ;;  %4745 = vrsqrt.f32 %v7459_v34  ;;  %v4736_v24 = vpop.eup %4735  ;;  %vm2344_vm11 = vcmp.eq.f32.partialorder %v7381_v29, 0.0  ;;  %v2345_v23 = vand.u32 2147483648, %v7381_v29 }
 0x1f4   : > { %vm2349_vm12 = vcmp.eq.f32.partialorder %v7387_v54, inf  ;;  %v2362_v63 = vadd.f32 %v2361_v52, %v2325_v13  ;;  %v2260_v3 = vadd.f32 %v2259_v11, %v2253_v35  ;;  %v2332_v20 = vsel %vm2330_vm7, %v2331_v4, %v2329_v6  ;;  %v4181_v4 = vld [vmem:[%s5220_s18 + $0x560] sm:$0xff] }
 0x1f5   : > { %v4738_v1 = vpop.eup %4737  ;;  %v2401_v8 = vmul.f32 %v2393_v58, %v2393_v58  ;;  %v2402_v15 = vmul.f32 %v2394_v55, %v2394_v55  ;;  %v2336_v18 = vsel %vm2335_vm8, %v7360_v45, %v2334_v9  ;;  %v2403_v30 = vmul.f32 %v2395_v61, %v2395_v61 }
 0x1f6   : > { %v7481_v40 = vadd.f32 1e-06, %v2400_v16  ;;  %4747 = vrsqrt.f32 %v7467_v12  ;;  %v2341_v26 = vmul.f32 %v4736_v24, %v7381_v29  ;;  %vm2351_vm13 = vcmp.eq.f32.partialorder %v7387_v54, 0.0 }
 0x1f7   : > { %v2352_v21 = vand.u32 2147483648, %v7387_v54  ;;  %vm2356_vm14 = vcmp.eq.f32.partialorder %v7389_v32, inf  ;;  %v2348_v19 = vmul.f32 %v4738_v1, %v7387_v54  ;;  %vm2358_vm15 = vcmp.eq.f32.partialorder %v7389_v32, 0.0 }
 0x1f8   : > { %v4740_v38 = vpop.eup %4739  ;;  %v2359_v31 = vand.u32 2147483648, %v7389_v32  ;;  %v2363_v42 = vadd.f32 %v2362_v63, %v2332_v20  ;;  %v7496_v39 = vadd.f32 %v2260_v3, %v7369_v50  ;;  %v2339_v14 = vsel %vm2337_vm9, %v2338_v60, %v2336_v18  ;;  %v4182_v63 = vld [vmem:[%s5220_s18 + $0x568] sm:$0xff]  ;;  %v4183_v18 = vld [vmem:[%s5220_s18 + $0x570] sm:$0xff] }
 0x1f9   : > { %v7500_v56 = vadd.f32 1e-06, %v2401_v8  ;;  %v2495_v48 = vsub.f32 %v4169_v57, %v4177_v46  ;;  %v7504_v35 = vadd.f32 1e-06, %v2402_v15  ;;  %v7506_v53 = vadd.f32 1e-06, %v2403_v30 }
 0x1fa   : > { %v4742_v17 = vpop.eup %4741  ;;  %vm2414_vm0 = vcmp.eq.f32.partialorder %v7427_v37, inf  ;;  %4749 = vrsqrt.f32 %v7481_v40  ;;  %v2343_v50 = vsel %vm2342_vm10, %v7381_v29, %v2341_v26  ;;  %v2355_v45 = vmul.f32 %v4740_v38, %v7389_v32  ;;  %v4175_v15 = vld [vmem:[%s5213_s20 + $0x570] sm:$0xff]  ;;  %v4176_v30 = vld [vmem:[%s5213_s20 + $0x578] sm:$0xff] }
 0x1fb   : > { %vm2416_vm1 = vcmp.eq.f32.partialorder %v7427_v37, 0.0  ;;  %v2496_v59 = vsub.f32 %v4170_v36, %v4178_v43  ;;  %v2350_v27 = vsel %vm2349_vm12, %v7387_v54, %v2348_v19  ;;  %v2364_v10 = vadd.f32 %v2363_v42, %v2339_v14  ;;  %v4184_v57 = vld [vmem:[%s5220_s18 + $0x578] sm:$0xff] }
 0x1fc   : > { %v2417_v47 = vand.u32 2147483648, %v7427_v37  ;;  %v2497_v33 = vsub.f32 %v4171_v51, %v4179_v2  ;;  %v2413_v62 = vmul.f32 %v4742_v17, %v7427_v37  ;;  %4751 = vrsqrt.f32 %v7500_v56 }
 0x1fd   : > { %v4744_v44 = vpop.eup %4743  ;;  %v2503_v0 = vmul.f32 %v2495_v48, %v2495_v48  ;;  %v2504_v25 = vmul.f32 %v2496_v59, %v2496_v59  ;;  %v2346_v49 = vsel %vm2344_vm11, %v2345_v23, %v2343_v50  ;;  %vm2421_vm2 = vcmp.eq.f32.partialorder %v7438_v41, inf  ;;  %v4174_v23 = vld [vmem:[%s5213_s20 + $0x568] sm:$0xff] }
 0x1fe   : > { %v2420_v5 = vmul.f32 %v4744_v44, %v7438_v41  ;;  %v2498_v11 = vsub.f32 %v4172_v22, %v4180_v28  ;;  %v2353_v52 = vsel %vm2351_vm13, %v2352_v21, %v2350_v27  ;;  %v2357_v13 = vsel %vm2356_vm14, %v7389_v32, %v2355_v45 }
 0x1ff   : > { %vm2423_vm3 = vcmp.eq.f32.partialorder %v7438_v41, 0.0  ;;  %v7535_v29 = vadd.f32 1e-06, %v2503_v0  ;;  %v2424_v55 = vand.u32 2147483648, %v7438_v41  ;;  %4753 = vrsqrt.f32 %v7504_v35 }
 0x200   : > { %v4746_v58 = vpop.eup %4745  ;;  %v2505_v61 = vmul.f32 %v2497_v33, %v2497_v33  ;;  %v7539_v6 = vadd.f32 1e-06, %v2504_v25  ;;  %v2365_v54 = vadd.f32 %v2364_v10, %v2346_v49  ;;  %v2415_v9 = vsel %vm2414_vm0, %v7427_v37, %v2413_v62  ;;  %v4185_v49 = vld [vmem:[%s5213_s20 + $0x580] sm:$0xff] }
 0x201   : > { %4755 = vrsqrt.f32 %v7506_v53  ;;  %v2499_v16 = vsub.f32 %v4173_v7, %v4181_v4  ;;  %v2422_v60 = vsel %vm2421_vm2, %v7438_v41, %v2420_v5  ;;  %v2427_v24 = vmul.f32 %v4746_v58, %v7459_v34  ;;  %v4193_v5 = vld [vmem:[%s5220_s18 + $0x580] sm:$0xff] }
 0x202   : > { %v2506_v1 = vmul.f32 %v2498_v11, %v2498_v11  ;;  %4757 = vrsqrt.f32 %v7535_v29  ;;  %v2360_v20 = vsel %vm2358_vm15, %v2359_v31, %v2357_v13  ;;  %vm2428_vm4 = vcmp.eq.f32.partialorder %v7459_v34, inf  ;;  %v4194_v11 = vld [vmem:[%s5220_s18 + $0x588] sm:$0xff] }
 0x203   : > { %v4748_v3 = vpop.eup %4747  ;;  %vm2430_vm5 = vcmp.eq.f32.partialorder %v7459_v34, 0.0  ;;  %v2431_v8 = vand.u32 2147483648, %v7459_v34  ;;  %vm2435_vm6 = vcmp.eq.f32.partialorder %v7467_v12, inf  ;;  %vm2437_vm7 = vcmp.eq.f32.partialorder %v7467_v12, 0.0 }
 0x204   : > { %v7563_v46 = vadd.f32 1e-06, %v2505_v61  ;;  %4759 = vrsqrt.f32 %v7539_v6  ;;  %v2366_v32 = vadd.f32 %v2365_v54, %v2353_v52  ;;  %v2418_v26 = vsel %vm2416_vm1, %v2417_v47, %v2415_v9  ;;  %v4187_v9 = vld [vmem:[%s5213_s20 + $0x590] sm:$0xff] }
 0x205   : > { %v2425_v21 = vsel %vm2423_vm3, %v2424_v55, %v2422_v60  ;;  %v2500_v38 = vsub.f32 %v4174_v23, %v4182_v63  ;;  %v2429_v19 = vsel %vm2428_vm4, %v7459_v34, %v2427_v24  ;;  %v2434_v31 = vmul.f32 %v4748_v3, %v7467_v12 }
 0x206   : > { %v2507_v42 = vmul.f32 %v2499_v16, %v2499_v16  ;;  %v7572_v36 = vadd.f32 1e-06, %v2506_v1  ;;  %v2438_v14 = vand.u32 2147483648, %v7467_v12  ;;  %vm2442_vm8 = vcmp.eq.f32.partialorder %v7481_v40, inf  ;;  %v4195_v16 = vld [vmem:[%s5220_s18 + $0x590] sm:$0xff] }
 0x207   : > { %v4750_v43 = vpop.eup %4749  ;;  %v2501_v51 = vsub.f32 %v4175_v15, %v4183_v18  ;;  %v2502_v2 = vsub.f32 %v4176_v30, %v4184_v57  ;;  %vm2444_vm9 = vcmp.eq.f32.partialorder %v7481_v40, 0.0  ;;  %v2445_v37 = vand.u32 2147483648, %v7481_v40  ;;  %v4188_v18 = vld [vmem:[%s5213_s20 + $0x598] sm:$0xff] }
 0x208   : > { %v2468_v41 = vadd.f32 %v2425_v21, %v2418_v26  ;;  %4761 = vrsqrt.f32 %v7563_v46  ;;  %v2367_v48 = vadd.f32 %v2366_v32, %v2360_v20  ;;  %v2432_v17 = vsel %vm2430_vm5, %v2431_v8, %v2429_v19  ;;  %v4196_v30 = vld [vmem:[%s5220_s18 + $0x598] sm:$0xff] }
 0x209   : > { %vm2449_vm10 = vcmp.eq.f32.partialorder %v7500_v56, inf  ;;  %v2508_v50 = vmul.f32 %v2500_v38, %v2500_v38  ;;  %v4752_v45 = vpop.eup %4751  ;;  %v2436_v22 = vsel %vm2435_vm6, %v7467_v12, %v2434_v31  ;;  %v2441_v28 = vmul.f32 %v4750_v43, %v7481_v40  ;;  %v4186_v12 = vld [vmem:[%s5213_s20 + $0x588] sm:$0xff] }
 0x20a   : > { %v7586_v59 = vadd.f32 1e-06, %v2507_v42  ;;  %4763 = vrsqrt.f32 %v7572_v36  ;;  %vm2451_vm11 = vcmp.eq.f32.partialorder %v7500_v56, 0.0  ;;  %v2452_v34 = vand.u32 2147483648, %v7500_v56 }
 0x20b   : > { %v2509_v27 = vmul.f32 %v2501_v51, %v2501_v51  ;;  %v2510_v10 = vmul.f32 %v2502_v2, %v2502_v2  ;;  %vm2456_vm12 = vcmp.eq.f32.partialorder %v7504_v35, inf  ;;  %vm2458_vm13 = vcmp.eq.f32.partialorder %v7504_v35, 0.0 }
 0x20c   : > { %v2459_v47 = vand.u32 2147483648, %v7504_v35  ;;  %v2469_v33 = vadd.f32 %v2468_v41, %v2432_v17  ;;  %v4754_v44 = vpop.eup %4753  ;;  %v7595_v62 = vadd.f32 %v2367_v48, %v7496_v39  ;;  %v2439_v0 = vsel %vm2437_vm7, %v2438_v14, %v2436_v22  ;;  %v4189_v48 = vld [vmem:[%s5213_s20 + $0x5a0] sm:$0xff] }
 0x20d   : > { %v2448_v25 = vmul.f32 %v4752_v45, %v7500_v56  ;;  %vm2463_vm14 = vcmp.eq.f32.partialorder %v7506_v53, inf  ;;  %v2443_v4 = vsel %vm2442_vm8, %v7481_v40, %v2441_v28  ;;  %vm2465_vm15 = vcmp.eq.f32.partialorder %v7506_v53, 0.0  ;;  %v4197_v17 = vld [vmem:[%s5220_s18 + $0x5a0] sm:$0xff] }
 0x20e   : > { %v4756_v7 = vpop.eup %4755  ;;  %v7607_v39 = vadd.f32 1e-06, %v2508_v50  ;;  %4765 = vrsqrt.f32 %v7586_v59  ;;  %v2466_v13 = vand.u32 2147483648, %v7506_v53  ;;  %v7613_v58 = vadd.f32 1e-06, %v2509_v27 }
 0x20f   : > { %v4758_v52 = vpop.eup %4757  ;;  %v7615_v55 = vadd.f32 1e-06, %v2510_v10  ;;  %vm2521_vm0 = vcmp.eq.f32.partialorder %v7535_v29, inf  ;;  %v2455_v61 = vmul.f32 %v4754_v44, %v7504_v35  ;;  %v2470_v54 = vadd.f32 %v2469_v33, %v2439_v0  ;;  %v4190_v10 = vld [vmem:[%s5213_s20 + $0x5a8] sm:$0xff]  ;;  %v4192_v0 = vld [vmem:[%s5213_s20 + $0x5b8] sm:$0xff] }
 0x210   : > { %vm2523_vm1 = vcmp.eq.f32.partialorder %v7535_v29, 0.0  ;;  %v2602_v60 = vsub.f32 %v4185_v49, %v4193_v5  ;;  %v2446_v23 = vsel %vm2444_vm9, %v2445_v37, %v2443_v4  ;;  %v2450_v63 = vsel %vm2449_vm10, %v7500_v56, %v2448_v25  ;;  %v4198_v33 = vld [vmem:[%s5220_s18 + $0x5a8] sm:$0xff]  ;;  %v4199_v25 = vld [vmem:[%s5220_s18 + $0x5b0] sm:$0xff] }
 0x211   : > { %v4760_v24 = vpop.eup %4759  ;;  %v2462_v1 = vmul.f32 %v4756_v7, %v7506_v53  ;;  %v2603_v3 = vsub.f32 %v4186_v12, %v4194_v11  ;;  %v2520_v20 = vmul.f32 %v4758_v52, %v7535_v29  ;;  %v2524_v8 = vand.u32 2147483648, %v7535_v29 }
 0x212   : > { %v2527_v15 = vmul.f32 %v4760_v24, %v7539_v6  ;;  %4767 = vrsqrt.f32 %v7607_v39  ;;  %vm2528_vm2 = vcmp.eq.f32.partialorder %v7539_v6, inf  ;;  %vm2530_vm3 = vcmp.eq.f32.partialorder %v7539_v6, 0.0 }
 0x213   : > { %v2604_v40 = vsub.f32 %v4187_v9, %v4195_v16  ;;  %v2610_v57 = vmul.f32 %v2602_v60, %v2602_v60  ;;  %v2453_v32 = vsel %vm2451_vm11, %v2452_v34, %v2450_v63  ;;  %v2457_v26 = vsel %vm2456_vm12, %v7504_v35, %v2455_v61 }
 0x214   : > { %v2471_v21 = vadd.f32 %v2470_v54, %v2446_v23  ;;  %v2611_v38 = vmul.f32 %v2603_v3, %v2603_v3  ;;  %v2464_v31 = vsel %vm2463_vm14, %v7506_v53, %v2462_v1  ;;  %v2531_v42 = vand.u32 2147483648, %v7539_v6 }
 0x215   : > { %v4762_v19 = vpop.eup %4761  ;;  %4769 = vrsqrt.f32 %v7613_v58  ;;  %v2605_v43 = vsub.f32 %v4188_v18, %v4196_v30  ;;  %v2522_v56 = vsel %vm2521_vm0, %v7535_v29, %v2520_v20  ;;  %v2529_v14 = vsel %vm2528_vm2, %v7539_v6, %v2527_v15  ;;  %v4200_v29 = vld [vmem:[%s5220_s18 + $0x5b8] sm:$0xff] }
 0x216   : > { %v2534_v51 = vmul.f32 %v4762_v19, %v7563_v46  ;;  %v7651_v2 = vadd.f32 1e-06, %v2610_v57  ;;  %v2460_v41 = vsel %vm2458_vm13, %v2459_v47, %v2457_v26  ;;  %vm2535_vm4 = vcmp.eq.f32.partialorder %v7563_v46, inf  ;;  %v4191_v47 = vld [vmem:[%s5213_s20 + $0x5b0] sm:$0xff]  ;;  %v4201_v26 = vld [vmem:[%s5213_s20 + $0x5c0] sm:$0xff] }
 0x217   : > { %v4764_v37 = vpop.eup %4763  ;;  %4771 = vrsqrt.f32 %v7615_v55  ;;  %v2612_v50 = vmul.f32 %v2604_v40, %v2604_v40  ;;  %v2467_v45 = vsel %vm2465_vm15, %v2466_v13, %v2464_v31  ;;  %v2472_v22 = vadd.f32 %v2471_v21, %v2453_v32 }
 0x218   : > { %vm2537_vm5 = vcmp.eq.f32.partialorder %v7563_v46, 0.0  ;;  %v7662_v28 = vadd.f32 1e-06, %v2611_v38  ;;  %v2525_v35 = vsel %vm2523_vm1, %v2524_v8, %v2522_v56  ;;  %v2532_v34 = vsel %vm2530_vm3, %v2531_v42, %v2529_v14  ;;  %v4210_v56 = vld [vmem:[%s5220_s18 + $0x5c8] sm:$0xff] }
 0x219   : > { %v2538_v27 = vand.u32 2147483648, %v7563_v46  ;;  %4773 = vrsqrt.f32 %v7651_v2  ;;  %v2536_v53 = vsel %vm2535_vm4, %v7563_v46, %v2534_v51  ;;  %v2541_v44 = vmul.f32 %v4764_v37, %v7572_v36 }
 0x21a   : > { %v2606_v49 = vsub.f32 %v4189_v48, %v4197_v17  ;;  %v2613_v5 = vmul.f32 %v2605_v43, %v2605_v43  ;;  %vm2542_vm6 = vcmp.eq.f32.partialorder %v7572_v36, inf  ;;  %vm2544_vm7 = vcmp.eq.f32.partialorder %v7572_v36, 0.0  ;;  %v4202_v43 = vld [vmem:[%s5213_s20 + $0x5c8] sm:$0xff]  ;;  %v4211_v48 = vld [vmem:[%s5220_s18 + $0x5d0] sm:$0xff] }
 0x21b   : > { %v4766_v6 = vpop.eup %4765  ;;  %v2545_v7 = vand.u32 2147483648, %v7572_v36  ;;  %v7683_v4 = vadd.f32 1e-06, %v2612_v50  ;;  %v2473_v12 = vadd.f32 %v2472_v22, %v2460_v41  ;;  %vm2549_vm8 = vcmp.eq.f32.partialorder %v7586_v59, inf  ;;  %v4203_v41 = vld [vmem:[%s5213_s20 + $0x5d0] sm:$0xff] }
 0x21c   : > { %v2575_v11 = vadd.f32 %v2532_v34, %v2525_v35  ;;  %4775 = vrsqrt.f32 %v7662_v28  ;;  %v2539_v52 = vsel %vm2537_vm5, %v2538_v27, %v2536_v53  ;;  %v2607_v13 = vsub.f32 %v4190_v10, %v4198_v33  ;;  %v4204_v35 = vld [vmem:[%s5213_s20 + $0x5d8] sm:$0xff] }
 0x21d   : > { %v2608_v61 = vsub.f32 %v4191_v47, %v4199_v25  ;;  %v2609_v54 = vsub.f32 %v4192_v0, %v4200_v29  ;;  %v2543_v9 = vsel %vm2542_vm6, %v7572_v36, %v2541_v44  ;;  %v2548_v16 = vmul.f32 %v4766_v6, %v7586_v59  ;;  %v4209_v36 = vld [vmem:[%s5220_s18 + $0x5c0] sm:$0xff]  ;;  %v4212_v34 = vld [vmem:[%s5220_s18 + $0x5d8] sm:$0xff] }
 0x21e   : > { %v2614_v60 = vmul.f32 %v2606_v49, %v2606_v49  ;;  %v7691_v24 = vadd.f32 1e-06, %v2613_v5  ;;  %vm2551_vm9 = vcmp.eq.f32.partialorder %v7586_v59, 0.0  ;;  %v2552_v63 = vand.u32 2147483648, %v7586_v59  ;;  %v4205_v6 = vld [vmem:[%s5213_s20 + $0x5e0] sm:$0xff] }
 0x21f   : > { %v4768_v23 = vpop.eup %4767  ;;  %vm2556_vm10 = vcmp.eq.f32.partialorder %v7607_v39, inf  ;;  %4777 = vrsqrt.f32 %v7683_v4  ;;  %v2474_v46 = vadd.f32 %v2473_v12, %v2467_v45  ;;  %vm2558_vm11 = vcmp.eq.f32.partialorder %v7607_v39, 0.0 }
 0x220   : > { %v2559_v1 = vand.u32 2147483648, %v7607_v39  ;;  %v2576_v3 = vadd.f32 %v2575_v11, %v2539_v52  ;;  %v2546_v20 = vsel %vm2544_vm7, %v2545_v7, %v2543_v9  ;;  %v2615_v8 = vmul.f32 %v2607_v13, %v2607_v13  ;;  %v4213_v7 = vld [vmem:[%s5220_s18 + $0x5e0] sm:$0xff] }
 0x221   : > { %v2616_v15 = vmul.f32 %v2608_v61, %v2608_v61  ;;  %v2617_v18 = vmul.f32 %v2609_v54, %v2609_v54  ;;  %v2550_v40 = vsel %vm2549_vm8, %v7586_v59, %v2548_v16  ;;  %v2555_v57 = vmul.f32 %v4768_v23, %v7607_v39 }
 0x222   : > { %v4770_v30 = vpop.eup %4769  ;;  %v7705_v32 = vadd.f32 1e-06, %v2614_v60  ;;  %4779 = vrsqrt.f32 %v7691_v24  ;;  %vm2563_vm12 = vcmp.eq.f32.partialorder %v7613_v58, inf  ;;  %vm2565_vm13 = vcmp.eq.f32.partialorder %v7613_v58, 0.0 }
 0x223   : > { %v2566_v21 = vand.u32 2147483648, %v7613_v58  ;;  %vm2570_vm14 = vcmp.eq.f32.partialorder %v7615_v55, inf  ;;  %v7715_v19 = vadd.f32 %v2474_v46, %v7595_v62  ;;  %vm2572_vm15 = vcmp.eq.f32.partialorder %v7615_v55, 0.0 }
 0x224   : > { %v4772_v38 = vpop.eup %4771  ;;  %v2573_v31 = vand.u32 2147483648, %v7615_v55  ;;  %v2577_v42 = vadd.f32 %v2576_v3, %v2546_v20  ;;  %v2553_v14 = vsel %vm2551_vm9, %v2552_v63, %v2550_v40  ;;  %v7723_v51 = vadd.f32 1e-06, %v2615_v8  ;;  %v4208_v40 = vld [vmem:[%s5213_s20 + $0x5f8] sm:$0xff] }
 0x225   : > { %v7725_v37 = vadd.f32 1e-06, %v2616_v15  ;;  %v2709_v62 = vsub.f32 %v4201_v26, %v4209_v36  ;;  %v2557_v50 = vsel %vm2556_vm10, %v7607_v39, %v2555_v57  ;;  %v2562_v45 = vmul.f32 %v4770_v30, %v7613_v58  ;;  %v4215_v57 = vld [vmem:[%s5220_s18 + $0x5f0] sm:$0xff]  ;;  %v4216_v26 = vld [vmem:[%s5220_s18 + $0x5f8] sm:$0xff] }
 0x226   : > { %v4774_v17 = vpop.eup %4773  ;;  %v7733_v22 = vadd.f32 1e-06, %v2617_v18  ;;  %4781 = vrsqrt.f32 %v7705_v32  ;;  %v2569_v59 = vmul.f32 %v4772_v38, %v7615_v55  ;;  %vm2628_vm0 = vcmp.eq.f32.partialorder %v7651_v2, inf  ;;  %v4207_v18 = vld [vmem:[%s5213_s20 + $0x5f0] sm:$0xff] }
 0x227   : > { %vm2630_vm1 = vcmp.eq.f32.partialorder %v7651_v2, 0.0  ;;  %v2710_v27 = vsub.f32 %v4202_v43, %v4210_v56  ;;  %v2578_v10 = vadd.f32 %v2577_v42, %v2553_v14  ;;  %v2631_v47 = vand.u32 2147483648, %v7651_v2 }
 0x228   : > { %vm2635_vm2 = vcmp.eq.f32.partialorder %v7662_v28, inf  ;;  %v2711_v33 = vsub.f32 %v4203_v41, %v4211_v48  ;;  %v2560_v44 = vsel %vm2558_vm11, %v2559_v1, %v2557_v50  ;;  %v2627_v0 = vmul.f32 %v4774_v17, %v7651_v2  ;;  %v4206_v1 = vld [vmem:[%s5213_s20 + $0x5e8] sm:$0xff] }
 0x229   : > { %v4776_v53 = vpop.eup %4775  ;;  %v2717_v25 = vmul.f32 %v2709_v62, %v2709_v62  ;;  %v2718_v29 = vmul.f32 %v2710_v27, %v2710_v27  ;;  %v2564_v49 = vsel %vm2563_vm12, %v7613_v58, %v2562_v45  ;;  %4783 = vrsqrt.f32 %v7723_v51  ;;  %v4214_v58 = vld [vmem:[%s5220_s18 + $0x5e8] sm:$0xff] }
 0x22a   : > { %v2634_v5 = vmul.f32 %v4776_v53, %v7662_v28  ;;  %v2712_v12 = vsub.f32 %v4204_v35, %v4212_v34  ;;  %v2571_v39 = vsel %vm2570_vm14, %v7615_v55, %v2569_v59  ;;  %vm2637_vm3 = vcmp.eq.f32.partialorder %v7662_v28, 0.0 }
 0x22b   : > { %4785 = vrsqrt.f32 %v7725_v37  ;;  %v7758_v11 = vadd.f32 1e-06, %v2717_v25  ;;  %v2579_v13 = vadd.f32 %v2578_v10, %v2560_v44  ;;  %v2719_v61 = vmul.f32 %v2711_v33, %v2711_v33 }
 0x22c   : > { %v4778_v52 = vpop.eup %4777  ;;  %4787 = vrsqrt.f32 %v7733_v22  ;;  %v7761_v54 = vadd.f32 1e-06, %v2718_v29  ;;  %v2567_v9 = vsel %vm2565_vm13, %v2566_v21, %v2564_v49  ;;  %v2629_v16 = vsel %vm2628_vm0, %v7651_v2, %v2627_v0 }
 0x22d   : > { %v2638_v60 = vand.u32 2147483648, %v7662_v28  ;;  %v2713_v23 = vsub.f32 %v4205_v6, %v4213_v7  ;;  %v2636_v63 = vsel %vm2635_vm2, %v7662_v28, %v2634_v5  ;;  %v2641_v46 = vmul.f32 %v4778_v52, %v7683_v4  ;;  %v4217_v5 = vld [vmem:[%s5213_s20 + $0x600] sm:$0xff] }
 0x22e   : > { %v2720_v3 = vmul.f32 %v2712_v12, %v2712_v12  ;;  %4789 = vrsqrt.f32 %v7758_v11  ;;  %v2574_v8 = vsel %vm2572_vm15, %v2573_v31, %v2571_v39  ;;  %vm2642_vm4 = vcmp.eq.f32.partialorder %v7683_v4, inf  ;;  %v4226_v39 = vld [vmem:[%s5220_s18 + $0x608] sm:$0xff] }
 0x22f   : > { %v4780_v20 = vpop.eup %4779  ;;  %vm2644_vm5 = vcmp.eq.f32.partialorder %v7683_v4, 0.0  ;;  %v2645_v15 = vand.u32 2147483648, %v7683_v4  ;;  %v2580_v30 = vadd.f32 %v2579_v13, %v2567_v9  ;;  %vm2649_vm6 = vcmp.eq.f32.partialorder %v7691_v24, inf }
 0x230   : > { %v7786_v36 = vadd.f32 1e-06, %v2719_v61  ;;  %4791 = vrsqrt.f32 %v7761_v54  ;;  %v2632_v55 = vsel %vm2630_vm1, %v2631_v47, %v2629_v16  ;;  %v2639_v21 = vsel %vm2637_vm3, %v2638_v60, %v2636_v63  ;;  %v4227_v63 = vld [vmem:[%s5220_s18 + $0x610] sm:$0xff] }
 0x231   : > { %vm2651_vm7 = vcmp.eq.f32.partialorder %v7691_v24, 0.0  ;;  %v2714_v38 = vsub.f32 %v4206_v1, %v4214_v58  ;;  %v2643_v31 = vsel %vm2642_vm4, %v7683_v4, %v2641_v46  ;;  %v2648_v42 = vmul.f32 %v4780_v20, %v7691_v24 }
 0x232   : > { %v2721_v43 = vmul.f32 %v2713_v23, %v2713_v23  ;;  %v7796_v56 = vadd.f32 1e-06, %v2720_v3  ;;  %v2652_v41 = vand.u32 2147483648, %v7691_v24  ;;  %vm2656_vm8 = vcmp.eq.f32.partialorder %v7705_v32, inf  ;;  %v4219_v23 = vld [vmem:[%s5213_s20 + $0x610] sm:$0xff] }
 0x233   : > { %v4782_v14 = vpop.eup %4781  ;;  %v2715_v2 = vsub.f32 %v4207_v18, %v4215_v57  ;;  %v2716_v48 = vsub.f32 %v4208_v40, %v4216_v26  ;;  %v2581_v62 = vadd.f32 %v2580_v30, %v2574_v8  ;;  %vm2658_vm9 = vcmp.eq.f32.partialorder %v7705_v32, 0.0  ;;  %v4220_v30 = vld [vmem:[%s5213_s20 + $0x618] sm:$0xff] }
 0x234   : > { %v2682_v28 = vadd.f32 %v2639_v21, %v2632_v55  ;;  %4793 = vrsqrt.f32 %v7786_v36  ;;  %v2646_v17 = vsel %vm2644_vm5, %v2645_v15, %v2643_v31  ;;  %v2659_v50 = vand.u32 2147483648, %v7705_v32  ;;  %v4228_v40 = vld [vmem:[%s5220_s18 + $0x618] sm:$0xff] }
 0x235   : > { %vm2663_vm10 = vcmp.eq.f32.partialorder %v7723_v51, inf  ;;  %v2722_v45 = vmul.f32 %v2714_v38, %v2714_v38  ;;  %v2650_v59 = vsel %vm2649_vm6, %v7691_v24, %v2648_v42  ;;  %v2655_v35 = vmul.f32 %v4782_v14, %v7705_v32  ;;  %v4218_v24 = vld [vmem:[%s5213_s20 + $0x608] sm:$0xff] }
 0x236   : > { %vm2665_vm11 = vcmp.eq.f32.partialorder %v7723_v51, 0.0  ;;  %v7811_v34 = vadd.f32 1e-06, %v2721_v43  ;;  %4795 = vrsqrt.f32 %v7796_v56  ;;  %v4784_v4 = vpop.eup %4783  ;;  %v2666_v27 = vand.u32 2147483648, %v7723_v51 }
 0x237   : > { %vm2670_vm12 = vcmp.eq.f32.partialorder %v7725_v37, inf  ;;  %v2723_v10 = vmul.f32 %v2715_v2, %v2715_v2  ;;  %v2724_v47 = vmul.f32 %v2716_v48, %v2716_v48  ;;  %v7817_v53 = vadd.f32 %v2581_v62, %v7715_v19  ;;  %v4225_v19 = vld [vmem:[%s5220_s18 + $0x600] sm:$0xff] }
 0x238   : > { %v4786_v33 = vpop.eup %4785  ;;  %vm2672_vm13 = vcmp.eq.f32.partialorder %v7725_v37, 0.0  ;;  %v2673_v44 = vand.u32 2147483648, %v7725_v37  ;;  %v2683_v0 = vadd.f32 %v2682_v28, %v2646_v17  ;;  %v2653_v29 = vsel %vm2651_vm7, %v2652_v41, %v2650_v59 }
 0x239   : > { %v4788_v25 = vpop.eup %4787  ;;  %vm2677_vm14 = vcmp.eq.f32.partialorder %v7733_v22, inf  ;;  %vm2679_vm15 = vcmp.eq.f32.partialorder %v7733_v22, 0.0  ;;  %v7825_v49 = vadd.f32 1e-06, %v2722_v45  ;;  %v2657_v6 = vsel %vm2656_vm8, %v7705_v32, %v2655_v35  ;;  %v4229_v45 = vld [vmem:[%s5220_s18 + $0x620] sm:$0xff] }
 0x23a   : > { %v2662_v7 = vmul.f32 %v4784_v4, %v7723_v51  ;;  %v2680_v12 = vand.u32 2147483648, %v7733_v22  ;;  %4797 = vrsqrt.f32 %v7811_v34  ;;  %v2669_v13 = vmul.f32 %v4786_v33, %v7725_v37  ;;  %v4230_v33 = vld [vmem:[%s5220_s18 + $0x628] sm:$0xff] }
 0x23b   : > { %v4790_v52 = vpop.eup %4789  ;;  %v7838_v61 = vadd.f32 1e-06, %v2723_v10  ;;  %v7840_v9 = vadd.f32 1e-06, %v2724_v47  ;;  %vm2735_vm0 = vcmp.eq.f32.partialorder %v7758_v11, inf  ;;  %v2676_v16 = vmul.f32 %v4788_v25, %v7733_v22  ;;  %v4222_v10 = vld [vmem:[%s5213_s20 + $0x628] sm:$0xff] }
 0x23c   : > { %v2684_v60 = vadd.f32 %v2683_v0, %v2653_v29  ;;  %vm2737_vm1 = vcmp.eq.f32.partialorder %v7758_v11, 0.0  ;;  %v2816_v46 = vsub.f32 %v4217_v5, %v4225_v19  ;;  %v2660_v58 = vsel %vm2658_vm9, %v2659_v50, %v2657_v6  ;;  %v4221_v50 = vld [vmem:[%s5213_s20 + $0x620] sm:$0xff]  ;;  %v4223_v47 = vld [vmem:[%s5213_s20 + $0x630] sm:$0xff]  ;;  %v4224_v25 = vld [vmem:[%s5213_s20 + $0x638] sm:$0xff] }
 0x23d   : > { %v4792_v1 = vpop.eup %4791  ;;  %v2738_v3 = vand.u32 2147483648, %v7758_v11  ;;  %4799 = vrsqrt.f32 %v7825_v49  ;;  %v2817_v20 = vsub.f32 %v4218_v24, %v4226_v39  ;;  %v2664_v8 = vsel %vm2663_vm10, %v7723_v51, %v2662_v7  ;;  %v4231_v29 = vld [vmem:[%s5220_s18 + $0x630] sm:$0xff]  ;;  %v4232_v5 = vld [vmem:[%s5220_s18 + $0x638] sm:$0xff] }
 0x23e   : > { %v2734_v15 = vmul.f32 %v4790_v52, %v7758_v11  ;;  %v2741_v18 = vmul.f32 %v4792_v1, %v7761_v54  ;;  %vm2742_vm2 = vcmp.eq.f32.partialorder %v7761_v54, inf  ;;  %v2671_v32 = vsel %vm2670_vm12, %v7725_v37, %v2669_v13 }
 0x23f   : > { %vm2744_vm3 = vcmp.eq.f32.partialorder %v7761_v54, 0.0  ;;  %v2818_v57 = vsub.f32 %v4219_v23, %v4227_v63  ;;  %v2824_v26 = vmul.f32 %v2816_v46, %v2816_v46  ;;  %v2678_v55 = vsel %vm2677_vm14, %v7733_v22, %v2676_v16 }
 0x240   : > { %v2685_v21 = vadd.f32 %v2684_v60, %v2660_v58  ;;  %4801 = vrsqrt.f32 %v7838_v61  ;;  %v2825_v38 = vmul.f32 %v2817_v20, %v2817_v20  ;;  %v2667_v42 = vsel %vm2665_vm11, %v2666_v27, %v2664_v8 }
 0x241   : > { %v4794_v31 = vpop.eup %4793  ;;  %v2745_v43 = vand.u32 2147483648, %v7761_v54  ;;  %4803 = vrsqrt.f32 %v7840_v9  ;;  %v2819_v14 = vsub.f32 %v4220_v30, %v4228_v40  ;;  %v2736_v41 = vsel %vm2735_vm0, %v7758_v11, %v2734_v15 }
 0x242   : > { %v2743_v2 = vsel %vm2742_vm2, %v7761_v54, %v2741_v18  ;;  %v2748_v48 = vmul.f32 %v4794_v31, %v7786_v36  ;;  %v7878_v62 = vadd.f32 1e-06, %v2824_v26  ;;  %v2674_v28 = vsel %vm2672_vm13, %v2673_v44, %v2671_v32 }
 0x243   : > { %v4796_v51 = vpop.eup %4795  ;;  %v2681_v17 = vsel %vm2679_vm15, %v2680_v12, %v2678_v55  ;;  %vm2749_vm4 = vcmp.eq.f32.partialorder %v7786_v36, inf  ;;  %v2826_v59 = vmul.f32 %v2818_v57, %v2818_v57  ;;  %v2686_v35 = vadd.f32 %v2685_v21, %v2667_v42  ;;  %v4233_v21 = vld [vmem:[%s5213_s20 + $0x640] sm:$0xff] }
 0x244   : > { %vm2751_vm5 = vcmp.eq.f32.partialorder %v7786_v36, 0.0  ;;  %v2752_v4 = vand.u32 2147483648, %v7786_v36  ;;  %v7889_v27 = vadd.f32 1e-06, %v2825_v38  ;;  %v2739_v37 = vsel %vm2737_vm1, %v2738_v3, %v2736_v41  ;;  %v4234_v41 = vld [vmem:[%s5213_s20 + $0x648] sm:$0xff] }
 0x245   : > { %v2746_v22 = vsel %vm2744_vm3, %v2745_v43, %v2743_v2  ;;  %vm2756_vm6 = vcmp.eq.f32.partialorder %v7796_v56, inf  ;;  %4805 = vrsqrt.f32 %v7878_v62  ;;  %v2750_v44 = vsel %vm2749_vm4, %v7786_v36, %v2748_v48  ;;  %v4242_v2 = vld [vmem:[%s5220_s18 + $0x648] sm:$0xff] }
 0x246   : > { %v2755_v0 = vmul.f32 %v4796_v51, %v7796_v56  ;;  %v2820_v19 = vsub.f32 %v4221_v50, %v4229_v45  ;;  %v2827_v11 = vmul.f32 %v2819_v14, %v2819_v14  ;;  %vm2758_vm7 = vcmp.eq.f32.partialorder %v7796_v56, 0.0 }
 0x247   : > { %v4798_v6 = vpop.eup %4797  ;;  %v2759_v54 = vand.u32 2147483648, %v7796_v56  ;;  %vm2763_vm8 = vcmp.eq.f32.partialorder %v7811_v34, inf  ;;  %v7908_v7 = vadd.f32 1e-06, %v2826_v59  ;;  %v2687_v12 = vadd.f32 %v2686_v35, %v2674_v28 }
 0x248   : > { %vm2765_vm9 = vcmp.eq.f32.partialorder %v7811_v34, 0.0  ;;  %v2789_v24 = vadd.f32 %v2746_v22, %v2739_v37  ;;  %4807 = vrsqrt.f32 %v7889_v27  ;;  %v2753_v39 = vsel %vm2751_vm5, %v2752_v4, %v2750_v44  ;;  %v4236_v37 = vld [vmem:[%s5213_s20 + $0x658] sm:$0xff] }
 0x249   : > { %v2821_v52 = vsub.f32 %v4222_v10, %v4230_v33  ;;  %v2822_v13 = vsub.f32 %v4223_v47, %v4231_v29  ;;  %v2823_v16 = vsub.f32 %v4224_v25, %v4232_v5  ;;  %v2757_v23 = vsel %vm2756_vm6, %v7796_v56, %v2755_v0  ;;  %v4241_v56 = vld [vmem:[%s5220_s18 + $0x640] sm:$0xff]  ;;  %v4244_v22 = vld [vmem:[%s5220_s18 + $0x658] sm:$0xff] }
 0x24a   : > { %v4800_v60 = vpop.eup %4799  ;;  %v2762_v63 = vmul.f32 %v4798_v6, %v7811_v34  ;;  %v2828_v46 = vmul.f32 %v2820_v19, %v2820_v19  ;;  %v7918_v1 = vadd.f32 1e-06, %v2827_v11  ;;  %v2766_v58 = vand.u32 2147483648, %v7811_v34  ;;  %v4237_v6 = vld [vmem:[%s5213_s20 + $0x660] sm:$0xff] }
 0x24b   : > { %vm2770_vm10 = vcmp.eq.f32.partialorder %v7825_v49, inf  ;;  %vm2772_vm11 = vcmp.eq.f32.partialorder %v7825_v49, 0.0  ;;  %4809 = vrsqrt.f32 %v7908_v7  ;;  %v2688_v36 = vadd.f32 %v2687_v12, %v2681_v17  ;;  %v4243_v17 = vld [vmem:[%s5220_s18 + $0x650] sm:$0xff] }
 0x24c   : > { %v2773_v3 = vand.u32 2147483648, %v7825_v49  ;;  %vm2777_vm12 = vcmp.eq.f32.partialorder %v7838_v61, inf  ;;  %v2790_v20 = vadd.f32 %v2789_v24, %v2753_v39  ;;  %v2760_v15 = vsel %vm2758_vm7, %v2759_v54, %v2757_v23  ;;  %v4245_v54 = vld [vmem:[%s5220_s18 + $0x660] sm:$0xff] }
 0x24d   : > { %v4802_v8 = vpop.eup %4801  ;;  %v2769_v18 = vmul.f32 %v4800_v60, %v7825_v49  ;;  %v2829_v30 = vmul.f32 %v2821_v52, %v2821_v52  ;;  %v2830_v40 = vmul.f32 %v2822_v13, %v2822_v13  ;;  %v2764_v57 = vsel %vm2763_vm8, %v7811_v34, %v2762_v63 }
 0x24e   : > { %v4804_v32 = vpop.eup %4803  ;;  %v2831_v26 = vmul.f32 %v2823_v16, %v2823_v16  ;;  %v7932_v55 = vadd.f32 1e-06, %v2828_v46  ;;  %4811 = vrsqrt.f32 %v7918_v1  ;;  %vm2779_vm13 = vcmp.eq.f32.partialorder %v7838_v61, 0.0 }
 0x24f   : > { %v2780_v38 = vand.u32 2147483648, %v7838_v61  ;;  %vm2784_vm14 = vcmp.eq.f32.partialorder %v7840_v9, inf  ;;  %vm2786_vm15 = vcmp.eq.f32.partialorder %v7840_v9, 0.0  ;;  %v7942_v31 = vadd.f32 %v2688_v36, %v7817_v53  ;;  %v4235_v53 = vld [vmem:[%s5213_s20 + $0x650] sm:$0xff] }
 0x250   : > { %v2776_v42 = vmul.f32 %v4802_v8, %v7838_v61  ;;  %v2787_v43 = vand.u32 2147483648, %v7840_v9  ;;  %v2791_v14 = vadd.f32 %v2790_v20, %v2760_v15  ;;  %v2767_v48 = vsel %vm2765_vm9, %v2766_v58, %v2764_v57  ;;  %v4246_v20 = vld [vmem:[%s5220_s18 + $0x668] sm:$0xff]  ;;  %v4248_v57 = vld [vmem:[%s5220_s18 + $0x678] sm:$0xff] }
 0x251   : > { %v2771_v51 = vsel %vm2770_vm10, %v7825_v49, %v2769_v18  ;;  %v7953_v28 = vadd.f32 1e-06, %v2829_v30  ;;  %v2923_v50 = vsub.f32 %v4233_v21, %v4241_v56  ;;  %v2783_v59 = vmul.f32 %v4804_v32, %v7840_v9  ;;  %v4239_v18 = vld [vmem:[%s5213_s20 + $0x670] sm:$0xff] }
 0x252   : > { %v4806_v45 = vpop.eup %4805  ;;  %v7958_v35 = vadd.f32 1e-06, %v2830_v40  ;;  %v7960_v4 = vadd.f32 1e-06, %v2831_v26  ;;  %4813 = vrsqrt.f32 %v7932_v55  ;;  %vm2842_vm0 = vcmp.eq.f32.partialorder %v7878_v62, inf  ;;  %v4240_v40 = vld [vmem:[%s5213_s20 + $0x678] sm:$0xff] }
 0x253   : > { %vm2844_vm1 = vcmp.eq.f32.partialorder %v7878_v62, 0.0  ;;  %v2845_v34 = vand.u32 2147483648, %v7878_v62  ;;  %v2924_v10 = vsub.f32 %v4234_v41, %v4242_v2  ;;  %v2774_v47 = vsel %vm2772_vm11, %v2773_v3, %v2771_v51  ;;  %v4238_v3 = vld [vmem:[%s5213_s20 + $0x668] sm:$0xff]  ;;  %v4247_v32 = vld [vmem:[%s5220_s18 + $0x670] sm:$0xff] }
 0x254   : > { %v2778_v33 = vsel %vm2777_vm12, %v7838_v61, %v2776_v42  ;;  %v2792_v44 = vadd.f32 %v2791_v14, %v2767_v48  ;;  %v2925_v0 = vsub.f32 %v4235_v53, %v4243_v17  ;;  %v2841_v29 = vmul.f32 %v4806_v45, %v7878_v62 }
 0x255   : > { %v4808_v25 = vpop.eup %4807  ;;  %4815 = vrsqrt.f32 %v7953_v28  ;;  %v2931_v5 = vmul.f32 %v2923_v50, %v2923_v50  ;;  %v2932_v19 = vmul.f32 %v2924_v10, %v2924_v10  ;;  %v2785_v11 = vsel %vm2784_vm14, %v7840_v9, %v2783_v59 }
 0x256   : > { %v2848_v49 = vmul.f32 %v4808_v25, %v7889_v27  ;;  %4817 = vrsqrt.f32 %v7958_v35  ;;  %v2926_v12 = vsub.f32 %v4236_v37, %v4244_v22  ;;  %v2781_v24 = vsel %vm2779_vm13, %v2780_v38, %v2778_v33 }
 0x257   : > { %vm2849_vm2 = vcmp.eq.f32.partialorder %v7889_v27, inf  ;;  %vm2851_vm3 = vcmp.eq.f32.partialorder %v7889_v27, 0.0  ;;  %v7986_v39 = vadd.f32 1e-06, %v2931_v5  ;;  %v2793_v13 = vadd.f32 %v2792_v44, %v2774_v47 }
 0x258   : > { %v4810_v52 = vpop.eup %4809  ;;  %4819 = vrsqrt.f32 %v7960_v4  ;;  %v2933_v16 = vmul.f32 %v2925_v0, %v2925_v0  ;;  %v7989_v60 = vadd.f32 1e-06, %v2932_v19  ;;  %v2788_v61 = vsel %vm2786_vm15, %v2787_v43, %v2785_v11  ;;  %v4249_v11 = vld [vmem:[%s5213_s20 + $0x680] sm:$0xff] }
 0x259   : > { %v2843_v23 = vsel %vm2842_vm0, %v7878_v62, %v2841_v29  ;;  %v2852_v63 = vand.u32 2147483648, %v7889_v27  ;;  %v2927_v46 = vsub.f32 %v4237_v6, %v4245_v54  ;;  %v2850_v58 = vsel %vm2849_vm2, %v7889_v27, %v2848_v49 }
 0x25a   : > { %v2855_v36 = vmul.f32 %v4810_v52, %v7908_v7  ;;  %v2934_v8 = vmul.f32 %v2926_v12, %v2926_v12  ;;  %4821 = vrsqrt.f32 %v7986_v39  ;;  %vm2856_vm4 = vcmp.eq.f32.partialorder %v7908_v7, inf  ;;  %v4258_v12 = vld [vmem:[%s5220_s18 + $0x688] sm:$0xff] }
 0x25b   : > { %v4812_v9 = vpop.eup %4811  ;;  %vm2858_vm5 = vcmp.eq.f32.partialorder %v7908_v7, 0.0  ;;  %v2859_v15 = vand.u32 2147483648, %v7908_v7  ;;  %vm2863_vm6 = vcmp.eq.f32.partialorder %v7918_v1, inf  ;;  %v2794_v30 = vadd.f32 %v2793_v13, %v2781_v24 }
 0x25c   : > { %vm2865_vm7 = vcmp.eq.f32.partialorder %v7918_v1, 0.0  ;;  %v8011_v26 = vadd.f32 1e-06, %v2933_v16  ;;  %4823 = vrsqrt.f32 %v7989_v60  ;;  %v2846_v21 = vsel %vm2844_vm1, %v2845_v34, %v2843_v23 }
 0x25d   : > { %v2853_v56 = vsel %vm2851_vm3, %v2852_v63, %v2850_v58  ;;  %v2866_v38 = vand.u32 2147483648, %v7918_v1  ;;  %v2928_v42 = vsub.f32 %v4238_v3, %v4246_v20  ;;  %v2857_v43 = vsel %vm2856_vm4, %v7908_v7, %v2855_v36  ;;  %v4251_v63 = vld [vmem:[%s5213_s20 + $0x690] sm:$0xff] }
 0x25e   : > { %v2862_v14 = vmul.f32 %v4812_v9, %v7918_v1  ;;  %v2935_v41 = vmul.f32 %v2927_v46, %v2927_v46  ;;  %v8023_v2 = vadd.f32 1e-06, %v2934_v8  ;;  %vm2870_vm8 = vcmp.eq.f32.partialorder %v7932_v55, inf  ;;  %v4259_v46 = vld [vmem:[%s5220_s18 + $0x690] sm:$0xff] }
 0x25f   : > { %v4814_v48 = vpop.eup %4813  ;;  %vm2872_vm9 = vcmp.eq.f32.partialorder %v7932_v55, 0.0  ;;  %v2929_v62 = vsub.f32 %v4239_v18, %v4247_v32  ;;  %v2930_v27 = vsub.f32 %v4240_v40, %v4248_v57  ;;  %v2795_v51 = vadd.f32 %v2794_v30, %v2788_v61 }
 0x260   : > { %v2873_v53 = vand.u32 2147483648, %v7932_v55  ;;  %v2896_v17 = vadd.f32 %v2853_v56, %v2846_v21  ;;  %4825 = vrsqrt.f32 %v8011_v26  ;;  %v2860_v50 = vsel %vm2858_vm5, %v2859_v15, %v2857_v43  ;;  %v4252_v56 = vld [vmem:[%s5213_s20 + $0x698] sm:$0xff] }
 0x261   : > { %vm2877_vm10 = vcmp.eq.f32.partialorder %v7953_v28, inf  ;;  %vm2879_vm11 = vcmp.eq.f32.partialorder %v7953_v28, 0.0  ;;  %v2936_v45 = vmul.f32 %v2928_v42, %v2928_v42  ;;  %v2864_v34 = vsel %vm2863_vm6, %v7918_v1, %v2862_v14  ;;  %v4250_v1 = vld [vmem:[%s5213_s20 + $0x688] sm:$0xff] }
 0x262   : > { %v4816_v59 = vpop.eup %4815  ;;  %v2869_v37 = vmul.f32 %v4814_v48, %v7932_v55  ;;  %v8037_v22 = vadd.f32 1e-06, %v2935_v41  ;;  %4827 = vrsqrt.f32 %v8023_v2  ;;  %v2880_v10 = vand.u32 2147483648, %v7953_v28 }
 0x263   : > { %v4818_v7 = vpop.eup %4817  ;;  %vm2884_vm12 = vcmp.eq.f32.partialorder %v7958_v35, inf  ;;  %v2937_v47 = vmul.f32 %v2929_v62, %v2929_v62  ;;  %v2938_v33 = vmul.f32 %v2930_v27, %v2930_v27  ;;  %v8043_v44 = vadd.f32 %v2795_v51, %v7942_v31  ;;  %v4257_v31 = vld [vmem:[%s5220_s18 + $0x680] sm:$0xff] }
 0x264   : > { %vm2886_vm13 = vcmp.eq.f32.partialorder %v7958_v35, 0.0  ;;  %v2887_v0 = vand.u32 2147483648, %v7958_v35  ;;  %v2897_v25 = vadd.f32 %v2896_v17, %v2860_v50  ;;  %v2867_v5 = vsel %vm2865_vm7, %v2866_v38, %v2864_v34  ;;  %v4260_v38 = vld [vmem:[%s5220_s18 + $0x698] sm:$0xff]  ;;  %v4261_v34 = vld [vmem:[%s5220_s18 + $0x6a0] sm:$0xff] }
 0x265   : > { %v4820_v29 = vpop.eup %4819  ;;  %v2876_v19 = vmul.f32 %v4816_v59, %v7953_v28  ;;  %vm2891_vm14 = vcmp.eq.f32.partialorder %v7960_v4, inf  ;;  %vm2893_vm15 = vcmp.eq.f32.partialorder %v7960_v4, 0.0  ;;  %v2871_v49 = vsel %vm2870_vm8, %v7932_v55, %v2869_v37  ;;  %v4253_v59 = vld [vmem:[%s5213_s20 + $0x6a0] sm:$0xff] }
 0x266   : > { %v2883_v6 = vmul.f32 %v4818_v7, %v7958_v35  ;;  %v8058_v54 = vadd.f32 1e-06, %v2936_v45  ;;  %4829 = vrsqrt.f32 %v8037_v22  ;;  %v2894_v52 = vand.u32 2147483648, %v7960_v4 }
 0x267   : > { %v4822_v24 = vpop.eup %4821  ;;  %v8064_v13 = vadd.f32 1e-06, %v2937_v47  ;;  %v8066_v16 = vadd.f32 1e-06, %v2938_v33  ;;  %vm2949_vm0 = vcmp.eq.f32.partialorder %v7986_v39, inf  ;;  %v2890_v61 = vmul.f32 %v4820_v29, %v7960_v4  ;;  %v4262_v47 = vld [vmem:[%s5220_s18 + $0x6a8] sm:$0xff] }
 0x268   : > { %v2898_v23 = vadd.f32 %v2897_v25, %v2867_v5  ;;  %vm2951_vm1 = vcmp.eq.f32.partialorder %v7986_v39, 0.0  ;;  %v3030_v58 = vsub.f32 %v4249_v11, %v4257_v31  ;;  %v2874_v3 = vsel %vm2872_vm9, %v2873_v53, %v2871_v49  ;;  %v4263_v29 = vld [vmem:[%s5220_s18 + $0x6b0] sm:$0xff]  ;;  %v4256_v5 = vld [vmem:[%s5213_s20 + $0x6b8] sm:$0xff] }
 0x269   : > { %v4824_v36 = vpop.eup %4823  ;;  %v2878_v20 = vsel %vm2877_vm10, %v7953_v28, %v2876_v19  ;;  %v2952_v8 = vand.u32 2147483648, %v7986_v39  ;;  %v3031_v9 = vsub.f32 %v4250_v1, %v4258_v12  ;;  %v2885_v15 = vsel %vm2884_vm12, %v7958_v35, %v2883_v6  ;;  %v4264_v19 = vld [vmem:[%s5220_s18 + $0x6b8] sm:$0xff] }
 0x26a   : > { %v2948_v18 = vmul.f32 %v4822_v24, %v7986_v39  ;;  %v2955_v30 = vmul.f32 %v4824_v36, %v7989_v60  ;;  %4831 = vrsqrt.f32 %v8058_v54  ;;  %vm2956_vm2 = vcmp.eq.f32.partialorder %v7989_v60, inf }
 0x26b   : > { %vm2958_vm3 = vcmp.eq.f32.partialorder %v7989_v60, 0.0  ;;  %v3032_v55 = vsub.f32 %v4251_v63, %v4259_v46  ;;  %v3038_v40 = vmul.f32 %v3030_v58, %v3030_v58  ;;  %v2881_v32 = vsel %vm2879_vm11, %v2880_v10, %v2878_v20  ;;  %v4254_v10 = vld [vmem:[%s5213_s20 + $0x6a8] sm:$0xff] }
 0x26c   : > { %v2892_v57 = vsel %vm2891_vm14, %v7960_v4, %v2890_v61  ;;  %v2899_v21 = vadd.f32 %v2898_v23, %v2874_v3  ;;  %v3039_v42 = vmul.f32 %v3031_v9, %v3031_v9  ;;  %v2888_v14 = vsel %vm2886_vm13, %v2887_v0, %v2885_v15 }
 0x26d   : > { %v4826_v43 = vpop.eup %4825  ;;  %v2959_v41 = vand.u32 2147483648, %v7989_v60  ;;  %vm2963_vm4 = vcmp.eq.f32.partialorder %v8011_v26, inf  ;;  %4833 = vrsqrt.f32 %v8064_v13  ;;  %v2950_v28 = vsel %vm2949_vm0, %v7986_v39, %v2948_v18  ;;  %v4255_v39 = vld [vmem:[%s5213_s20 + $0x6b0] sm:$0xff] }
 0x26e   : > { %v2957_v48 = vsel %vm2956_vm2, %v7989_v60, %v2955_v30  ;;  %v2962_v62 = vmul.f32 %v4826_v43, %v8011_v26  ;;  %4835 = vrsqrt.f32 %v8066_v16  ;;  %v2895_v27 = vsel %vm2893_vm15, %v2894_v52, %v2892_v57 }
 0x26f   : > { %v4828_v35 = vpop.eup %4827  ;;  %v3033_v51 = vsub.f32 %v4252_v56, %v4260_v38  ;;  %v3040_v53 = vmul.f32 %v3032_v55, %v3032_v55  ;;  %v8109_v17 = vadd.f32 1e-06, %v3038_v40  ;;  %v2900_v50 = vadd.f32 %v2899_v21, %v2881_v32  ;;  %v4265_v21 = vld [vmem:[%s5213_s20 + $0x6c0] sm:$0xff] }
 0x270   : > { %vm2965_vm5 = vcmp.eq.f32.partialorder %v8011_v26, 0.0  ;;  %v2966_v45 = vand.u32 2147483648, %v8011_v26  ;;  %v8115_v37 = vadd.f32 1e-06, %v3039_v42  ;;  %v2953_v4 = vsel %vm2951_vm1, %v2952_v8, %v2950_v28  ;;  %v4266_v28 = vld [vmem:[%s5213_s20 + $0x6c8] sm:$0xff] }
 0x271   : > { %v2960_v7 = vsel %vm2958_vm3, %v2959_v41, %v2957_v48  ;;  %vm2970_vm6 = vcmp.eq.f32.partialorder %v8023_v2, inf  ;;  %vm2972_vm7 = vcmp.eq.f32.partialorder %v8023_v2, 0.0  ;;  %v2964_v33 = vsel %vm2963_vm4, %v8011_v26, %v2962_v62  ;;  %v4274_v48 = vld [vmem:[%s5220_s18 + $0x6c8] sm:$0xff] }
 0x272   : > { %v2969_v0 = vmul.f32 %v4828_v35, %v8023_v2  ;;  %v2973_v25 = vand.u32 2147483648, %v8023_v2  ;;  %vm2977_vm8 = vcmp.eq.f32.partialorder %v8037_v22, inf  ;;  %v3034_v11 = vsub.f32 %v4253_v59, %v4261_v34  ;;  %v4268_v34 = vld [vmem:[%s5213_s20 + $0x6d8] sm:$0xff] }
 0x273   : > { %v4830_v60 = vpop.eup %4829  ;;  %v3041_v31 = vmul.f32 %v3033_v51, %v3033_v51  ;;  %v8135_v49 = vadd.f32 1e-06, %v3040_v53  ;;  %4837 = vrsqrt.f32 %v8109_v17  ;;  %v2901_v6 = vadd.f32 %v2900_v50, %v2888_v14  ;;  %v4267_v51 = vld [vmem:[%s5213_s20 + $0x6d0] sm:$0xff] }
 0x274   : > { %v3003_v1 = vadd.f32 %v2960_v7, %v2953_v4  ;;  %v3035_v12 = vsub.f32 %v4254_v10, %v4262_v47  ;;  %4839 = vrsqrt.f32 %v8115_v37  ;;  %v2967_v24 = vsel %vm2965_vm5, %v2966_v45, %v2964_v33  ;;  %v4275_v53 = vld [vmem:[%s5220_s18 + $0x6d0] sm:$0xff]  ;;  %v4276_v4 = vld [vmem:[%s5220_s18 + $0x6d8] sm:$0xff] }
 0x275   : > { %vm2979_vm9 = vcmp.eq.f32.partialorder %v8037_v22, 0.0  ;;  %v2980_v52 = vand.u32 2147483648, %v8037_v22  ;;  %v3036_v61 = vsub.f32 %v4255_v39, %v4263_v29  ;;  %v2971_v23 = vsel %vm2970_vm6, %v8023_v2, %v2969_v0  ;;  %v4273_v2 = vld [vmem:[%s5220_s18 + $0x6c0] sm:$0xff] }
 0x276   : > { %v2976_v63 = vmul.f32 %v4830_v60, %v8037_v22  ;;  %vm2984_vm10 = vcmp.eq.f32.partialorder %v8058_v54, inf  ;;  %v3037_v46 = vsub.f32 %v4256_v5, %v4264_v19  ;;  %vm2986_vm11 = vcmp.eq.f32.partialorder %v8058_v54, 0.0  ;;  %v4269_v19 = vld [vmem:[%s5213_s20 + $0x6e0] sm:$0xff] }
 0x277   : > { %v4832_v58 = vpop.eup %4831  ;;  %v3042_v36 = vmul.f32 %v3034_v11, %v3034_v11  ;;  %v8149_v26 = vadd.f32 1e-06, %v3041_v31  ;;  %4841 = vrsqrt.f32 %v8135_v49  ;;  %v2902_v3 = vadd.f32 %v2901_v6, %v2895_v27  ;;  %v4277_v11 = vld [vmem:[%s5220_s18 + $0x6e0] sm:$0xff] }
 0x278   : > { %v2987_v20 = vand.u32 2147483648, %v8058_v54  ;;  %v3004_v8 = vadd.f32 %v3003_v1, %v2967_v24  ;;  %v3043_v9 = vmul.f32 %v3035_v12, %v3035_v12  ;;  %v2974_v15 = vsel %vm2972_vm7, %v2973_v25, %v2971_v23 }
 0x279   : > { %vm2991_vm12 = vcmp.eq.f32.partialorder %v8064_v13, inf  ;;  %vm2993_vm13 = vcmp.eq.f32.partialorder %v8064_v13, 0.0  ;;  %v3044_v18 = vmul.f32 %v3036_v61, %v3036_v61  ;;  %v2978_v55 = vsel %vm2977_vm8, %v8037_v22, %v2976_v63 }
 0x27a   : > { %v4834_v30 = vpop.eup %4833  ;;  %v2983_v40 = vmul.f32 %v4832_v58, %v8058_v54  ;;  %v2994_v32 = vand.u32 2147483648, %v8064_v13  ;;  %v3045_v57 = vmul.f32 %v3037_v46, %v3037_v46  ;;  %vm2998_vm14 = vcmp.eq.f32.partialorder %v8066_v16, inf  ;;  %v4270_v58 = vld [vmem:[%s5213_s20 + $0x6e8] sm:$0xff] }
 0x27b   : > { %v4836_v56 = vpop.eup %4835  ;;  %vm3000_vm15 = vcmp.eq.f32.partialorder %v8066_v16, 0.0  ;;  %v8166_v38 = vadd.f32 1e-06, %v3042_v36  ;;  %4843 = vrsqrt.f32 %v8149_v26  ;;  %v8170_v42 = vadd.f32 %v2902_v3, %v8043_v44  ;;  %v4271_v3 = vld [vmem:[%s5213_s20 + $0x6f0] sm:$0xff] }
 0x27c   : > { %v3001_v43 = vand.u32 2147483648, %v8066_v16  ;;  %v3005_v14 = vadd.f32 %v3004_v8, %v2974_v15  ;;  %v8173_v41 = vadd.f32 1e-06, %v3043_v9  ;;  %v2981_v62 = vsel %vm2979_vm9, %v2980_v52, %v2978_v55  ;;  %v4279_v8 = vld [vmem:[%s5220_s18 + $0x6f0] sm:$0xff]  ;;  %v4280_v55 = vld [vmem:[%s5220_s18 + $0x6f8] sm:$0xff] }
 0x27d   : > { %v2990_v35 = vmul.f32 %v4834_v30, %v8064_v13  ;;  %v8180_v27 = vadd.f32 1e-06, %v3044_v18  ;;  %v3137_v44 = vsub.f32 %v4265_v21, %v4273_v2  ;;  %v2985_v50 = vsel %vm2984_vm10, %v8058_v54, %v2983_v40  ;;  %v4272_v30 = vld [vmem:[%s5213_s20 + $0x6f8] sm:$0xff] }
 0x27e   : > { %v2997_v45 = vmul.f32 %v4836_v56, %v8066_v16  ;;  %v8188_v59 = vadd.f32 1e-06, %v3045_v57  ;;  %vm3056_vm0 = vcmp.eq.f32.partialorder %v8109_v17, inf  ;;  %vm3058_vm1 = vcmp.eq.f32.partialorder %v8109_v17, 0.0 }
 0x27f   : > { %v3059_v22 = vand.u32 2147483648, %v8109_v17  ;;  %4845 = vrsqrt.f32 %v8166_v38  ;;  %v3138_v7 = vsub.f32 %v4266_v28, %v4274_v48  ;;  %v3006_v47 = vadd.f32 %v3005_v14, %v2981_v62 }
 0x280   : > { %v4838_v10 = vpop.eup %4837  ;;  %vm3063_vm2 = vcmp.eq.f32.partialorder %v8115_v37, inf  ;;  %4847 = vrsqrt.f32 %v8173_v41  ;;  %v3139_v33 = vsub.f32 %v4267_v51, %v4275_v53  ;;  %v2988_v25 = vsel %vm2986_vm11, %v2987_v20, %v2985_v50  ;;  %v4278_v20 = vld [vmem:[%s5220_s18 + $0x6e8] sm:$0xff] }
 0x281   : > { %v4840_v0 = vpop.eup %4839  ;;  %v2992_v39 = vsel %vm2991_vm12, %v8064_v13, %v2990_v35  ;;  %v3145_v29 = vmul.f32 %v3137_v44, %v3137_v44  ;;  %v3146_v60 = vmul.f32 %v3138_v7, %v3138_v7  ;;  %v2999_v5 = vsel %vm2998_vm14, %v8066_v16, %v2997_v45 }
 0x282   : > { %vm3065_vm3 = vcmp.eq.f32.partialorder %v8115_v37, 0.0  ;;  %4849 = vrsqrt.f32 %v8180_v27  ;;  %v3140_v31 = vsub.f32 %v4268_v34, %v4276_v4  ;;  %v3055_v54 = vmul.f32 %v4838_v10, %v8109_v17 }
 0x283   : > { %v3062_v6 = vmul.f32 %v4840_v0, %v8115_v37  ;;  %4851 = vrsqrt.f32 %v8188_v59  ;;  %v8213_v1 = vadd.f32 1e-06, %v3145_v29  ;;  %v2995_v24 = vsel %vm2993_vm13, %v2994_v32, %v2992_v39 }
 0x284   : > { %v4842_v12 = vpop.eup %4841  ;;  %v3007_v52 = vadd.f32 %v3006_v47, %v2988_v25  ;;  %v3147_v61 = vmul.f32 %v3139_v33, %v3139_v33  ;;  %v8217_v23 = vadd.f32 1e-06, %v3146_v60  ;;  %v3002_v63 = vsel %vm3000_vm15, %v3001_v43, %v2999_v5 }
 0x285   : > { %v3066_v46 = vand.u32 2147483648, %v8115_v37  ;;  %vm3070_vm4 = vcmp.eq.f32.partialorder %v8135_v49, inf  ;;  %v3141_v36 = vsub.f32 %v4269_v19, %v4277_v11  ;;  %vm3072_vm5 = vcmp.eq.f32.partialorder %v8135_v49, 0.0  ;;  %v4281_v19 = vld [vmem:[%s5213_s20 + $0x700] sm:$0xff]  ;;  %v4282_v11 = vld [vmem:[%s5213_s20 + $0x708] sm:$0xff] }
 0x286   : > { %v3073_v13 = vand.u32 2147483648, %v8135_v49  ;;  %v3148_v9 = vmul.f32 %v3140_v31, %v3140_v31  ;;  %4853 = vrsqrt.f32 %v8213_v1  ;;  %v3057_v16 = vsel %vm3056_vm0, %v8109_v17, %v3055_v54  ;;  %v4289_v31 = vld [vmem:[%s5220_s18 + $0x700] sm:$0xff] }
 0x287   : > { %v3064_v15 = vsel %vm3063_vm2, %v8115_v37, %v3062_v6  ;;  %v3069_v18 = vmul.f32 %v4842_v12, %v8135_v49  ;;  %vm3077_vm6 = vcmp.eq.f32.partialorder %v8149_v26, inf  ;;  %v3008_v32 = vadd.f32 %v3007_v52, %v2995_v24  ;;  %v4290_v24 = vld [vmem:[%s5220_s18 + $0x708] sm:$0xff] }
 0x288   : > { %v4844_v40 = vpop.eup %4843  ;;  %vm3079_vm7 = vcmp.eq.f32.partialorder %v8149_v26, 0.0  ;;  %v8241_v57 = vadd.f32 1e-06, %v3147_v61  ;;  %4855 = vrsqrt.f32 %v8217_v23  ;;  %v3080_v21 = vand.u32 2147483648, %v8149_v26 }
 0x289   : > { %v3142_v2 = vsub.f32 %v4270_v58, %v4278_v20  ;;  %v3143_v56 = vsub.f32 %v4271_v3, %v4279_v8  ;;  %v3149_v43 = vmul.f32 %v3141_v36, %v3141_v36  ;;  %v3060_v14 = vsel %vm3058_vm1, %v3059_v22, %v3057_v16  ;;  %v4283_v8 = vld [vmem:[%s5213_s20 + $0x710] sm:$0xff] }
 0x28a   : > { %v3067_v28 = vsel %vm3065_vm3, %v3066_v46, %v3064_v15  ;;  %v3144_v48 = vsub.f32 %v4272_v30, %v4280_v55  ;;  %v8249_v62 = vadd.f32 1e-06, %v3148_v9  ;;  %v3071_v35 = vsel %vm3070_vm4, %v8135_v49, %v3069_v18  ;;  %v4291_v9 = vld [vmem:[%s5220_s18 + $0x710] sm:$0xff] }
 0x28b   : > { %v3076_v51 = vmul.f32 %v4844_v40, %v8149_v26  ;;  %vm3084_vm8 = vcmp.eq.f32.partialorder %v8166_v38, inf  ;;  %vm3086_vm9 = vcmp.eq.f32.partialorder %v8166_v38, 0.0  ;;  %v3009_v44 = vadd.f32 %v3008_v32, %v3002_v63 }
 0x28c   : > { %v4846_v53 = vpop.eup %4845  ;;  %v3087_v17 = vand.u32 2147483648, %v8166_v38  ;;  %vm3091_vm10 = vcmp.eq.f32.partialorder %v8173_v41, inf  ;;  %4857 = vrsqrt.f32 %v8241_v57  ;;  %vm3093_vm11 = vcmp.eq.f32.partialorder %v8173_v41, 0.0 }
 0x28d   : > { %v4848_v37 = vpop.eup %4847  ;;  %v3094_v50 = vand.u32 2147483648, %v8173_v41  ;;  %v3110_v45 = vadd.f32 %v3067_v28, %v3060_v14  ;;  %v3150_v22 = vmul.f32 %v3142_v2, %v3142_v2  ;;  %v8262_v34 = vadd.f32 1e-06, %v3149_v43  ;;  %v4292_v2 = vld [vmem:[%s5220_s18 + $0x718] sm:$0xff] }
 0x28e   : > { %v3074_v4 = vsel %vm3072_vm5, %v3073_v13, %v3071_v35  ;;  %v3151_v7 = vmul.f32 %v3143_v56, %v3143_v56  ;;  %v3152_v10 = vmul.f32 %v3144_v48, %v3144_v48  ;;  %4859 = vrsqrt.f32 %v8249_v62 }
 0x28f   : > { %v4850_v47 = vpop.eup %4849  ;;  %v3078_v33 = vsel %vm3077_vm6, %v8149_v26, %v3076_v51  ;;  %v3083_v0 = vmul.f32 %v4846_v53, %v8166_v38  ;;  %vm3098_vm12 = vcmp.eq.f32.partialorder %v8180_v27, inf  ;;  %vm3100_vm13 = vcmp.eq.f32.partialorder %v8180_v27, 0.0 }
 0x290   : > { %v4852_v49 = vpop.eup %4851  ;;  %v8274_v25 = vadd.f32 %v3009_v44, %v8170_v42  ;;  %v3090_v39 = vmul.f32 %v4848_v37, %v8173_v41  ;;  %v3101_v29 = vand.u32 2147483648, %v8180_v27  ;;  %vm3105_vm14 = vcmp.eq.f32.partialorder %v8188_v59, inf  ;;  %v4285_v44 = vld [vmem:[%s5213_s20 + $0x720] sm:$0xff] }
 0x291   : > { %vm3107_vm15 = vcmp.eq.f32.partialorder %v8188_v59, 0.0  ;;  %v3111_v60 = vadd.f32 %v3110_v45, %v3074_v4  ;;  %v8280_v5 = vadd.f32 1e-06, %v3150_v22  ;;  %4861 = vrsqrt.f32 %v8262_v34  ;;  %v4293_v45 = vld [vmem:[%s5220_s18 + $0x720] sm:$0xff] }
 0x292   : > { %v3081_v42 = vsel %vm3079_vm7, %v3080_v21, %v3078_v33  ;;  %v3108_v54 = vand.u32 2147483648, %v8188_v59  ;;  %v8289_v6 = vadd.f32 1e-06, %v3151_v7  ;;  %v8291_v12 = vadd.f32 1e-06, %v3152_v10  ;;  %v4284_v21 = vld [vmem:[%s5213_s20 + $0x718] sm:$0xff] }
 0x293   : > { %v4854_v52 = vpop.eup %4853  ;;  %v3085_v61 = vsel %vm3084_vm8, %v8166_v38, %v3083_v0  ;;  %v3097_v63 = vmul.f32 %v4850_v47, %v8180_v27  ;;  %v3104_v46 = vmul.f32 %v4852_v49, %v8188_v59  ;;  %vm3163_vm0 = vcmp.eq.f32.partialorder %v8213_v1, inf  ;;  %v4287_v7 = vld [vmem:[%s5213_s20 + $0x730] sm:$0xff]  ;;  %v4294_v10 = vld [vmem:[%s5220_s18 + $0x728] sm:$0xff] }
 0x294   : > { %v3092_v26 = vsel %vm3091_vm10, %v8173_v41, %v3090_v39  ;;  %vm3165_vm1 = vcmp.eq.f32.partialorder %v8213_v1, 0.0  ;;  %v3166_v58 = vand.u32 2147483648, %v8213_v1  ;;  %v3244_v36 = vsub.f32 %v4281_v19, %v4289_v31  ;;  %v4295_v47 = vld [vmem:[%s5220_s18 + $0x730] sm:$0xff]  ;;  %v4296_v31 = vld [vmem:[%s5220_s18 + $0x738] sm:$0xff] }
 0x295   : > { %v4856_v13 = vpop.eup %4855  ;;  %v3112_v3 = vadd.f32 %v3111_v60, %v3081_v42  ;;  %v3162_v20 = vmul.f32 %v4854_v52, %v8213_v1  ;;  %4863 = vrsqrt.f32 %v8280_v5  ;;  %v3245_v16 = vsub.f32 %v4282_v11, %v4290_v24  ;;  %v4288_v11 = vld [vmem:[%s5213_s20 + $0x738] sm:$0xff] }
 0x296   : > { %v3088_v15 = vsel %vm3086_vm9, %v3087_v17, %v3085_v61  ;;  %v3169_v18 = vmul.f32 %v4856_v13, %v8217_v23  ;;  %vm3170_vm2 = vcmp.eq.f32.partialorder %v8217_v23, inf  ;;  %vm3172_vm3 = vcmp.eq.f32.partialorder %v8217_v23, 0.0 }
 0x297   : > { %v3099_v30 = vsel %vm3098_vm12, %v8180_v27, %v3097_v63  ;;  %v3106_v55 = vsel %vm3105_vm14, %v8188_v59, %v3104_v46  ;;  %4865 = vrsqrt.f32 %v8289_v6  ;;  %v3252_v40 = vmul.f32 %v3244_v36, %v3244_v36 }
 0x298   : > { %v3095_v38 = vsel %vm3093_vm11, %v3094_v50, %v3092_v26  ;;  %v3173_v32 = vand.u32 2147483648, %v8217_v23  ;;  %v3246_v56 = vsub.f32 %v4283_v8, %v4291_v9  ;;  %v3253_v43 = vmul.f32 %v3245_v16, %v3245_v16  ;;  %v4286_v50 = vld [vmem:[%s5213_s20 + $0x728] sm:$0xff] }
 0x299   : > { %v4858_v14 = vpop.eup %4857  ;;  %v3113_v28 = vadd.f32 %v3112_v3, %v3088_v15  ;;  %v3164_v48 = vsel %vm3163_vm0, %v8213_v1, %v3162_v20  ;;  %v3171_v35 = vsel %vm3170_vm2, %v8217_v23, %v3169_v18  ;;  %4867 = vrsqrt.f32 %v8291_v12 }
 0x29a   : > { %v3102_v41 = vsel %vm3100_vm13, %v3101_v29, %v3099_v30  ;;  %v3109_v51 = vsel %vm3107_vm15, %v3108_v54, %v3106_v55  ;;  %v3176_v53 = vmul.f32 %v4858_v14, %v8241_v57  ;;  %vm3177_vm4 = vcmp.eq.f32.partialorder %v8241_v57, inf }
 0x29b   : > { %v4860_v17 = vpop.eup %4859  ;;  %vm3179_vm5 = vcmp.eq.f32.partialorder %v8241_v57, 0.0  ;;  %v3180_v37 = vand.u32 2147483648, %v8241_v57  ;;  %v3247_v22 = vsub.f32 %v4284_v21, %v4292_v2  ;;  %v8342_v27 = vadd.f32 1e-06, %v3252_v40  ;;  %v4297_v2 = vld [vmem:[%s5213_s20 + $0x740] sm:$0xff] }
 0x29c   : > { %v3167_v59 = vsel %vm3165_vm1, %v3166_v58, %v3164_v48  ;;  %v3174_v4 = vsel %vm3172_vm3, %v3173_v32, %v3171_v35  ;;  %v3254_v33 = vmul.f32 %v3246_v56, %v3246_v56  ;;  %v8351_v0 = vadd.f32 1e-06, %v3253_v43  ;;  %v4305_v56 = vld [vmem:[%s5220_s18 + $0x740] sm:$0xff] }
 0x29d   : > { %v3114_v49 = vadd.f32 %v3113_v28, %v3095_v38  ;;  %v3178_v39 = vsel %vm3177_vm4, %v8241_v57, %v3176_v53  ;;  %v3183_v29 = vmul.f32 %v4860_v17, %v8249_v62  ;;  %vm3184_vm6 = vcmp.eq.f32.partialorder %v8249_v62, inf }
 0x29e   : > { %v4862_v1 = vpop.eup %4861  ;;  %vm3186_vm7 = vcmp.eq.f32.partialorder %v8249_v62, 0.0  ;;  %v3187_v23 = vand.u32 2147483648, %v8249_v62  ;;  %vm3191_vm8 = vcmp.eq.f32.partialorder %v8262_v34, inf  ;;  %v3248_v60 = vsub.f32 %v4285_v44, %v4293_v45 }
 0x29f   : > { %v3217_v19 = vadd.f32 %v3174_v4, %v3167_v59  ;;  %v3249_v42 = vsub.f32 %v4286_v50, %v4294_v10  ;;  %v3250_v54 = vsub.f32 %v4287_v7, %v4295_v47  ;;  %4869 = vrsqrt.f32 %v8342_v27  ;;  %v4300_v7 = vld [vmem:[%s5213_s20 + $0x758] sm:$0xff] }
 0x2a0   : > { %v3181_v24 = vsel %vm3179_vm5, %v3180_v37, %v3178_v39  ;;  %v3255_v52 = vmul.f32 %v3247_v22, %v3247_v22  ;;  %v8366_v61 = vadd.f32 1e-06, %v3254_v33  ;;  %4871 = vrsqrt.f32 %v8351_v0  ;;  %v4307_v37 = vld [vmem:[%s5220_s18 + $0x750] sm:$0xff]  ;;  %v4308_v10 = vld [vmem:[%s5220_s18 + $0x758] sm:$0xff]  ;;  %v4301_v39 = vld [vmem:[%s5213_s20 + $0x760] sm:$0xff] }
 0x2a1   : > { %v3185_v63 = vsel %vm3184_vm6, %v8249_v62, %v3183_v29  ;;  %v3190_v46 = vmul.f32 %v4862_v1, %v8262_v34  ;;  %vm3193_vm9 = vcmp.eq.f32.partialorder %v8262_v34, 0.0  ;;  %v3194_v26 = vand.u32 2147483648, %v8262_v34  ;;  %v4309_v29 = vld [vmem:[%s5220_s18 + $0x760] sm:$0xff] }
 0x2a2   : > { %v4864_v58 = vpop.eup %4863  ;;  %v3115_v36 = vadd.f32 %v3114_v49, %v3102_v41  ;;  %vm3198_vm10 = vcmp.eq.f32.partialorder %v8280_v5, inf  ;;  %v3251_v57 = vsub.f32 %v4288_v11, %v4296_v31  ;;  %v3256_v13 = vmul.f32 %v3248_v60, %v3248_v60  ;;  %v4298_v41 = vld [vmem:[%s5213_s20 + $0x748] sm:$0xff] }
 0x2a3   : > { %vm3200_vm11 = vcmp.eq.f32.partialorder %v8280_v5, 0.0  ;;  %v3201_v3 = vand.u32 2147483648, %v8280_v5  ;;  %v3218_v20 = vadd.f32 %v3217_v19, %v3181_v24  ;;  %v3257_v8 = vmul.f32 %v3249_v42, %v3249_v42 }
 0x2a4   : > { %v4866_v9 = vpop.eup %4865  ;;  %v3188_v16 = vsel %vm3186_vm7, %v3187_v23, %v3185_v63  ;;  %v3258_v15 = vmul.f32 %v3250_v54, %v3250_v54  ;;  %v8380_v18 = vadd.f32 1e-06, %v3255_v52  ;;  %4873 = vrsqrt.f32 %v8366_v61  ;;  %v4302_v52 = vld [vmem:[%s5213_s20 + $0x768] sm:$0xff] }
 0x2a5   : > { %v3192_v30 = vsel %vm3191_vm8, %v8262_v34, %v3190_v46  ;;  %v3197_v55 = vmul.f32 %v4864_v58, %v8280_v5  ;;  %vm3205_vm12 = vcmp.eq.f32.partialorder %v8289_v6, inf  ;;  %vm3207_vm13 = vcmp.eq.f32.partialorder %v8289_v6, 0.0  ;;  %v4299_v34 = vld [vmem:[%s5213_s20 + $0x750] sm:$0xff]  ;;  %v4310_v63 = vld [vmem:[%s5220_s18 + $0x768] sm:$0xff] }
 0x2a6   : > { %v4868_v40 = vpop.eup %4867  ;;  %v3116_v62 = vadd.f32 %v3115_v36, %v3109_v51  ;;  %v3208_v38 = vand.u32 2147483648, %v8289_v6  ;;  %v3259_v32 = vmul.f32 %v3251_v57, %v3251_v57  ;;  %v8390_v21 = vadd.f32 1e-06, %v3256_v13  ;;  %v4306_v51 = vld [vmem:[%s5220_s18 + $0x748] sm:$0xff]  ;;  %v4303_v36 = vld [vmem:[%s5213_s20 + $0x770] sm:$0xff] }
 0x2a7   : > { %v3204_v43 = vmul.f32 %v4866_v9, %v8289_v6  ;;  %vm3212_vm14 = vcmp.eq.f32.partialorder %v8291_v12, inf  ;;  %v3219_v14 = vadd.f32 %v3218_v20, %v3188_v16  ;;  %v8396_v28 = vadd.f32 1e-06, %v3257_v8  ;;  %v4311_v57 = vld [vmem:[%s5220_s18 + $0x770] sm:$0xff]  ;;  %v4312_v9 = vld [vmem:[%s5220_s18 + $0x778] sm:$0xff] }
 0x2a8   : > { %v3195_v48 = vsel %vm3193_vm9, %v3194_v26, %v3192_v30  ;;  %vm3214_vm15 = vcmp.eq.f32.partialorder %v8291_v12, 0.0  ;;  %v8401_v35 = vadd.f32 1e-06, %v3258_v15  ;;  %4875 = vrsqrt.f32 %v8380_v18 }
 0x2a9   : > { %v3199_v53 = vsel %vm3198_vm10, %v8280_v5, %v3197_v55  ;;  %v3211_v44 = vmul.f32 %v4868_v40, %v8291_v12  ;;  %v3215_v17 = vand.u32 2147483648, %v8291_v12  ;;  %v3351_v50 = vsub.f32 %v4297_v2, %v4305_v56 }
 0x2aa   : > { %v8414_v45 = vadd.f32 %v3116_v62, %v8274_v25  ;;  %v8416_v22 = vadd.f32 1e-06, %v3259_v32  ;;  %vm3270_vm0 = vcmp.eq.f32.partialorder %v8342_v27, inf  ;;  %4877 = vrsqrt.f32 %v8390_v21 }
 0x2ab   : > { %v3206_v59 = vsel %vm3205_vm12, %v8289_v6, %v3204_v43  ;;  %v3220_v4 = vadd.f32 %v3219_v14, %v3195_v48  ;;  %4879 = vrsqrt.f32 %v8396_v28  ;;  %v3352_v47 = vsub.f32 %v4298_v41, %v4306_v51 }
 0x2ac   : > { %v4870_v33 = vpop.eup %4869  ;;  %v3202_v25 = vsel %vm3200_vm11, %v3201_v3, %v3199_v53  ;;  %vm3272_vm1 = vcmp.eq.f32.partialorder %v8342_v27, 0.0  ;;  %v3273_v49 = vand.u32 2147483648, %v8342_v27  ;;  %4881 = vrsqrt.f32 %v8401_v35 }
 0x2ad   : > { %v3353_v1 = vsub.f32 %v4299_v34, %v4307_v37  ;;  %v4872_v23 = vpop.eup %4871  ;;  %v3213_v60 = vsel %vm3212_vm14, %v8291_v12, %v3211_v44  ;;  %vm3277_vm2 = vcmp.eq.f32.partialorder %v8351_v0, inf  ;;  %v3359_v5 = vmul.f32 %v3351_v50, %v3351_v50  ;;  %v4304_v12 = vld [vmem:[%s5213_s20 + $0x778] sm:$0xff] }
 0x2ae   : > { %v3360_v19 = vmul.f32 %v3352_v47, %v3352_v47  ;;  %v3209_v11 = vsel %vm3207_vm13, %v3208_v38, %v3206_v59  ;;  %vm3279_vm3 = vcmp.eq.f32.partialorder %v8351_v0, 0.0  ;;  %v3280_v31 = vand.u32 2147483648, %v8351_v0 }
 0x2af   : > { %v3354_v42 = vsub.f32 %v4300_v7, %v4308_v10  ;;  %v3221_v54 = vadd.f32 %v3220_v4, %v3202_v25  ;;  %v3269_v24 = vmul.f32 %v4870_v33, %v8342_v27  ;;  %v3355_v46 = vsub.f32 %v4301_v39, %v4309_v29 }
 0x2b0   : > { %v8444_v26 = vadd.f32 1e-06, %v3359_v5  ;;  %v3216_v58 = vsel %vm3214_vm15, %v3215_v17, %v3213_v60  ;;  %v3276_v6 = vmul.f32 %v4872_v23, %v8351_v0  ;;  %v3361_v13 = vmul.f32 %v3353_v1, %v3353_v1 }
 0x2b1   : > { %v8451_v3 = vadd.f32 1e-06, %v3360_v19  ;;  %v4874_v20 = vpop.eup %4873  ;;  %vm3284_vm4 = vcmp.eq.f32.partialorder %v8366_v61, inf  ;;  %vm3286_vm5 = vcmp.eq.f32.partialorder %v8366_v61, 0.0  ;;  %v3287_v8 = vand.u32 2147483648, %v8366_v61 }
 0x2b2   : > { %4883 = vrsqrt.f32 %v8416_v22  ;;  %vm3291_vm6 = vcmp.eq.f32.partialorder %v8380_v18, inf  ;;  %v3356_v16 = vsub.f32 %v4302_v52, %v4310_v63  ;;  %v3362_v15 = vmul.f32 %v3354_v42, %v3354_v42  ;;  %v4322_v52 = vld [vmem:[%s5220_s18 + $0x788] sm:$0xff] }
 0x2b3   : > { %4885 = vrsqrt.f32 %v8444_v26  ;;  %v3222_v30 = vadd.f32 %v3221_v54, %v3209_v11  ;;  %v3271_v55 = vsel %vm3270_vm0, %v8342_v27, %v3269_v24  ;;  %v3357_v40 = vsub.f32 %v4303_v36, %v4311_v57  ;;  %v4313_v11 = vld [vmem:[%s5213_s20 + $0x780] sm:$0xff] }
 0x2b4   : > { %v3363_v62 = vmul.f32 %v3355_v46, %v3355_v46  ;;  %v3278_v38 = vsel %vm3277_vm2, %v8351_v0, %v3276_v6  ;;  %v3283_v32 = vmul.f32 %v4874_v20, %v8366_v61  ;;  %v8468_v2 = vadd.f32 1e-06, %v3361_v13  ;;  %v4323_v13 = vld [vmem:[%s5220_s18 + $0x790] sm:$0xff] }
 0x2b5   : > { %4887 = vrsqrt.f32 %v8451_v3  ;;  %v4876_v56 = vpop.eup %4875  ;;  %vm3293_vm7 = vcmp.eq.f32.partialorder %v8380_v18, 0.0  ;;  %v3294_v43 = vand.u32 2147483648, %v8380_v18  ;;  %vm3298_vm8 = vcmp.eq.f32.partialorder %v8390_v21, inf }
 0x2b6   : > { %v3358_v14 = vsub.f32 %v4304_v12, %v4312_v9  ;;  %vm3300_vm9 = vcmp.eq.f32.partialorder %v8390_v21, 0.0  ;;  %v3301_v48 = vand.u32 2147483648, %v8390_v21  ;;  %vm3305_vm10 = vcmp.eq.f32.partialorder %v8396_v28, inf }
 0x2b7   : > { %v3364_v41 = vmul.f32 %v3356_v16, %v3356_v16  ;;  %v8477_v51 = vadd.f32 1e-06, %v3362_v15  ;;  %v4878_v53 = vpop.eup %4877  ;;  %v3223_v44 = vadd.f32 %v3222_v30, %v3216_v58  ;;  %v3274_v17 = vsel %vm3272_vm1, %v3273_v49, %v3271_v55 }
 0x2b8   : > { %v3281_v34 = vsel %vm3279_vm3, %v3280_v31, %v3278_v38  ;;  %v3365_v37 = vmul.f32 %v3357_v40, %v3357_v40  ;;  %v4880_v50 = vpop.eup %4879  ;;  %v3285_v59 = vsel %vm3284_vm4, %v8366_v61, %v3283_v32  ;;  %v3290_v4 = vmul.f32 %v4876_v56, %v8380_v18  ;;  %v4321_v31 = vld [vmem:[%s5220_s18 + $0x780] sm:$0xff]  ;;  %v4324_v38 = vld [vmem:[%s5220_s18 + $0x798] sm:$0xff] }
 0x2b9   : > { %v8487_v7 = vadd.f32 1e-06, %v3363_v62  ;;  %4889 = vrsqrt.f32 %v8468_v2  ;;  %v4882_v10 = vpop.eup %4881  ;;  %vm3307_vm11 = vcmp.eq.f32.partialorder %v8396_v28, 0.0  ;;  %v3308_v27 = vand.u32 2147483648, %v8396_v28  ;;  %v4316_v62 = vld [vmem:[%s5213_s20 + $0x798] sm:$0xff]  ;;  %v4317_v56 = vld [vmem:[%s5213_s20 + $0x7a0] sm:$0xff] }
 0x2ba   : > { %vm3312_vm12 = vcmp.eq.f32.partialorder %v8401_v35, inf  ;;  %v3366_v0 = vmul.f32 %v3358_v14, %v3358_v14  ;;  %v3297_v47 = vmul.f32 %v4878_v53, %v8390_v21  ;;  %v3324_v33 = vadd.f32 %v3281_v34, %v3274_v17 }
 0x2bb   : > { %v8494_v25 = vadd.f32 1e-06, %v3364_v41  ;;  %4891 = vrsqrt.f32 %v8477_v51  ;;  %v3288_v49 = vsel %vm3286_vm5, %v3287_v8, %v3285_v59  ;;  %v3304_v39 = vmul.f32 %v4880_v50, %v8396_v28  ;;  %v4318_v50 = vld [vmem:[%s5213_s20 + $0x7a8] sm:$0xff] }
 0x2bc   : > { %vm3314_vm13 = vcmp.eq.f32.partialorder %v8401_v35, 0.0  ;;  %v3315_v29 = vand.u32 2147483648, %v8401_v35  ;;  %v3292_v1 = vsel %vm3291_vm6, %v8380_v18, %v3290_v4  ;;  %v3311_v23 = vmul.f32 %v4882_v10, %v8401_v35  ;;  %v4315_v18 = vld [vmem:[%s5213_s20 + $0x790] sm:$0xff]  ;;  %v4326_v59 = vld [vmem:[%s5220_s18 + $0x7a8] sm:$0xff] }
 0x2bd   : > { %v8506_v60 = vadd.f32 1e-06, %v3365_v37  ;;  %4893 = vrsqrt.f32 %v8487_v7  ;;  %v8510_v61 = vadd.f32 %v3223_v44, %v8414_v45  ;;  %v3322_v5 = vand.u32 2147483648, %v8416_v22  ;;  %v4314_v45 = vld [vmem:[%s5213_s20 + $0x788] sm:$0xff] }
 0x2be   : > { %v8513_v19 = vadd.f32 1e-06, %v3366_v0  ;;  %vm3377_vm14 = vcmp.eq.f32.partialorder %v8444_v26, inf  ;;  %v3299_v54 = vsel %vm3298_vm8, %v8390_v21, %v3297_v47  ;;  %v3325_v24 = vadd.f32 %v3324_v33, %v3288_v49 }
 0x2bf   : > { %v4884_v42 = vpop.eup %4883  ;;  %vm3379_vm15 = vcmp.eq.f32.partialorder %v8444_v26, 0.0  ;;  %4895 = vrsqrt.f32 %v8494_v25  ;;  %v3295_v46 = vsel %vm3293_vm7, %v3294_v43, %v3292_v1  ;;  %v3306_v58 = vsel %vm3305_vm10, %v8396_v28, %v3304_v39  ;;  %v4325_v43 = vld [vmem:[%s5220_s18 + $0x7a0] sm:$0xff] }
 0x2c0   : > { %v4886_v63 = vpop.eup %4885  ;;  %v3380_v6 = vand.u32 2147483648, %v8444_v26  ;;  %vm3384_vm0 = vcmp.eq.f32.partialorder %v8451_v3, inf  ;;  %v3313_v36 = vsel %vm3312_vm12, %v8401_v35, %v3311_v23  ;;  %vm3319_vm1 = vcmp.eq.f32.partialorder %v8416_v22, inf  ;;  %v4319_v23 = vld [vmem:[%s5213_s20 + $0x7b0] sm:$0xff] }
 0x2c1   : > { %v3376_v57 = vmul.f32 %v4886_v63, %v8444_v26  ;;  %4897 = vrsqrt.f32 %v8506_v60  ;;  %v3458_v20 = vsub.f32 %v4313_v11, %v4321_v31  ;;  %v3302_v12 = vsel %vm3300_vm9, %v3301_v48, %v3299_v54  ;;  %v4327_v11 = vld [vmem:[%s5220_s18 + $0x7b0] sm:$0xff] }
 0x2c2   : > { %v4888_v8 = vpop.eup %4887  ;;  %vm3386_vm2 = vcmp.eq.f32.partialorder %v8451_v3, 0.0  ;;  %v3387_v9 = vand.u32 2147483648, %v8451_v3  ;;  %v3459_v16 = vsub.f32 %v4314_v45, %v4322_v52  ;;  %v3318_v15 = vmul.f32 %v4884_v42, %v8416_v22  ;;  %v4328_v45 = vld [vmem:[%s5220_s18 + $0x7b8] sm:$0xff] }
 0x2c3   : > { %v3326_v30 = vadd.f32 %v3325_v24, %v3295_v46  ;;  %v3378_v55 = vsel %vm3377_vm14, %v8444_v26, %v3376_v57  ;;  %v3383_v40 = vmul.f32 %v4888_v8, %v8451_v3  ;;  %v3309_v21 = vsel %vm3307_vm11, %v3308_v27, %v3306_v58 }
 0x2c4   : > { %v8555_v32 = vsel %vm3314_vm13, %v3315_v29, %v3313_v36  ;;  %v3460_v14 = vsub.f32 %v4315_v18, %v4323_v13  ;;  %v3466_v48 = vmul.f32 %v3458_v20, %v3458_v20  ;;  %vm3321_vm3 = vcmp.eq.f32.partialorder %v8416_v22, 0.0 }
 0x2c5   : > { %v3385_v41 = vsel %vm3384_vm0, %v8451_v3, %v3383_v40  ;;  %vm3391_vm4 = vcmp.eq.f32.partialorder %v8468_v2, inf  ;;  %4899 = vrsqrt.f32 %v8513_v19  ;;  %v3467_v28 = vmul.f32 %v3459_v16, %v3459_v16 }
 0x2c6   : > { %v4890_v35 = vpop.eup %4889  ;;  %v3381_v53 = vsel %vm3379_vm15, %v3380_v6, %v3378_v55  ;;  %v3388_v44 = vsel %vm3386_vm2, %v3387_v9, %v3385_v41  ;;  %v3394_v17 = vand.u32 2147483648, %v8468_v2  ;;  %v3461_v34 = vsub.f32 %v4316_v62, %v4324_v38 }
 0x2c7   : > { %v3390_v37 = vmul.f32 %v4890_v35, %v8468_v2  ;;  %vm3393_vm5 = vcmp.eq.f32.partialorder %v8468_v2, 0.0  ;;  %v3462_v4 = vsub.f32 %v4317_v56, %v4325_v43  ;;  %v8574_v10 = vadd.f32 1e-06, %v3466_v48 }
 0x2c8   : > { %v4892_v27 = vpop.eup %4891  ;;  %v3327_v26 = vadd.f32 %v3326_v30, %v3302_v12  ;;  %vm3398_vm6 = vcmp.eq.f32.partialorder %v8477_v51, inf  ;;  %v3401_v3 = vand.u32 2147483648, %v8477_v51  ;;  %v3468_v0 = vmul.f32 %v3460_v14, %v3460_v14 }
 0x2c9   : > { %v3392_v47 = vsel %vm3391_vm4, %v8468_v2, %v3390_v37  ;;  %v3397_v33 = vmul.f32 %v4892_v27, %v8477_v51  ;;  %v3431_v49 = vadd.f32 %v3388_v44, %v3381_v53  ;;  %v8582_v39 = vadd.f32 1e-06, %v3467_v28  ;;  %v4320_v2 = vld [vmem:[%s5213_s20 + $0x7b8] sm:$0xff]  ;;  %v4338_v44 = vld [vmem:[%s5220_s18 + $0x7c8] sm:$0xff] }
 0x2ca   : > { %v4894_v29 = vpop.eup %4893  ;;  %v3395_v1 = vsel %vm3393_vm5, %v3394_v17, %v3392_v47  ;;  %v3463_v31 = vsub.f32 %v4318_v50, %v4326_v59  ;;  %v3469_v42 = vmul.f32 %v3461_v34, %v3461_v34  ;;  %4901 = vrsqrt.f32 %v8574_v10  ;;  %v4331_v59 = vld [vmem:[%s5213_s20 + $0x7d0] sm:$0xff]  ;;  %v4332_v47 = vld [vmem:[%s5213_s20 + $0x7d8] sm:$0xff] }
 0x2cb   : > { %v3399_v54 = vsel %vm3398_vm6, %v8477_v51, %v3397_v33  ;;  %vm3400_vm7 = vcmp.eq.f32.partialorder %v8477_v51, 0.0  ;;  %v3404_v24 = vmul.f32 %v4894_v29, %v8487_v7  ;;  %v3470_v52 = vmul.f32 %v3462_v4, %v3462_v4  ;;  %v4339_v4 = vld [vmem:[%s5220_s18 + $0x7d0] sm:$0xff]  ;;  %v4340_v33 = vld [vmem:[%s5220_s18 + $0x7d8] sm:$0xff] }
 0x2cc   : > { %v4896_v63 = vpop.eup %4895  ;;  %v3320_v46 = vsel %vm3319_vm1, %v8416_v22, %v3318_v15  ;;  %v3328_v58 = vadd.f32 %v3327_v26, %v3309_v21  ;;  %vm3405_vm8 = vcmp.eq.f32.partialorder %v8487_v7, inf  ;;  %v8596_v6 = vadd.f32 1e-06, %v3468_v0  ;;  %v4329_v22 = vld [vmem:[%s5213_s20 + $0x7c0] sm:$0xff] }
 0x2cd   : > { %v3408_v36 = vand.u32 2147483648, %v8487_v7  ;;  %v3432_v57 = vadd.f32 %v3431_v49, %v3395_v1  ;;  %v3464_v18 = vsub.f32 %v4319_v23, %v4327_v11  ;;  %4903 = vrsqrt.f32 %v8582_v39  ;;  %v4333_v23 = vld [vmem:[%s5213_s20 + $0x7e0] sm:$0xff] }
 0x2ce   : > { %v4898_v51 = vpop.eup %4897  ;;  %v3402_v13 = vsel %vm3400_vm7, %v3401_v3, %v3399_v54  ;;  %v3465_v20 = vsub.f32 %v4320_v2, %v4328_v45  ;;  %v3471_v8 = vmul.f32 %v3463_v31, %v3463_v31  ;;  %v8600_v12 = vadd.f32 1e-06, %v3469_v42  ;;  %v4341_v11 = vld [vmem:[%s5220_s18 + $0x7e0] sm:$0xff] }
 0x2cf   : > { %v3406_v9 = vsel %vm3405_vm8, %v8487_v7, %v3404_v24  ;;  %vm3407_vm9 = vcmp.eq.f32.partialorder %v8487_v7, 0.0  ;;  %v3411_v16 = vmul.f32 %v4896_v63, %v8494_v25  ;;  %v8605_v15 = vadd.f32 1e-06, %v3470_v52  ;;  %v4334_v52 = vld [vmem:[%s5213_s20 + $0x7e8] sm:$0xff] }
 0x2d0   : > { %v8611_v30 = vsel %vm3321_vm3, %v3322_v5, %v3320_v46  ;;  %vm3412_vm10 = vcmp.eq.f32.partialorder %v8494_v25, inf  ;;  %v3415_v55 = vand.u32 2147483648, %v8494_v25  ;;  %4905 = vrsqrt.f32 %v8596_v6  ;;  %v4337_v5 = vld [vmem:[%s5220_s18 + $0x7c0] sm:$0xff]  ;;  %v4342_v63 = vld [vmem:[%s5220_s18 + $0x7e8] sm:$0xff] }
 0x2d1   : > { %v3418_v7 = vmul.f32 %v4898_v51, %v8506_v60  ;;  %vm3419_vm11 = vcmp.eq.f32.partialorder %v8506_v60, inf  ;;  %v3433_v40 = vadd.f32 %v3432_v57, %v3402_v13  ;;  %v3472_v62 = vmul.f32 %v3464_v18, %v3464_v18  ;;  %v4343_v57 = vld [vmem:[%s5220_s18 + $0x7f0] sm:$0xff] }
 0x2d2   : > { %v4900_v38 = vpop.eup %4899  ;;  %v3409_v21 = vsel %vm3407_vm9, %v3408_v36, %v3406_v9  ;;  %v3473_v56 = vmul.f32 %v3465_v20, %v3465_v20  ;;  %v8618_v43 = vadd.f32 1e-06, %v3471_v8  ;;  %4907 = vrsqrt.f32 %v8600_v12  ;;  %v4335_v36 = vld [vmem:[%s5213_s20 + $0x7f0] sm:$0xff]  ;;  %v4336_v9 = vld [vmem:[%s5213_s20 + $0x7f8] sm:$0xff] }
 0x2d3   : > { %v8624_v14 = vadd.f32 %v3328_v58, %v8555_v32  ;;  %v3413_v48 = vsel %vm3412_vm10, %v8494_v25, %v3411_v16  ;;  %vm3414_vm12 = vcmp.eq.f32.partialorder %v8494_v25, 0.0  ;;  %4909 = vrsqrt.f32 %v8605_v15  ;;  %v4330_v25 = vld [vmem:[%s5213_s20 + $0x7c8] sm:$0xff]  ;;  %v4344_v16 = vld [vmem:[%s5220_s18 + $0x7f8] sm:$0xff] }
 0x2d4   : > { %vm3421_vm13 = vcmp.eq.f32.partialorder %v8506_v60, 0.0  ;;  %v3422_v41 = vand.u32 2147483648, %v8506_v60  ;;  %vm3426_vm14 = vcmp.eq.f32.partialorder %v8513_v19, inf  ;;  %v3429_v28 = vand.u32 2147483648, %v8513_v19 }
 0x2d5   : > { %v3420_v32 = vsel %vm3419_vm11, %v8506_v60, %v3418_v7  ;;  %v3425_v35 = vmul.f32 %v4900_v38, %v8513_v19  ;;  %v3434_v53 = vadd.f32 %v3433_v40, %v3409_v21  ;;  %v3565_v17 = vsub.f32 %v4329_v22, %v4337_v5 }
 0x2d6   : > { %v3416_v34 = vsel %vm3414_vm12, %v3415_v55, %v3413_v48  ;;  %v8639_v37 = vadd.f32 1e-06, %v3472_v62  ;;  %v8641_v50 = vadd.f32 1e-06, %v3473_v56  ;;  %4911 = vrsqrt.f32 %v8618_v43 }
 0x2d7   : > { %v4902_v27 = vpop.eup %4901  ;;  %vm3484_vm15 = vcmp.eq.f32.partialorder %v8574_v10, inf  ;;  %vm3486_vm0 = vcmp.eq.f32.partialorder %v8574_v10, 0.0  ;;  %v3487_v26 = vand.u32 2147483648, %v8574_v10  ;;  %vm3491_vm1 = vcmp.eq.f32.partialorder %v8582_v39, inf }
 0x2d8   : > { %v8652_v3 = vsel %vm3421_vm13, %v3422_v41, %v3420_v32  ;;  %v3483_v0 = vmul.f32 %v4902_v27, %v8574_v10  ;;  %vm3493_vm2 = vcmp.eq.f32.partialorder %v8582_v39, 0.0  ;;  %v3566_v49 = vsub.f32 %v4330_v25, %v4338_v44 }
 0x2d9   : > { %v3427_v29 = vsel %vm3426_vm14, %v8513_v19, %v3425_v35  ;;  %vm3428_vm3 = vcmp.eq.f32.partialorder %v8513_v19, 0.0  ;;  %v3435_v1 = vadd.f32 %v3434_v53, %v3416_v34  ;;  %v3494_v60 = vand.u32 2147483648, %v8582_v39 }
 0x2da   : > { %v3567_v31 = vsub.f32 %v4331_v59, %v4339_v4  ;;  %v4904_v42 = vpop.eup %4903  ;;  %v3485_v54 = vsel %vm3484_vm15, %v8574_v10, %v3483_v0  ;;  %4913 = vrsqrt.f32 %v8639_v37  ;;  %v3573_v24 = vmul.f32 %v3565_v17, %v3565_v17 }
 0x2db   : > { %v3574_v2 = vmul.f32 %v3566_v49, %v3566_v49  ;;  %v3490_v45 = vmul.f32 %v4904_v42, %v8582_v39  ;;  %vm3498_vm4 = vcmp.eq.f32.partialorder %v8596_v6, inf  ;;  %4915 = vrsqrt.f32 %v8641_v50 }
 0x2dc   : > { %v3568_v46 = vsub.f32 %v4332_v47, %v4340_v33  ;;  %vm3500_vm5 = vcmp.eq.f32.partialorder %v8596_v6, 0.0  ;;  %v3501_v58 = vand.u32 2147483648, %v8596_v6  ;;  %v3569_v18 = vsub.f32 %v4333_v23, %v4341_v11 }
 0x2dd   : > { %v8678_v51 = vadd.f32 1e-06, %v3573_v24  ;;  %v4906_v13 = vpop.eup %4905  ;;  %v3488_v20 = vsel %vm3486_vm0, %v3487_v26, %v3485_v54  ;;  %v3492_v8 = vsel %vm3491_vm1, %v8582_v39, %v3490_v45  ;;  %v3575_v55 = vmul.f32 %v3567_v31, %v3567_v31 }
 0x2de   : > { %v8687_v7 = vadd.f32 1e-06, %v3574_v2  ;;  %v3495_v40 = vsel %vm3493_vm2, %v3494_v60, %v3492_v8  ;;  %v3497_v62 = vmul.f32 %v4906_v13, %v8596_v6  ;;  %vm3505_vm6 = vcmp.eq.f32.partialorder %v8600_v12, inf }
 0x2df   : > { %v3570_v38 = vsub.f32 %v4334_v52, %v4342_v63  ;;  %v4908_v21 = vpop.eup %4907  ;;  %v3508_v10 = vand.u32 2147483648, %v8600_v12  ;;  %v3571_v56 = vsub.f32 %v4335_v36, %v4343_v57  ;;  %v3576_v22 = vmul.f32 %v3568_v46, %v3568_v46 }
 0x2e0   : > { %4917 = vrsqrt.f32 %v8678_v51  ;;  %v4910_v5 = vpop.eup %4909  ;;  %v3499_v48 = vsel %vm3498_vm4, %v8596_v6, %v3497_v62  ;;  %v3504_v39 = vmul.f32 %v4908_v21, %v8600_v12  ;;  %v3538_v41 = vadd.f32 %v3495_v40, %v3488_v20 }
 0x2e1   : > { %v3572_v32 = vsub.f32 %v4336_v9, %v4344_v16  ;;  %v3502_v35 = vsel %vm3500_vm5, %v3501_v58, %v3499_v48  ;;  %v3577_v53 = vmul.f32 %v3569_v18, %v3569_v18  ;;  %v8701_v25 = vadd.f32 1e-06, %v3575_v55 }
 0x2e2   : > { %4919 = vrsqrt.f32 %v8687_v7  ;;  %v3506_v44 = vsel %vm3505_vm6, %v8600_v12, %v3504_v39  ;;  %vm3507_vm7 = vcmp.eq.f32.partialorder %v8600_v12, 0.0  ;;  %v3511_v17 = vmul.f32 %v4910_v5, %v8605_v15 }
 0x2e3   : > { %v3578_v34 = vmul.f32 %v3570_v38, %v3570_v38  ;;  %v4912_v59 = vpop.eup %4911  ;;  %v3330_v4 = vadd.f32 %v8624_v14, %v8611_v30  ;;  %vm3512_vm8 = vcmp.eq.f32.partialorder %v8605_v15, inf  ;;  %v3579_v6 = vmul.f32 %v3571_v56, %v3571_v56 }
 0x2e4   : > { %v8712_v27 = vadd.f32 1e-06, %v3576_v22  ;;  %v3430_v26 = vsel %vm3428_vm3, %v3429_v28, %v3427_v29  ;;  %v3436_v0 = vadd.f32 %v3435_v1, %v8652_v3  ;;  %v3539_v12 = vadd.f32 %v3538_v41, %v3502_v35 }
 0x2e5   : > { %v3580_v47 = vmul.f32 %v3572_v32, %v3572_v32  ;;  %v3509_v33 = vsel %vm3507_vm7, %v3508_v10, %v3506_v44  ;;  %v3515_v49 = vand.u32 2147483648, %v8605_v15  ;;  %v8720_v60 = vadd.f32 1e-06, %v3577_v53 }
 0x2e6   : > { %4921 = vrsqrt.f32 %v8701_v25  ;;  %v3513_v30 = vsel %vm3512_vm8, %v8605_v15, %v3511_v17  ;;  %vm3514_vm9 = vcmp.eq.f32.partialorder %v8605_v15, 0.0  ;;  %v3518_v14 = vmul.f32 %v4912_v59, %v8618_v43 }
 0x2e7   : > { %v8726_v23 = vadd.f32 1e-06, %v3578_v34  ;;  %v4914_v19 = vpop.eup %4913  ;;  %v3331_v28 = vadd.f32 %v3330_v4, %v8510_v61  ;;  %vm3519_vm10 = vcmp.eq.f32.partialorder %v8618_v43, inf  ;;  %v8730_v3 = vadd.f32 1e-06, %v3579_v6 }
 0x2e8   : > { %4923 = vrsqrt.f32 %v8712_v27  ;;  %v4916_v29 = vpop.eup %4915  ;;  %v3437_v1 = vadd.f32 %v3436_v0, %v3430_v26  ;;  %vm3521_vm11 = vcmp.eq.f32.partialorder %v8618_v43, 0.0  ;;  %v3540_v11 = vadd.f32 %v3539_v12, %v3509_v33 }
 0x2e9   : > { %v8734_v31 = vadd.f32 1e-06, %v3580_v47  ;;  %v3516_v15 = vsel %vm3514_vm9, %v3515_v49, %v3513_v30  ;;  %v3522_v42 = vand.u32 2147483648, %v8618_v43  ;;  %vm3526_vm12 = vcmp.eq.f32.partialorder %v8639_v37, inf }
 0x2ea   : > { %4925 = vrsqrt.f32 %v8720_v60  ;;  %v3520_v61 = vsel %vm3519_vm10, %v8618_v43, %v3518_v14  ;;  %v3525_v54 = vmul.f32 %v4914_v19, %v8639_v37  ;;  %vm3528_vm13 = vcmp.eq.f32.partialorder %v8639_v37, 0.0 }
 0x2eb   : > { %4927 = vrsqrt.f32 %v8726_v23  ;;  %v3529_v24 = vand.u32 2147483648, %v8639_v37  ;;  %v3532_v2 = vmul.f32 %v4916_v29, %v8641_v50  ;;  %vm3533_vm14 = vcmp.eq.f32.partialorder %v8641_v50, inf }
 0x2ec   : > { %4929 = vrsqrt.f32 %v8730_v3  ;;  %v3541_v52 = vadd.f32 %v3540_v11, %v3516_v15  ;;  %vm3591_vm15 = vcmp.eq.f32.partialorder %v8678_v51, inf  ;;  %v3594_v63 = vand.u32 2147483648, %v8678_v51 }
 0x2ed   : > { %v4918_v45 = vpop.eup %4917  ;;  %4931 = vrsqrt.f32 %v8734_v31  ;;  %v3523_v46 = vsel %vm3521_vm11, %v3522_v42, %v3520_v61  ;;  %vm3535_vm0 = vcmp.eq.f32.partialorder %v8641_v50, 0.0  ;;  %vm3593_vm1 = vcmp.eq.f32.partialorder %v8678_v51, 0.0 }
 0x2ee   : > { %v3590_v58 = vmul.f32 %v4918_v45, %v8678_v51  ;;  %v3527_v57 = vsel %vm3526_vm12, %v8639_v37, %v3525_v54  ;;  %v3536_v18 = vand.u32 2147483648, %v8641_v50  ;;  %vm3598_vm2 = vcmp.eq.f32.partialorder %v8687_v7, inf }
 0x2ef   : > { %v4920_v36 = vpop.eup %4919  ;;  %v3601_v13 = vand.u32 2147483648, %v8687_v7  ;;  %v3534_v43 = vsel %vm3533_vm14, %v8641_v50, %v3532_v2  ;;  %vm3600_vm3 = vcmp.eq.f32.partialorder %v8687_v7, 0.0  ;;  %v3542_v9 = vadd.f32 %v3541_v52, %v3523_v46 }
 0x2f0   : > { %v3592_v20 = vsel %vm3591_vm15, %v8678_v51, %v3590_v58  ;;  %v3597_v8 = vmul.f32 %v4920_v36, %v8687_v7  ;;  %v3438_v55 = vadd.f32 %v3437_v1, %v3331_v28  ;;  %v3530_v40 = vsel %vm3528_vm13, %v3529_v24, %v3527_v57 }
 0x2f1   : > { %v3595_v16 = vsel %vm3593_vm1, %v3594_v63, %v3592_v20  ;;  %vm3605_vm4 = vcmp.eq.f32.partialorder %v8701_v25, inf  ;;  %v3537_v21 = vsel %vm3535_vm0, %v3536_v18, %v3534_v43  ;;  %vm3607_vm5 = vcmp.eq.f32.partialorder %v8701_v25, 0.0 }
 0x2f2   : > { %v3599_v62 = vsel %vm3598_vm2, %v8687_v7, %v3597_v8  ;;  %v3608_v51 = vand.u32 2147483648, %v8701_v25  ;;  %vm3612_vm6 = vcmp.eq.f32.partialorder %v8712_v27, inf  ;;  %vm3614_vm7 = vcmp.eq.f32.partialorder %v8712_v27, 0.0 }
 0x2f3   : > { %v4922_v38 = vpop.eup %4921  ;;  %v3602_v10 = vsel %vm3600_vm3, %v3601_v13, %v3599_v62  ;;  %v3543_v7 = vadd.f32 %v3542_v9, %v3530_v40  ;;  %v3615_v5 = vand.u32 2147483648, %v8712_v27  ;;  %vm3619_vm8 = vcmp.eq.f32.partialorder %v8720_v60, inf }
 0x2f4   : > { %v3604_v56 = vmul.f32 %v4922_v38, %v8701_v25  ;;  %v3645_v37 = vadd.f32 %v3602_v10, %v3595_v16  ;;  %vm3621_vm9 = vcmp.eq.f32.partialorder %v8720_v60, 0.0  ;;  %v3622_v39 = vand.u32 2147483648, %v8720_v60 }
 0x2f5   : > { %v4924_v22 = vpop.eup %4923  ;;  %vm3626_vm10 = vcmp.eq.f32.partialorder %v8726_v23, inf  ;;  %vm3628_vm11 = vcmp.eq.f32.partialorder %v8726_v23, 0.0  ;;  %v3629_v35 = vand.u32 2147483648, %v8726_v23  ;;  %vm3633_vm12 = vcmp.eq.f32.partialorder %v8730_v3, inf }
 0x2f6   : > { %v3606_v50 = vsel %vm3605_vm4, %v8701_v25, %v3604_v56  ;;  %v3611_v48 = vmul.f32 %v4924_v22, %v8712_v27  ;;  %vm3635_vm13 = vcmp.eq.f32.partialorder %v8730_v3, 0.0  ;;  %v3544_v4 = vadd.f32 %v3543_v7, %v3537_v21 }
 0x2f7   : > { %v4926_v41 = vpop.eup %4925  ;;  %v3609_v32 = vsel %vm3607_vm5, %v3608_v51, %v3606_v50  ;;  %v3636_v26 = vand.u32 2147483648, %v8730_v3  ;;  %vm3640_vm14 = vcmp.eq.f32.partialorder %v8734_v31, inf  ;;  %v3643_v14 = vand.u32 2147483648, %v8734_v31 }
 0x2f8   : > { %v4928_v53 = vpop.eup %4927  ;;  %v3613_v44 = vsel %vm3612_vm6, %v8712_v27, %v3611_v48  ;;  %v3618_v17 = vmul.f32 %v4926_v41, %v8720_v60  ;;  %v3646_v34 = vadd.f32 %v3645_v37, %v3609_v32  ;;  %vm3642_vm15 = vcmp.eq.f32.partialorder %v8734_v31, 0.0 }
 0x2f9   : > { %v4930_v59 = vpop.eup %4929  ;;  %v3616_v25 = vsel %vm3614_vm7, %v3615_v5, %v3613_v44  ;;  %v3625_v6 = vmul.f32 %v4928_v53, %v8726_v23  ;;  %v3545_v42 = vadd.f32 %v3544_v4, %v3438_v55 }
 0x2fa   : > { %v4932_v0 = vpop.eup %4931  ;;  %v3620_v12 = vsel %vm3619_vm8, %v8720_v60, %v3618_v17  ;;  %v3632_v47 = vmul.f32 %v4930_v59, %v8730_v3  ;;  %v3647_v33 = vadd.f32 %v3646_v34, %v3616_v25 }
 0x2fb   : > { %v3623_v49 = vsel %vm3621_vm9, %v3622_v39, %v3620_v12  ;;  %v3627_v27 = vsel %vm3626_vm10, %v8726_v23, %v3625_v6  ;;  %v3639_v30 = vmul.f32 %v4932_v0, %v8734_v31 }
 0x2fc   : > { %v3630_v19 = vsel %vm3628_vm11, %v3629_v35, %v3627_v27  ;;  %v3634_v28 = vsel %vm3633_vm12, %v8730_v3, %v3632_v47  ;;  %v3648_v60 = vadd.f32 %v3647_v33, %v3623_v49 }
 0x2fd   : > { %v3637_v29 = vsel %vm3635_vm13, %v3636_v26, %v3634_v28  ;;  %v3641_v1 = vsel %vm3640_vm14, %v8734_v31, %v3639_v30 }
 0x2fe   : > { %v3649_v11 = vadd.f32 %v3648_v60, %v3630_v19  ;;  %v3644_v15 = vsel %vm3642_vm15, %v3643_v14, %v3641_v1 }
 0x300   : > { %v3650_v23 = vadd.f32 %v3649_v11, %v3637_v29 }
 0x302   : > { %v3651_v61 = vadd.f32 %v3650_v23, %v3644_v15 }
 0x304   : > { %v3652_v54 = vadd.f32 %v3651_v61, %v3545_v42 }
 0x306   : > { %3655 = vst [vmem:[%s219_s28] sm:$0xff] %v3652_v54 }
 0x307   : > { %5002 = shalt.err (!%p4999_p7)
}
 0x308   : > { %s5003_s12 = scalar_lea.hbm %s3668_s8, 128  ;;  %s5007_s6 = scalar_lea.hbm %s8863_s2, 256 }
 0x309   : > { %p5004_p10 = scmp.ne.s32.totalorder %s3668_s8, %s5003_s12  ;;  %p5008_p3 = scmp.lt.s32.totalorder %s3668_s8, %s8863_s2 }
 0x30a   : > { %p5009_p8 = scmp.lt.s32.totalorder %s5007_s6, %s5003_s12 }
 0x30b   : > { %p5005_p1 = pnand %p5004_p10, %p5146_p9 }
 0x30c   : > { %p5010_p0 = por %p5009_p8, %p5008_p3 }
 0x30d   : > { %p5006_p13 = pneg %p5005_p1 }
 0x30f   : > { %p5011_p12 = pnand %p5010_p0, %p5006_p13 }
 0x311   : > { %5014 = shalt.err (!%p5011_p12)
}
 0x312   : > { %4355 = dma.vmem_to_hbm [thread:$0]  (%p5146_p9), %s3671_s29, 128, %s3668_s8, %s3657_s15  }
 0x313 PF: > { %s3682_s18 = sand.u32 1, %s5053_s9   ;;  %p8870_p2 = scmp.ge.s32.totalorder %s5073_s14, 2 }
 0x314   : > { %s3683_s21 = scalar_lea.sflag [#allocation4], %s3682_s18 }
 0x315   : > { %p4365_p5 = pnand %p8870_p2, %p5153_p11 }
 0x317   : > { %p4366_p6 = pneg %p4365_p5 }
 0x319   : > { %5048 = dma.done.wait (%p4366_p6), %s3683_s21, 128  }
 0x31a   : > { %5050 = vsyncadd (%p4366_p6), %s3683_s21, 4294967168  ;;  %s21_s14 = sadd.s32 1, %s5073_s14   ;;  %s8871_s9 = smov %s5057_s10 }
 0x31b   : > { %p18_p4 = scmp.ge.s32.totalorder %s21_s14, 4   ;;  %s8872_s10 = smov %s5061_s11 }
 0x31c   : > { %s8873_s11 = smov %s5151_s23  ;;  %s8874_s12 = smov %s5069_s13 }
 0x31d   : > { %s8875_s13 = smov %s8877_s17  ;;  %20 = sbr.rel (!%p18_p4) target bundleno = 8 (0x8), region = 154 }
 0x322   :  { %3688 = vsyncpa [#allocation3], 1 }
 0x323   :  { %3690 = vsyncpa [#allocation3 + $0x1], 1 }
 0x324   :  { %3691 = vsyncpa [#allocation6], 1 }
 0x325   :  { %3693 = vsyncpa [#allocation6 + $0x1], 1 }
 0x326   :  { %3694 = vsyncpa [#allocation4], 1 }
 0x327   :  { %3696 = vsyncpa [#allocation4 + $0x1], 1 }

</bundles_post_ra>
